<compile_context>
chip_gen: v6e
topology: v6e:2x2x1
jax: 0.10.0
libtpu: 0.0.40
codegen_flags: <defaults>
</compile_context>

<pallas_src>
import numpy as np
import jax
import jax.numpy as jnp
from jax import lax
from jax.experimental import pallas as pl
from jax.experimental.pallas import tpu as pltpu

# ---------------- model dimensions (docvec NRMS) -----------------------------
H = 8                     # history length
D = 32                    # doc-vector dim
HEADS = 4
HEAD_DIM = 8
HID = HEADS * HEAD_DIM    # 32 news/user representation dim
ATT = 16                  # additive-attention hidden dim
SCALE = 1.0 / float(HEAD_DIM) ** 0.5

# ---------------- kernel tiling -----------------------------------------------
BT = 16                   # users per grid step -> BT*H = 128 MXU-native rows
R = BT * H                # 128 history rows per tile
RT = R + BT               # 144 rows per tile: history rows then candidate rows
NH = HEADS * R            # 512 attention rows, ordered (head, user, query)
LANES = 128
NEG = -1e30

# ---------------- packed weight/constant slab layout (row offsets % 8 == 0) ---
OFF_WN = 0                            # (D, HID)
OFF_BN = OFF_WN + D                   # 32    (1, HID)
OFF_WQKV = OFF_BN + 8                 # 40    (HID, 3*HID)
OFF_BQKV = OFF_WQKV + HID             # 72    (1, 3*HID)
OFF_WA = OFF_BQKV + 8                 # 80    (HID, ATT)
OFF_BA = OFF_WA + HID                 # 112   (1, ATT)
OFF_QA = OFF_BA + 8                   # 120   (1, ATT)
OFF_HMASK = OFF_QA + 8                # 128   (NH, HID) 0/1 head-feature mask
OFF_SBIAS = OFF_HMASK + NH            # 640   (NH, R)   same-user additive bias
OFF_PBIAS = OFF_SBIAS + NH            # 1152  (BT, R)   pooling additive bias
SLAB_ROWS = OFF_PBIAS + BT            # 1168  (multiple of 8)


def _constant_masks():
    """Precomputed constants (numpy, trace-time) packed into the slab."""
    rows = np.arange(NH)
    head_of_row = rows // R                           # attention rows: (head, user, query)
    cols_hid = np.arange(HID)
    head_mask = (head_of_row[:, None] == cols_hid[None, :] // HEAD_DIM
                 ).astype(np.float32)                                      # (NH, HID)
    row_user = (rows % R) // H
    lane_user = np.arange(R) // H
    score_bias = np.where(row_user[:, None] == lane_user[None, :],
                          0.0, NEG).astype(np.float32)                     # (NH, R)
    pool_bias = np.where(np.arange(BT)[:, None] == lane_user[None, :],
                         0.0, NEG).astype(np.float32)                      # (BT, R)
    return head_mask, score_bias, pool_bias


_HEAD_MASK, _SCORE_BIAS, _POOL_BIAS = _constant_masks()


def pack_slab(p):
    """One (8,128)-aligned f32 slab holding every weight, bias and mask."""
    wqkv = jnp.concatenate([p["wq"] * SCALE, p["wk"], p["wv"]], axis=1)   # (HID, 96)
    bqkv = jnp.concatenate([p["bq"] * SCALE, p["bk"], p["bv"]], axis=1)   # (1, 96)
    slab = jnp.zeros((SLAB_ROWS, LANES), jnp.float32)
    slab = slab.at[OFF_WN:OFF_WN + D, :HID].set(p["wn"])
    slab = slab.at[OFF_BN:OFF_BN + 1, :HID].set(p["bn"])
    slab = slab.at[OFF_WQKV:OFF_WQKV + HID, :3 * HID].set(wqkv)
    slab = slab.at[OFF_BQKV:OFF_BQKV + 1, :3 * HID].set(bqkv)
    slab = slab.at[OFF_WA:OFF_WA + HID, :ATT].set(p["wa"])
    slab = slab.at[OFF_BA:OFF_BA + 1, :ATT].set(p["ba"])
    slab = slab.at[OFF_QA:OFF_QA + 1, :ATT].set(p["qa"])
    slab = slab.at[OFF_HMASK:OFF_HMASK + NH, :HID].set(jnp.asarray(_HEAD_MASK))
    slab = slab.at[OFF_SBIAS:OFF_SBIAS + NH, :R].set(jnp.asarray(_SCORE_BIAS))
    slab = slab.at[OFF_PBIAS:OFF_PBIAS + BT, :R].set(jnp.asarray(_POOL_BIAS))
    return slab


# ----------------------------------------------------------------------------
# Pallas kernel: one grid step scores BT users against their candidates.
# ----------------------------------------------------------------------------
def nrms_scorer_kernel(x_ref, w_ref, out_ref):
    f32 = jnp.float32

    # ---- static slices of the packed slab (single resident DMA) -------------
    wn = w_ref[OFF_WN:OFF_WN + D, 0:HID]
    bn = w_ref[OFF_BN:OFF_BN + 1, 0:HID]
    wqkv = w_ref[OFF_WQKV:OFF_WQKV + HID, 0:3 * HID]
    bqkv = w_ref[OFF_BQKV:OFF_BQKV + 1, 0:3 * HID]
    wa = w_ref[OFF_WA:OFF_WA + HID, 0:ATT]
    ba = w_ref[OFF_BA:OFF_BA + 1, 0:ATT]
    qa = w_ref[OFF_QA:OFF_QA + 1, 0:ATT]
    hmask = w_ref[OFF_HMASK:OFF_HMASK + NH, 0:HID]     # (NH, HID)
    sbias = w_ref[OFF_SBIAS:OFF_SBIAS + NH, 0:R]       # (NH, R)
    pbias = w_ref[OFF_PBIAS:OFF_PBIAS + BT, 0:R]       # (BT, R)

    # ---- fused news encoder: history + candidate rows in ONE matmul ---------
    x = x_ref[...]                                                    # (RT, D)
    rep = jnp.maximum(jnp.dot(x, wn, preferred_element_type=f32) + bn, 0.0)
    hrep = rep[0:R, :]                                                # (R, HID)
    news = rep[R:RT, :]                                               # (BT, HID)

    # ---- fused Q/K/V projection (1/sqrt(head_dim) already folded into Wq) ---
    qkv = jnp.dot(hrep, wqkv, preferred_element_type=f32) + bqkv      # (R, 3*HID)
    q = qkv[:, 0:HID]
    k = qkv[:, HID:2 * HID]
    v = qkv[:, 2 * HID:3 * HID]

    # ---- multi-head self-attention -------------------------------------------
    # Rows ordered (head, user, query): q replicated per head by a sublane-tile
    # concatenate, head feature blocks picked by a precomputed 0/1 mask, and
    # cross-user key lanes suppressed by a precomputed -1e30 additive bias.
    qe = jnp.concatenate([q] * HEADS, axis=0) * hmask                 # (NH, HID)
    s = lax.dot_general(qe, k, (((1,), (1,)), ((), ())),
                        preferred_element_type=f32) + sbias           # (NH, R)
    s = s - jnp.max(s, axis=-1, keepdims=True)
    p = jnp.exp(s)
    p = p / jnp.sum(p, axis=-1, keepdims=True)                        # exact divide
    o2 = jnp.dot(p, v, preferred_element_type=f32) * hmask            # (NH, HID)
    attn = o2[0:R, :]                                                 # combine heads:
    for hh in range(1, HEADS):                                        # slice adds, no
        attn = attn + o2[hh * R:(hh + 1) * R, :]                      # layout matmul

    # ---- additive attention pooling -------------------------------------------
    e = jnp.tanh(jnp.dot(attn, wa, preferred_element_type=f32) + ba)  # (R, ATT)
    sc = lax.dot_general(qa, e, (((1,), (1,)), ((), ())),
                         preferred_element_type=f32)                  # (1, R) lane-dense
    sc = jnp.broadcast_to(sc, (BT, R)) + pbias                        # (BT, R)
    sc = sc - jnp.max(sc, axis=-1, keepdims=True)
    pw = jnp.exp(sc)
    pw = pw / jnp.sum(pw, axis=-1, keepdims=True)                     # exact divide
    user = jnp.dot(pw, attn, preferred_element_type=f32)              # (BT, HID)

    # ---- candidate . user + exact sigmoid (ranking-safe) ----------------------
    prod = news * user                                                # (BT, HID)
    ones = jnp.ones((1, HID), f32)
    logit = lax.dot_general(ones, prod, (((1,), (1,)), ((), ())),
                            preferred_element_type=f32)               # (1, BT)
    sig = 1.0 / (1.0 + jnp.exp(-logit))
    out_ref[...] = jnp.broadcast_to(sig, (8, BT))                     # full-sublane store


# ----------------------------------------------------------------------------
# Wrapper
# ----------------------------------------------------------------------------
def nrms_score(his_input_title, pred_input_title_one, params):
    B = his_input_title.shape[0]
    assert his_input_title.shape[1:] == (H, D)
    cand = pred_input_title_one.reshape(B, D)     # mirrors .view(B, F) in torch

    num_tiles = (B + BT - 1) // BT
    Bp = num_tiles * BT
    pad = Bp - B
    his_p = jnp.pad(his_input_title, ((0, pad), (0, 0), (0, 0)))
    cand_p = jnp.pad(cand, ((0, pad), (0, 0)))

    # per tile: BT*H history rows followed by BT candidate rows (news-encoder fusion)
    his_t = his_p.reshape(num_tiles, BT * H, D)
    cand_t = cand_p.reshape(num_tiles, BT, D)
    xcat = jnp.concatenate([his_t, cand_t], axis=1).reshape(num_tiles * RT, D)

    slab = pack_slab(params)

    out = pl.pallas_call(
        nrms_scorer_kernel,
        out_shape=jax.ShapeDtypeStruct((num_tiles * 8, BT), jnp.float32),
        grid=(num_tiles,),
        in_specs=[
            pl.BlockSpec((RT, D), lambda i: (i, 0)),             # per-tile doc vectors
            pl.BlockSpec((SLAB_ROWS, LANES), lambda i: (0, 0)),  # resident weight slab
        ],
        out_specs=pl.BlockSpec((8, BT), lambda i: (i, 0)),
        compiler_params=pltpu.CompilerParams(
            dimension_semantics=("parallel",),                   # megacore / v7x 2-TC
            vmem_limit_bytes=32 * 1024 * 1024,                   # safe on v5e/v6e/v7x
        ),
    )(xcat, slab)

    scores = out.reshape(num_tiles, 8, BT)[:, 0, :].reshape(Bp)
    return scores[:B]


# ----------------------------------------------------------------------------
# Pure-JAX reference (for correctness check)
# ----------------------------------------------------------------------------
def nrms_score_ref(his, pred_one, p):
    Bc = his.shape[0]
    cand = pred_one.reshape(Bc, D)

    def news_enc(x):
        return jax.nn.relu(x @ p["wn"] + p["bn"])

    hrep = news_enc(his)                                            # (B, H, HID)
    q = (hrep @ p["wq"] + p["bq"]).reshape(Bc, H, HEADS, HEAD_DIM)
    k = (hrep @ p["wk"] + p["bk"]).reshape(Bc, H, HEADS, HEAD_DIM)
    v = (hrep @ p["wv"] + p["bv"]).reshape(Bc, H, HEADS, HEAD_DIM)
    s = jnp.einsum("bqhd,bkhd->bhqk", q, k) / (HEAD_DIM ** 0.5)
    a = jax.nn.softmax(s, axis=-1)
    o = jnp.einsum("bhqk,bkhd->bqhd", a, v).reshape(Bc, H, HID)
    e = jnp.tanh(o @ p["wa"] + p["ba"])
    att = jax.nn.softmax(jnp.sum(e * p["qa"], axis=-1), axis=-1)    # (B, H)
    user = jnp.einsum("bh,bhd->bd", att, o)                         # (B, HID)
    news = news_enc(cand)                                           # (B, HID)
    return jax.nn.sigmoid(jnp.sum(news * user, axis=-1))            # (B,)


# ----------------------------------------------------------------------------
def init_params(key):
    ks = jax.random.split(key, 11)
    s = 0.1
    f32 = jnp.float32
    return {
        "wn": jax.random.normal(ks[0], (D, HID), f32) * s,
        "bn": jax.random.normal(ks[1], (1, HID), f32) * 0.01,
        "wq": jax.random.normal(ks[2], (HID, HID), f32) * s,
        "bq": jax.random.normal(ks[3], (1, HID), f32) * 0.01,
        "wk": jax.random.normal(ks[4], (HID, HID), f32) * s,
        "bk": jax.random.normal(ks[5], (1, HID), f32) * 0.01,
        "wv": jax.random.normal(ks[6], (HID, HID), f32) * s,
        "bv": jax.random.normal(ks[7], (1, HID), f32) * 0.01,
        "wa": jax.random.normal(ks[8], (HID, ATT), f32) * s,
        "ba": jax.random.normal(ks[9], (1, ATT), f32) * 0.01,
        "qa": jax.random.normal(ks[10], (1, ATT), f32) * s,
    }


if __name__ == "__main__":
    key = jax.random.PRNGKey(0)
    k_his, k_pred, k_param, k_his2, k_pred2 = jax.random.split(key, 5)
    params = init_params(k_param)
    score_fn = jax.jit(nrms_score)

    # small shapes matching the module spec: B=2 users, 1 candidate each
    B0 = 2
    his_input_title = jax.random.normal(k_his, (B0, H, D), jnp.float32)
    pred_input_title_one = jax.random.normal(k_pred, (B0, 1, D), jnp.float32)
    out = jax.block_until_ready(score_fn(his_input_title, pred_input_title_one, params))
    ref = nrms_score_ref(his_input_title, pred_input_title_one, params)
    assert out.shape == (B0,)
    # tolerance covers XLA's default (bf16-pass) f32 matmul precision in the
    # reference vs. the kernel's MXU f32 path; all kernel divides are exact.
    assert jnp.allclose(out, ref, atol=5e-3, rtol=5e-3), (out, ref)

    # larger batch exercising several "parallel" grid tiles plus tail padding
    B1 = 40
    his1 = jax.random.normal(k_his2, (B1, H, D), jnp.float32)
    pred1 = jax.random.normal(k_pred2, (B1, 1, D), jnp.float32)
    out1 = jax.block_until_ready(score_fn(his1, pred1, params))
    ref1 = nrms_score_ref(his1, pred1, params)
    assert out1.shape == (B1,)
    assert jnp.allclose(out1, ref1, atol=5e-3, rtol=5e-3), (out1, ref1)

    print("KERNEL_OK")
</pallas_src>

<mosaic_0001>
module attributes {stable_mosaic.version = 11 : i64} {
  func.func @nrms_scorer_kernel(%arg0: i32, %arg1: memref<144x32xf32, #tpu.memory_space<vmem>>, %arg2: memref<1168x128xf32, #tpu.memory_space<vmem>>, %arg3: memref<8x16xf32, #tpu.memory_space<vmem>>) attributes {dimension_semantics = [#tpu.dimension_semantics<parallel>], iteration_bounds = array<i64: 1>, scalar_prefetch = 0 : i64, scratch_operands = 0 : i64, tpu.core_type = #tpu.core_type<tc>, window_params = [{transform_indices = @transform_0, window_bounds = array<i64: 144, 32>}, {pipeline_mode = #tpu.pipeline_mode<synchronous>, transform_indices = @transform_1, window_bounds = array<i64: 1168, 128>}, {transform_indices = @transform_2, window_bounds = array<i64: 8, 16>}]} {
    %c0 = arith.constant 0 : index
    %c0_0 = arith.constant 0 : index
    %0 = vector.load %arg2[%c0, %c0_0] : memref<1168x128xf32, #tpu.memory_space<vmem>>, vector<32x32xf32>
    %c32 = arith.constant 32 : index
    %c0_1 = arith.constant 0 : index
    %1 = vector.load %arg2[%c32, %c0_1] : memref<1168x128xf32, #tpu.memory_space<vmem>>, vector<1x32xf32>
    %c40 = arith.constant 40 : index
    %c0_2 = arith.constant 0 : index
    %2 = vector.load %arg2[%c40, %c0_2] : memref<1168x128xf32, #tpu.memory_space<vmem>>, vector<32x96xf32>
    %c72 = arith.constant 72 : index
    %c0_3 = arith.constant 0 : index
    %3 = vector.load %arg2[%c72, %c0_3] : memref<1168x128xf32, #tpu.memory_space<vmem>>, vector<1x96xf32>
    %c80 = arith.constant 80 : index
    %c0_4 = arith.constant 0 : index
    %4 = vector.load %arg2[%c80, %c0_4] : memref<1168x128xf32, #tpu.memory_space<vmem>>, vector<32x16xf32>
    %c112 = arith.constant 112 : index
    %c0_5 = arith.constant 0 : index
    %5 = vector.load %arg2[%c112, %c0_5] : memref<1168x128xf32, #tpu.memory_space<vmem>>, vector<1x16xf32>
    %c120 = arith.constant 120 : index
    %c0_6 = arith.constant 0 : index
    %6 = vector.load %arg2[%c120, %c0_6] : memref<1168x128xf32, #tpu.memory_space<vmem>>, vector<1x16xf32>
    %c128 = arith.constant 128 : index
    %c0_7 = arith.constant 0 : index
    %7 = vector.load %arg2[%c128, %c0_7] : memref<1168x128xf32, #tpu.memory_space<vmem>>, vector<512x32xf32>
    %c640 = arith.constant 640 : index
    %c0_8 = arith.constant 0 : index
    %8 = vector.load %arg2[%c640, %c0_8] : memref<1168x128xf32, #tpu.memory_space<vmem>>, vector<512x128xf32>
    %c1152 = arith.constant 1152 : index
    %c0_9 = arith.constant 0 : index
    %9 = vector.load %arg2[%c1152, %c0_9] : memref<1168x128xf32, #tpu.memory_space<vmem>>, vector<16x128xf32>
    %c0_10 = arith.constant 0 : index
    %c0_11 = arith.constant 0 : index
    %10 = vector.load %arg1[%c0_10, %c0_11] : memref<144x32xf32, #tpu.memory_space<vmem>>, vector<144x32xf32>
    %cst = arith.constant dense<0.000000e+00> : vector<144x32xf32>
    %11 = tpu.matmul %10, %0, %cst {dimension_numbers = #tpu.dot_dimension_numbers<[1], [0], [0], [1], [0, 0, 1, 1], [], []>} : vector<144x32xf32>, vector<32x32xf32>, vector<144x32xf32> -> vector<144x32xf32>
    %12 = vector.broadcast %1 : vector<1x32xf32> to vector<144x32xf32>
    %13 = arith.addf %11, %12 : vector<144x32xf32>
    %cst_12 = arith.constant 0.000000e+00 : f32
    %14 = vector.broadcast %cst_12 : f32 to vector<144x32xf32>
    %15 = arith.maximumf %13, %14 : vector<144x32xf32>
    %16 = vector.extract_strided_slice %15 {offsets = [0, 0], sizes = [128, 32], strides = [1, 1]} : vector<144x32xf32> to vector<128x32xf32>
    %17 = vector.extract_strided_slice %15 {offsets = [128, 0], sizes = [16, 32], strides = [1, 1]} : vector<144x32xf32> to vector<16x32xf32>
    %cst_13 = arith.constant dense<0.000000e+00> : vector<128x96xf32>
    %18 = tpu.matmul %16, %2, %cst_13 {dimension_numbers = #tpu.dot_dimension_numbers<[1], [0], [0], [1], [0, 0, 1, 1], [], []>} : vector<128x32xf32>, vector<32x96xf32>, vector<128x96xf32> -> vector<128x96xf32>
    %19 = vector.broadcast %3 : vector<1x96xf32> to vector<128x96xf32>
    %20 = arith.addf %18, %19 : vector<128x96xf32>
    %21 = vector.extract_strided_slice %20 {offsets = [0, 0], sizes = [128, 32], strides = [1, 1]} : vector<128x96xf32> to vector<128x32xf32>
    %22 = vector.extract_strided_slice %20 {offsets = [0, 32], sizes = [128, 32], strides = [1, 1]} : vector<128x96xf32> to vector<128x32xf32>
    %23 = vector.extract_strided_slice %20 {offsets = [0, 64], sizes = [128, 32], strides = [1, 1]} : vector<128x96xf32> to vector<128x32xf32>
    %24 = tpu.concatenate %21, %21, %21, %21 in 0 : vector<128x32xf32>, vector<128x32xf32>, vector<128x32xf32>, vector<128x32xf32> -> vector<512x32xf32>
    %25 = arith.mulf %24, %7 : vector<512x32xf32>
    %cst_14 = arith.constant dense<0.000000e+00> : vector<512x128xf32>
    %26 = tpu.matmul %25, %22, %cst_14 {dimension_numbers = #tpu.dot_dimension_numbers<[1], [1], [0], [0], [0, 0, 1, 0], [], []>} : vector<512x32xf32>, vector<128x32xf32>, vector<512x128xf32> -> vector<512x128xf32>
    %27 = arith.addf %26, %8 : vector<512x128xf32>
    %cst_15 = arith.constant dense<0xFF800000> : vector<512xf32>
    %28 = vector.multi_reduction <maximumf>, %27, %cst_15 [1] : vector<512x128xf32> to vector<512xf32>
    %29 = vector.shape_cast %28 : vector<512xf32> to vector<512x1xf32>
    %30 = vector.broadcast %29 : vector<512x1xf32> to vector<512x128xf32>
    %31 = arith.subf %27, %30 : vector<512x128xf32>
    %32 = math.exp %31 : vector<512x128xf32>
    %cst_16 = arith.constant dense<0.000000e+00> : vector<512xf32>
    %33 = vector.multi_reduction <add>, %32, %cst_16 [1] : vector<512x128xf32> to vector<512xf32>
    %34 = vector.shape_cast %33 : vector<512xf32> to vector<512x1xf32>
    %35 = vector.broadcast %34 : vector<512x1xf32> to vector<512x128xf32>
    %36 = arith.divf %32, %35 : vector<512x128xf32>
    %cst_17 = arith.constant dense<0.000000e+00> : vector<512x32xf32>
    %37 = tpu.matmul %36, %23, %cst_17 {dimension_numbers = #tpu.dot_dimension_numbers<[1], [0], [0], [1], [0, 0, 1, 1], [], []>} : vector<512x128xf32>, vector<128x32xf32>, vector<512x32xf32> -> vector<512x32xf32>
    %38 = arith.mulf %37, %7 : vector<512x32xf32>
    %39 = vector.extract_strided_slice %38 {offsets = [0, 0], sizes = [128, 32], strides = [1, 1]} : vector<512x32xf32> to vector<128x32xf32>
    %40 = vector.extract_strided_slice %38 {offsets = [128, 0], sizes = [128, 32], strides = [1, 1]} : vector<512x32xf32> to vector<128x32xf32>
    %41 = arith.addf %39, %40 : vector<128x32xf32>
    %42 = vector.extract_strided_slice %38 {offsets = [256, 0], sizes = [128, 32], strides = [1, 1]} : vector<512x32xf32> to vector<128x32xf32>
    %43 = arith.addf %41, %42 : vector<128x32xf32>
    %44 = vector.extract_strided_slice %38 {offsets = [384, 0], sizes = [128, 32], strides = [1, 1]} : vector<512x32xf32> to vector<128x32xf32>
    %45 = arith.addf %43, %44 : vector<128x32xf32>
    %cst_18 = arith.constant dense<0.000000e+00> : vector<128x16xf32>
    %46 = tpu.matmul %45, %4, %cst_18 {dimension_numbers = #tpu.dot_dimension_numbers<[1], [0], [0], [1], [0, 0, 1, 1], [], []>} : vector<128x32xf32>, vector<32x16xf32>, vector<128x16xf32> -> vector<128x16xf32>
    %47 = vector.broadcast %5 : vector<1x16xf32> to vector<128x16xf32>
    %48 = arith.addf %46, %47 : vector<128x16xf32>
    %49 = math.tanh %48 : vector<128x16xf32>
    %cst_19 = arith.constant dense<0.000000e+00> : vector<1x128xf32>
    %50 = tpu.matmul %6, %49, %cst_19 {dimension_numbers = #tpu.dot_dimension_numbers<[1], [1], [0], [0], [0, 0, 1, 0], [], []>} : vector<1x16xf32>, vector<128x16xf32>, vector<1x128xf32> -> vector<1x128xf32>
    %51 = vector.shape_cast %50 : vector<1x128xf32> to vector<1x128xf32>
    %52 = vector.broadcast %51 : vector<1x128xf32> to vector<16x128xf32>
    %53 = arith.addf %52, %9 : vector<16x128xf32>
    %cst_20 = arith.constant dense<0xFF800000> : vector<16xf32>
    %54 = vector.multi_reduction <maximumf>, %53, %cst_20 [1] : vector<16x128xf32> to vector<16xf32>
    %55 = vector.shape_cast %54 : vector<16xf32> to vector<16x1xf32>
    %56 = vector.broadcast %55 : vector<16x1xf32> to vector<16x128xf32>
    %57 = arith.subf %53, %56 : vector<16x128xf32>
    %58 = math.exp %57 : vector<16x128xf32>
    %cst_21 = arith.constant dense<0.000000e+00> : vector<16xf32>
    %59 = vector.multi_reduction <add>, %58, %cst_21 [1] : vector<16x128xf32> to vector<16xf32>
    %60 = vector.shape_cast %59 : vector<16xf32> to vector<16x1xf32>
    %61 = vector.broadcast %60 : vector<16x1xf32> to vector<16x128xf32>
    %62 = arith.divf %58, %61 : vector<16x128xf32>
    %cst_22 = arith.constant dense<0.000000e+00> : vector<16x32xf32>
    %63 = tpu.matmul %62, %45, %cst_22 {dimension_numbers = #tpu.dot_dimension_numbers<[1], [0], [0], [1], [0, 0, 1, 1], [], []>} : vector<16x128xf32>, vector<128x32xf32>, vector<16x32xf32> -> vector<16x32xf32>
    %64 = arith.mulf %17, %63 : vector<16x32xf32>
    %cst_23 = arith.constant 1.000000e+00 : f32
    %65 = vector.broadcast %cst_23 : f32 to vector<1x32xf32>
    %cst_24 = arith.constant dense<0.000000e+00> : vector<1x16xf32>
    %66 = tpu.matmul %65, %64, %cst_24 {dimension_numbers = #tpu.dot_dimension_numbers<[1], [1], [0], [0], [0, 0, 1, 0], [], []>} : vector<1x32xf32>, vector<16x32xf32>, vector<1x16xf32> -> vector<1x16xf32>
    %cst_25 = arith.constant 0.000000e+00 : f32
    %67 = vector.broadcast %cst_25 : f32 to vector<1x16xf32>
    %68 = arith.subf %67, %66 : vector<1x16xf32>
    %69 = math.exp %68 : vector<1x16xf32>
    %cst_26 = arith.constant 1.000000e+00 : f32
    %70 = vector.broadcast %cst_26 : f32 to vector<1x16xf32>
    %71 = arith.addf %70, %69 : vector<1x16xf32>
    %cst_27 = arith.constant 1.000000e+00 : f32
    %72 = vector.broadcast %cst_27 : f32 to vector<1x16xf32>
    %73 = arith.divf %72, %71 : vector<1x16xf32>
    %74 = vector.shape_cast %73 : vector<1x16xf32> to vector<1x16xf32>
    %75 = vector.broadcast %74 : vector<1x16xf32> to vector<8x16xf32>
    %c0_28 = arith.constant 0 : index
    %c0_29 = arith.constant 0 : index
    %76 = vector.load %arg3[%c0_28, %c0_29] : memref<8x16xf32, #tpu.memory_space<vmem>>, vector<8x16xf32>
    tpu.vector_store %arg3[%c0_28, %c0_29], %75 {strides = array<i32>} : memref<8x16xf32, #tpu.memory_space<vmem>>, vector<8x16xf32>,
    return
  }
  func.func @transform_0(%arg0: i32) -> (i32, i32) {
    %c0_i32 = arith.constant 0 : i32
    %c0_i32_0 = arith.constant 0 : i32
    return %arg0, %c0_i32 : i32, i32
  }
  func.func @transform_1(%arg0: i32) -> (i32, i32) {
    %c0_i32 = arith.constant 0 : i32
    %c0_i32_0 = arith.constant 0 : i32
    %c0_i32_1 = arith.constant 0 : i32
    return %c0_i32, %c0_i32_0 : i32, i32
  }
  func.func @transform_2(%arg0: i32) -> (i32, i32) {
    %c0_i32 = arith.constant 0 : i32
    %c0_i32_0 = arith.constant 0 : i32
    return %arg0, %c0_i32 : i32, i32
  }
}

</mosaic_0001>

<bundles_post_ra>
// kernel: nrms_score.1
= control target key start
LH: loop header
LB: loop body
LE: loop exit
PB: predicated region body
PF: predicated region fallthrough
CT: control target
= control target key end

     0   :  { %vm179_vm0 = vcmask 261120   ;;  %s4192_s11 = smov 64   ;;  %vm4194_vm1 = vmmov 0   ;;  %vm2659_vm2 = vcmask 130048   ;;  %s5988_s1 = inlined_call_operand.vmem [shape: f32[1168,128], index: 1, kind: input, shape index: {}]   ;;  %s5989_s0 = inlined_call_operand.vmem [shape: f32[144,32], index: 0, kind: input, shape index: {}]   ;;  %s5990_s2 = inlined_call_operand.vmem [shape: f32[8,16], index: 2, kind: output, shape index: {}]  }
   0x1   :  { %v14_v0 = vld [vmem:[%s5988_s1 + $0x18] sm:$0xff]  ;;  %v13_v1 = vld [vmem:[%s5988_s1 + $0x10] sm:$0xff]  ;;  %v157_v2 = vld [vmem:[%s5989_s0] sm:$0xff] }
   0x2   :  { %3389 = vmatprep.subr.mxu0 %v14_v0  ;;  %v12_v3 = vld [vmem:[%s5988_s1 + $0x8] sm:$0xff]  ;;  %3397 = vmatprep.mubr.msk.f32.mxu0 %vm179_vm0, %v157_v2  ;;  %v11_v4 = vld [vmem:[%s5988_s1] sm:$0xff]  ;;  %v159_v6 = vld [vmem:[%s5989_s0 + $0x10] sm:$0xff] }
   0x3   :  { %3390 = vmatpush3.msra.mxu0 %v14_v0  ;;  %v158_v5 = vld [vmem:[%s5989_s0 + $0x8] sm:$0xff]  ;;  %v160_v7 = vld [vmem:[%s5989_s0 + $0x18] sm:$0xff]  ;;  %v161_v8 = vld [vmem:[%s5989_s0 + $0x20] sm:$0xff] }
   0x4   :  { %3391 = vmatprep.subr.mxu0 %v13_v1  ;;  %v162_v9 = vld [vmem:[%s5989_s0 + $0x28] sm:$0xff]  ;;  %v163_v10 = vld [vmem:[%s5989_s0 + $0x30] sm:$0xff]  ;;  %v164_v11 = vld [vmem:[%s5989_s0 + $0x38] sm:$0xff] }
   0x5   :  { %3392 = vmatpush3.msra.mxu0 %v13_v1  ;;  %v165_v12 = vld [vmem:[%s5989_s0 + $0x40] sm:$0xff]  ;;  %v166_v13 = vld [vmem:[%s5989_s0 + $0x48] sm:$0xff]  ;;  %v167_v14 = vld [vmem:[%s5989_s0 + $0x50] sm:$0xff] }
   0x6   :  { %3393 = vmatprep.subr.mxu0 %v12_v3  ;;  %v168_v15 = vld [vmem:[%s5989_s0 + $0x58] sm:$0xff]  ;;  %v169_v16 = vld [vmem:[%s5989_s0 + $0x60] sm:$0xff]  ;;  %v170_v17 = vld [vmem:[%s5989_s0 + $0x68] sm:$0xff] }
   0x7   :  { %3394 = vmatpush3.msra.mxu0 %v12_v3  ;;  %v171_v18 = vld [vmem:[%s5989_s0 + $0x70] sm:$0xff]  ;;  %v172_v19 = vld [vmem:[%s5989_s0 + $0x78] sm:$0xff]  ;;  %v19_v20 = vld [vmem:[%s5988_s1 + $0x40] sm:$0xff] }
   0x8   :  { %3395 = vmatprep.subr.mxu0 %v11_v4  ;;  %3424 = vmatprep.subr.mxu1 %v19_v20  ;;  %v18_v21 = vld [vmem:[%s5988_s1 + $0x38] sm:$0xff]  ;;  %v17_v22 = vld [vmem:[%s5988_s1 + $0x30] sm:$0xff]  ;;  %v16_v23 = vld [vmem:[%s5988_s1 + $0x28] sm:$0xff] }
   0x9   :  { %3396 = vmatpush3.msra.mxu0 %v11_v4  ;;  %3425 = vmatpush3.msra.mxu1 %v19_v20  ;;  %v2976_v24 = vld [vmem:[%s5988_s1 + $0x20] ss:$0 sm:$0xff] }
   0xa   :  { %3398 = vmatmul.mubr.msk.f32.vlgmr.msra.gmra.mxu0 %vm179_vm0, %v158_v5  ;;  %3426 = vmatprep.subr.mxu1 %v18_v21 }
   0xb   :  { %3400 = vmatprep.mubr.msk.f32.mxu0 %vm179_vm0, %v159_v6  ;;  %3427 = vmatpush3.msra.mxu1 %v18_v21 }
   0xc   :  { %3428 = vmatprep.subr.mxu1 %v17_v22 }
   0xd   :  { %3429 = vmatpush3.msra.mxu1 %v17_v22 }
   0xe   :  { %3401 = vmatmul.mubr.msk.f32.gmra.mxu0 %vm179_vm0, %v160_v7  ;;  %3430 = vmatprep.subr.mxu1 %v16_v23 }
   0xf   :  { %3403 = vmatprep.mubr.msk.f32.mxu0 %vm179_vm0, %v161_v8  ;;  %3431 = vmatpush3.msra.mxu1 %v16_v23 }
  0x12   :  { %3404 = vmatmul.mubr.msk.f32.gmra.mxu0 %vm179_vm0, %v162_v9  ;;  %v173_v9 = vld [vmem:[%s5989_s0 + $0x80] sm:$0xff] }
  0x13   :  { %3406 = vmatprep.mubr.msk.f32.mxu0 %vm179_vm0, %v163_v10  ;;  %v174_v10 = vld [vmem:[%s5989_s0 + $0x88] sm:$0xff]  ;;  %s4191_s0 = smov 96  }
  0x16   :  { %3407 = vmatmul.mubr.msk.f32.gmra.mxu0 %vm179_vm0, %v164_v11 }
  0x17   :  { %3409 = vmatprep.mubr.msk.f32.mxu0 %vm179_vm0, %v165_v12  ;;  %v2995_v12 = vld [vmem:[%s5988_s1 + $0x48] ss:$0 sm:$0xff] }
  0x1a   :  { %3410 = vmatmul.mubr.msk.f32.gmra.mxu0 %vm179_vm0, %v166_v13 }
  0x1b   :  { %3412 = vmatprep.mubr.msk.f32.mxu0 %vm179_vm0, %v167_v14  ;;  %v27_v14 = vld [vmem:[%s5988_s1 + $0x80] sm:$0xff] }
  0x1e   :  { %3413 = vmatmul.mubr.msk.f32.gmra.mxu0 %vm179_vm0, %v168_v15 }
  0x1f   :  { %3415 = vmatprep.mubr.msk.f32.mxu0 %vm179_vm0, %v169_v16 }
  0x22   :  { %3416 = vmatmul.mubr.msk.f32.gmra.mxu0 %vm179_vm0, %v170_v17 }
  0x23   :  { %3418 = vmatprep.mubr.msk.f32.mxu0 %vm179_vm0, %v171_v18 }
  0x26   :  { %3419 = vmatmul.mubr.msk.f32.gmra.mxu0 %vm179_vm0, %v172_v19 }
  0x27   :  { %3421 = vmatprep.mubr.msk.f32.mxu0 %vm179_vm0, %v173_v9  ;;  %v28_v9 = vld [vmem:[%s5988_s1 + $0x88] sm:$0xff] }
  0x2a   :  { %3422 = vmatmul.mubr.msk.f32.gmra.mxu0 %vm179_vm0, %v174_v10  ;;  %v29_v10 = vld [vmem:[%s5988_s1 + $0x90] sm:$0xff] }
  0xca   :  { %v3399_v25 = vpop.f32.mrf.mxu0 }
  0xcb   :  { %v306_v26 = vadd.f32 %v3399_v25, %v2976_v24 }
  0xcc   :  { %v300_v27 = vpop.f32.mrf.mxu0 }
  0xcd   :  { %v301_v28 = vadd.f32 %v2976_v24, %v300_v27  ;;  %v390_v31 = vmax.f32 %v306_v26, 0.0 }
  0xce   :  { %v3402_v29 = vpop.f32.mrf.mxu0 }
  0xcf   :  { %v389_v30 = vmax.f32 %v301_v28, 0.0  ;;  %v316_v32 = vadd.f32 %v3402_v29, %v2976_v24 }
  0xd0   :  { %v310_v33 = vpop.f32.mrf.mxu0 }
  0xd1   :  { %v311_v34 = vadd.f32 %v2976_v24, %v310_v33  ;;  %3432 = vmatprep.mubr.msk.f32.mxu1 %vm179_vm0, %v389_v30  ;;  %v392_v37 = vmax.f32 %v316_v32, 0.0 }
  0xd2   :  { %v3405_v35 = vpop.f32.mrf.mxu0  ;;  %3433 = vmatmul.mubr.msk.f32.vlgmr.msra.gmra.mxu1 %vm179_vm0, %v390_v31 }
  0xd3   :  { %v391_v36 = vmax.f32 %v311_v34, 0.0  ;;  %v326_v38 = vadd.f32 %v3405_v35, %v2976_v24 }
  0xd4   :  { %v320_v39 = vpop.f32.mrf.mxu0 }
  0xd5   :  { %v321_v40 = vadd.f32 %v2976_v24, %v320_v39  ;;  %3435 = vmatprep.mubr.msk.f32.mxu1 %vm179_vm0, %v391_v36  ;;  %v394_v43 = vmax.f32 %v326_v38, 0.0 }
  0xd6   :  { %v3408_v41 = vpop.f32.mrf.mxu0  ;;  %3436 = vmatmul.mubr.msk.f32.gmra.mxu1 %vm179_vm0, %v392_v37 }
  0xd7   :  { %v393_v42 = vmax.f32 %v321_v40, 0.0  ;;  %v336_v44 = vadd.f32 %v3408_v41, %v2976_v24 }
  0xd8   :  { %v330_v45 = vpop.f32.mrf.mxu0 }
  0xd9   :  { %v331_v46 = vadd.f32 %v2976_v24, %v330_v45  ;;  %3438 = vmatprep.mubr.msk.f32.mxu1 %vm179_vm0, %v393_v42  ;;  %v396_v49 = vmax.f32 %v336_v44, 0.0 }
  0xda   :  { %v3411_v47 = vpop.f32.mrf.mxu0  ;;  %3439 = vmatmul.mubr.msk.f32.gmra.mxu1 %vm179_vm0, %v394_v43 }
  0xdb   :  { %v395_v48 = vmax.f32 %v331_v46, 0.0  ;;  %v346_v50 = vadd.f32 %v3411_v47, %v2976_v24 }
  0xdc   :  { %v340_v51 = vpop.f32.mrf.mxu0 }
  0xdd   :  { %v341_v52 = vadd.f32 %v2976_v24, %v340_v51  ;;  %3441 = vmatprep.mubr.msk.f32.mxu1 %vm179_vm0, %v395_v48  ;;  %v398_v55 = vmax.f32 %v346_v50, 0.0 }
  0xde   :  { %v3414_v53 = vpop.f32.mrf.mxu0  ;;  %3442 = vmatmul.mubr.msk.f32.gmra.mxu1 %vm179_vm0, %v396_v49 }
  0xdf   :  { %v397_v54 = vmax.f32 %v341_v52, 0.0  ;;  %v356_v56 = vadd.f32 %v3414_v53, %v2976_v24 }
  0xe0   :  { %v350_v57 = vpop.f32.mrf.mxu0 }
  0xe1   :  { %v351_v58 = vadd.f32 %v2976_v24, %v350_v57  ;;  %3444 = vmatprep.mubr.msk.f32.mxu1 %vm179_vm0, %v397_v54  ;;  %v400_v61 = vmax.f32 %v356_v56, 0.0 }
  0xe2   :  { %v3417_v59 = vpop.f32.mrf.mxu0  ;;  %3445 = vmatmul.mubr.msk.f32.gmra.mxu1 %vm179_vm0, %v398_v55 }
  0xe3   :  { %v399_v60 = vmax.f32 %v351_v58, 0.0  ;;  %v366_v62 = vadd.f32 %v3417_v59, %v2976_v24 }
  0xe4   :  { %v360_v63 = vpop.f32.mrf.mxu0 }
  0xe5   :  { %v361_v0 = vadd.f32 %v2976_v24, %v360_v63  ;;  %3447 = vmatprep.mubr.msk.f32.mxu1 %vm179_vm0, %v399_v60  ;;  %v402_v3 = vmax.f32 %v366_v62, 0.0 }
  0xe6   :  { %v3420_v1 = vpop.f32.mrf.mxu0  ;;  %3448 = vmatmul.mubr.msk.f32.gmra.mxu1 %vm179_vm0, %v400_v61 }
  0xe7   :  { %v401_v2 = vmax.f32 %v361_v0, 0.0  ;;  %v376_v4 = vadd.f32 %v3420_v1, %v2976_v24 }
  0xe8   :  { %v370_v5 = vpop.f32.mrf.mxu0 }
  0xe9   :  { %v371_v6 = vadd.f32 %v2976_v24, %v370_v5  ;;  %3450 = vmatprep.mubr.msk.f32.mxu1 %vm179_vm0, %v401_v2  ;;  %v404_v8 = vmax.f32 %v376_v4, 0.0 }
  0xea   :  { %3451 = vmatmul.mubr.msk.f32.gmra.mxu1 %vm179_vm0, %v402_v3 }
  0xeb   :  { %v403_v7 = vmax.f32 %v371_v6, 0.0 }
  0xed   :  { %3453 = vmatprep.mubr.msk.f32.mxu1 %vm179_vm0, %v403_v7 }
  0xee   :  { %3454 = vmatmul.mubr.msk.f32.gmra.mxu1 %vm179_vm0, %v404_v8 }
 0x192   :  { %v3434_v11 = vpop.f32.mrf.mxu1 }
 0x193   :  { %v4394_v45 = vadd.f32 %v3434_v11, %v2995_v12 }
 0x194   :  { %v525_v13 = vpop.f32.mrf.mxu1 }
 0x195   :  { %v4332_v15 = vadd.f32 %v2995_v12, %v525_v13 }
 0x196   :  { %v3437_v16 = vpop.f32.mrf.mxu1 }
 0x197   :  { %v604_v17 = vmul.f32 %v4332_v15, %v27_v14  ;;  %v4388_v44 = vadd.f32 %v3437_v16, %v2995_v12  ;;  %v30_v14 = vld [vmem:[%s5988_s1 + $0x98] sm:$0xff]  ;;  %v31_v16 = vld [vmem:[%s5988_s1 + $0xa0] sm:$0xff] }
 0x198   :  { %v535_v18 = vpop.f32.mrf.mxu1 }
 0x199   :  { %3488 = vmatprep.mubr.msk.f32.mxu0 %vm179_vm0, %v604_v17  ;;  %v4380_v42 = vadd.f32 %v2995_v12, %v535_v18  ;;  %v607_v17 = vmul.f32 %v4388_v44, %v30_v14  ;;  %v52_v14 = vld [vmem:[%s5988_s1 + $0x148] sm:$0xff] }
 0x19a   :  { %v3440_v19 = vpop.f32.mrf.mxu1 }
 0x19b   :  { %v4382_v43 = vadd.f32 %v3440_v19, %v2995_v12  ;;  %v606_v13 = vmul.f32 %v4380_v42, %v29_v10  ;;  %v50_v10 = vld [vmem:[%s5988_s1 + $0x138] sm:$0xff] }
 0x19c   :  { %v545_v20 = vpop.f32.mrf.mxu1 }
 0x19d   :  { %v4372_v40 = vadd.f32 %v2995_v12, %v545_v20  ;;  %v32_v20 = vld [vmem:[%s5988_s1 + $0xa8] sm:$0xff] }
 0x19e   :  { %v3443_v21 = vpop.f32.mrf.mxu1 }
 0x19f   :  { %v4374_v41 = vadd.f32 %v3443_v21, %v2995_v12  ;;  %v608_v19 = vmul.f32 %v4372_v40, %v31_v16  ;;  %v33_v21 = vld [vmem:[%s5988_s1 + $0xb0] sm:$0xff] }
 0x1a0   :  { %v555_v22 = vpop.f32.mrf.mxu1  ;;  %v53_v16 = vld [vmem:[%s5988_s1 + $0x150] sm:$0xff] }
 0x1a1   :  { %v4364_v38 = vadd.f32 %v2995_v12, %v555_v22  ;;  %v609_v22 = vmul.f32 %v4382_v43, %v32_v20  ;;  %v55_v20 = vld [vmem:[%s5988_s1 + $0x160] sm:$0xff] }
 0x1a2   :  { %v3446_v23 = vpop.f32.mrf.mxu1 }
 0x1a3   :  { %v4366_v39 = vadd.f32 %v3446_v23, %v2995_v12  ;;  %v610_v23 = vmul.f32 %v4364_v38, %v33_v21 }
 0x1a4   :  { %v565_v24 = vpop.f32.mrf.mxu1 }
 0x1a5   :  { %v4356_v36 = vadd.f32 %v2995_v12, %v565_v24  ;;  %v34_v24 = vld [vmem:[%s5988_s1 + $0xb8] sm:$0xff] }
 0x1a6   :  { %v3449_v25 = vpop.f32.mrf.mxu1 }
 0x1a7   :  { %v4358_v37 = vadd.f32 %v3449_v25, %v2995_v12  ;;  %v35_v25 = vld [vmem:[%s5988_s1 + $0xc0] sm:$0xff] }
 0x1a8   :  { %v575_v26 = vpop.f32.mrf.mxu1 }
 0x1a9   :  { %v4348_v34 = vadd.f32 %v2995_v12, %v575_v26 }
 0x1aa   :  { %v3452_v27 = vpop.f32.mrf.mxu1 }
 0x1ab   :  { %v4336_v28 = vadd.f32 %v3452_v27, %v2995_v12  ;;  %v611_v27 = vmul.f32 %v4374_v41, %v34_v24  ;;  %v57_v24 = vld [vmem:[%s5988_s1 + $0x170] sm:$0xff] }
 0x1ac   :  { %v585_v29 = vpop.f32.mrf.mxu1 }
 0x1ad   :  { %710 = vrot.lane.b32.xlu1 %v4336_v28, %s4191_s0  ;;  %v4340_v31 = vadd.f32 %v2995_v12, %v585_v29  ;;  %v612_v29 = vmul.f32 %v4356_v36, %v35_v25 }
 0x1ae   :  { %v3455_v30 = vpop.f32.mrf.mxu1 }
 0x1af   :  { %v4342_v32 = vadd.f32 %v3455_v30, %v2995_v12  ;;  %v36_v30 = vld [vmem:[%s5988_s1 + $0xc8] sm:$0xff] }
 0x1b0   :  { %v595_v33 = vpop.f32.mrf.mxu1 }
 0x1b1   :  { %714 = vrot.lane.b32.xlu0 %v4342_v32, %s4191_s0  ;;  %708 = vrot.lane.b32.xlu1 %v4340_v31, %s4191_s0  ;;  %v4350_v35 = vadd.f32 %v2995_v12, %v595_v33  ;;  %v605_v12 = vmul.f32 %v4394_v45, %v28_v9  ;;  %v37_v33 = vld [vmem:[%s5988_s1 + $0xd0] sm:$0xff] }
 0x1b5   :  { %712 = vrot.lane.b32.xlu0 %v4350_v35, %s4191_s0  ;;  %704 = vrot.lane.b32.xlu1 %v4348_v34, %s4191_s0 }
 0x1b9   :  { %706 = vrot.lane.b32.xlu0 %v4358_v37, %s4191_s0  ;;  %700 = vrot.lane.b32.xlu1 %v4356_v36, %s4191_s0 }
 0x1bd   :  { %702 = vrot.lane.b32.xlu0 %v4366_v39, %s4191_s0  ;;  %696 = vrot.lane.b32.xlu1 %v4364_v38, %s4191_s0 }
 0x1c1   :  { %698 = vrot.lane.b32.xlu0 %v4374_v41, %s4191_s0  ;;  %692 = vrot.lane.b32.xlu1 %v4372_v40, %s4191_s0 }
 0x1c5   :  { %694 = vrot.lane.b32.xlu0 %v4382_v43, %s4191_s0  ;;  %688 = vrot.lane.b32.xlu1 %v4380_v42, %s4191_s0 }
 0x1c9   :  { %690 = vrot.lane.b32.xlu0 %v4388_v44, %s4191_s0  ;;  %684 = vrot.lane.b32.xlu1 %v4332_v15, %s4191_s0 }
 0x1cd   :  { %686 = vrot.lane.b32.xlu0 %v4394_v45, %s4191_s0  ;;  %1931 = vrot.lane.b32.xlu1 %v4342_v32, %s4192_s11 }
 0x1d1   :  { %1925 = vrot.lane.b32.xlu0 %v4340_v31, %s4192_s11  ;;  %1927 = vrot.lane.b32.xlu1 %v4336_v28, %s4192_s11 }
 0x1d5   :  { %1921 = vrot.lane.b32.xlu0 %v4348_v34, %s4192_s11  ;;  %1923 = vrot.lane.b32.xlu1 %v4358_v37, %s4192_s11 }
 0x1d9   :  { %1917 = vrot.lane.b32.xlu0 %v4356_v36, %s4192_s11  ;;  %1919 = vrot.lane.b32.xlu1 %v4366_v39, %s4192_s11 }
 0x1dd   :  { %1913 = vrot.lane.b32.xlu0 %v4364_v38, %s4192_s11  ;;  %1915 = vrot.lane.b32.xlu1 %v4374_v41, %s4192_s11 }
 0x1e1   :  { %1909 = vrot.lane.b32.xlu0 %v4372_v40, %s4192_s11  ;;  %1911 = vrot.lane.b32.xlu1 %v4382_v43, %s4192_s11 }
 0x1e5   :  { %1905 = vrot.lane.b32.xlu0 %v4380_v42, %s4192_s11  ;;  %1907 = vrot.lane.b32.xlu1 %v4388_v44, %s4192_s11 }
 0x1e9   :  { %1901 = vrot.lane.b32.xlu0 %v4332_v15, %s4192_s11  ;;  %1903 = vrot.lane.b32.xlu1 %v4394_v45, %s4192_s11 }
 0x1ed   :  { %1929 = vrot.lane.b32.xlu0 %v4350_v35, %s4192_s11 }
 0x21f   :  { %v711_v46 = vpop.permute.xlu1 %710 }
 0x223   :  { %v715_v47 = vpop.permute.xlu0 %714  ;;  %v709_v48 = vpop.permute.xlu1 %708 }
 0x224   :  { %3456 = vmatprep.subr.msk.mxu0 %vm179_vm0, %v715_v47 }
 0x225   :  { %3457 = vmatpush3.xpose.msk.msra.mxu0 %vm179_vm0, %v715_v47 }
 0x227   :  { %v713_v49 = vpop.permute.xlu0 %712  ;;  %v705_v50 = vpop.permute.xlu1 %704 }
 0x228   :  { %3458 = vmatprep.subr.msk.mxu0 %vm179_vm0, %v713_v49 }
 0x229   :  { %3459 = vmatpush3.xpose.msk.msra.mxu0 %vm179_vm0, %v713_v49  ;;  %v38_v49 = vld [vmem:[%s5988_s1 + $0xd8] sm:$0xff] }
 0x22a   :  { %3460 = vmatprep.subr.msk.mxu0 %vm179_vm0, %v711_v46 }
 0x22b   :  { %v707_v51 = vpop.permute.xlu0 %706  ;;  %v701_v52 = vpop.permute.xlu1 %700 }
 0x22d   :  { %3461 = vmatpush3.xpose.msk.msra.mxu0 %vm179_vm0, %v711_v46  ;;  %v613_v46 = vmul.f32 %v4366_v39, %v36_v30 }
 0x22e   :  { %3462 = vmatprep.subr.msk.mxu0 %vm179_vm0, %v709_v48 }
 0x22f   :  { %v703_v53 = vpop.permute.xlu0 %702  ;;  %v697_v54 = vpop.permute.xlu1 %696 }
 0x231   :  { %3463 = vmatpush3.xpose.msk.msra.mxu0 %vm179_vm0, %v709_v48  ;;  %v614_v48 = vmul.f32 %v4348_v34, %v37_v33 }
 0x232   :  { %3464 = vmatprep.subr.msk.mxu0 %vm179_vm0, %v707_v51 }
 0x233   :  { %v699_v55 = vpop.permute.xlu0 %698  ;;  %v693_v56 = vpop.permute.xlu1 %692 }
 0x235   :  { %3465 = vmatpush3.xpose.msk.msra.mxu0 %vm179_vm0, %v707_v51  ;;  %v615_v51 = vmul.f32 %v4358_v37, %v38_v49 }
 0x236   :  { %3466 = vmatprep.subr.msk.mxu0 %vm179_vm0, %v705_v50 }
 0x237   :  { %v695_v57 = vpop.permute.xlu0 %694  ;;  %v689_v58 = vpop.permute.xlu1 %688 }
 0x239   :  { %3467 = vmatpush3.xpose.msk.msra.mxu0 %vm179_vm0, %v705_v50  ;;  %v39_v50 = vld [vmem:[%s5988_s1 + $0xe0] sm:$0xff] }
 0x23a   :  { %3468 = vmatprep.subr.msk.mxu0 %vm179_vm0, %v703_v53 }
 0x23b   :  { %v691_v59 = vpop.permute.xlu0 %690  ;;  %v685_v60 = vpop.permute.xlu1 %684 }
 0x23d   :  { %3469 = vmatpush3.xpose.msk.msra.mxu0 %vm179_vm0, %v703_v53  ;;  %v40_v53 = vld [vmem:[%s5988_s1 + $0xe8] sm:$0xff] }
 0x23e   :  { %3470 = vmatprep.subr.msk.mxu0 %vm179_vm0, %v701_v52 }
 0x23f   :  { %v687_v61 = vpop.permute.xlu0 %686  ;;  %v1932_v62 = vpop.permute.xlu1 %1931 }
 0x240   :  { %3584 = vmatprep.subr.mxu1 %v1932_v62 }
 0x241   :  { %3471 = vmatpush3.xpose.msk.msra.mxu0 %vm179_vm0, %v701_v52  ;;  %3585 = vmatpush3.msra.mxu1 %v1932_v62  ;;  %v616_v52 = vmul.f32 %v4340_v31, %v39_v50  ;;  %v44_v62 = vld [vmem:[%s5988_s1 + $0x108] sm:$0xff]  ;;  %v62_v50 = vld [vmem:[%s5988_s1 + $0x198] sm:$0xff] }
 0x242   :  { %3472 = vmatprep.subr.msk.mxu0 %vm179_vm0, %v699_v55 }
 0x243   :  { %v1926_v63 = vpop.permute.xlu0 %1925  ;;  %v1928_v4 = vpop.permute.xlu1 %1927 }
 0x245   :  { %3473 = vmatpush3.xpose.msk.msra.mxu0 %vm179_vm0, %v699_v55 }
 0x246   :  { %3474 = vmatprep.subr.msk.mxu0 %vm179_vm0, %v697_v54 }
 0x247   :  { %v1922_v0 = vpop.permute.xlu0 %1921  ;;  %v1924_v6 = vpop.permute.xlu1 %1923 }
 0x249   :  { %3475 = vmatpush3.xpose.msk.msra.mxu0 %vm179_vm0, %v697_v54  ;;  %v41_v54 = vld [vmem:[%s5988_s1 + $0xf0] sm:$0xff] }
 0x24a   :  { %3476 = vmatprep.subr.msk.mxu0 %vm179_vm0, %v695_v57 }
 0x24b   :  { %v1918_v1 = vpop.permute.xlu0 %1917  ;;  %v1920_v11 = vpop.permute.xlu1 %1919 }
 0x24d   :  { %3477 = vmatpush3.xpose.msk.msra.mxu0 %vm179_vm0, %v695_v57  ;;  %v618_v57 = vmul.f32 %v4350_v35, %v41_v54  ;;  %v64_v54 = vld [vmem:[%s5988_s1 + $0x1a8] sm:$0xff] }
 0x24e   :  { %3478 = vmatprep.subr.msk.mxu0 %vm179_vm0, %v693_v56 }
 0x24f   :  { %v1914_v2 = vpop.permute.xlu0 %1913  ;;  %v1916_v18 = vpop.permute.xlu1 %1915 }
 0x251   :  { %3479 = vmatpush3.xpose.msk.msra.mxu0 %vm179_vm0, %v693_v56  ;;  %v617_v56 = vmul.f32 %v4336_v28, %v40_v53 }
 0x252   :  { %3480 = vmatprep.subr.msk.mxu0 %vm179_vm0, %v691_v59 }
 0x253   :  { %v4439_v3 = vpop.permute.xlu0 %1909  ;;  %v1912_v26 = vpop.permute.xlu1 %1911 }
 0x255   :  { %3481 = vmatpush3.xpose.msk.msra.mxu0 %vm179_vm0, %v691_v59  ;;  %v43_v59 = vld [vmem:[%s5988_s1 + $0x100] sm:$0xff] }
 0x256   :  { %3482 = vmatprep.subr.msk.mxu0 %vm179_vm0, %v689_v58 }
 0x257   :  { %v4443_v5 = vpop.permute.xlu0 %1905  ;;  %v1908_v47 = vpop.permute.xlu1 %1907 }
 0x259   :  { %3483 = vmatpush3.xpose.msk.msra.mxu0 %vm179_vm0, %v689_v58  ;;  %v42_v58 = vld [vmem:[%s5988_s1 + $0xf8] sm:$0xff] }
 0x25a   :  { %3484 = vmatprep.subr.msk.mxu0 %vm179_vm0, %v687_v61 }
 0x25b   :  { %v4447_v7 = vpop.permute.xlu0 %1901  ;;  %v1904_v55 = vpop.permute.xlu1 %1903 }
 0x25d   :  { %3485 = vmatpush3.xpose.msk.msra.mxu0 %vm179_vm0, %v687_v61  ;;  %v620_v61 = vmul.f32 %v4332_v15, %v43_v59  ;;  %v67_v59 = vld [vmem:[%s5988_s1 + $0x1c0] sm:$0xff] }
 0x25e   :  { %3486 = vmatprep.subr.msk.mxu0 %vm179_vm0, %v685_v60 }
 0x25f   :  { %v1930_v8 = vpop.permute.xlu0 %1929 }
 0x260   :  { %3586 = vmatprep.subr.mxu1 %v1930_v8 }
 0x261   :  { %3487 = vmatpush3.xpose.msk.msra.mxu0 %vm179_vm0, %v685_v60  ;;  %3587 = vmatpush3.msra.mxu1 %v1930_v8  ;;  %v619_v60 = vmul.f32 %v4342_v32, %v42_v58  ;;  %v66_v58 = vld [vmem:[%s5988_s1 + $0x1b8] sm:$0xff] }
 0x262   :  { %3588 = vmatprep.subr.mxu1 %v1928_v4 }
 0x263   :  { %3589 = vmatpush3.msra.mxu1 %v1928_v4 }
 0x264   :  { %3489 = vmatmul.mubr.msk.f32.vlgmr.msra.gmra.mxu0 %vm179_vm0, %v605_v12  ;;  %3590 = vmatprep.subr.mxu1 %v1926_v63  ;;  %v627_v12 = vmul.f32 %v4374_v41, %v50_v10  ;;  %v74_v10 = vld [vmem:[%s5988_s1 + $0x1f8] sm:$0xff] }
 0x265   :  { %3491 = vmatprep.mubr.msk.f32.mxu0 %vm179_vm0, %v606_v13  ;;  %3591 = vmatpush3.msra.mxu1 %v1926_v63  ;;  %v45_v63 = vld [vmem:[%s5988_s1 + $0x110] sm:$0xff] }
 0x266   :  { %3592 = vmatprep.subr.mxu1 %v1924_v6 }
 0x267   :  { %3593 = vmatpush3.msra.mxu1 %v1924_v6  ;;  %v48_v6 = vld [vmem:[%s5988_s1 + $0x128] sm:$0xff] }
 0x268   :  { %3492 = vmatmul.mubr.msk.f32.gmra.mxu0 %vm179_vm0, %v607_v17  ;;  %3594 = vmatprep.subr.mxu1 %v1922_v0  ;;  %v625_v8 = vmul.f32 %v4382_v43, %v48_v6  ;;  %v629_v17 = vmul.f32 %v4366_v39, %v52_v14  ;;  %v72_v6 = vld [vmem:[%s5988_s1 + $0x1e8] sm:$0xff] }
 0x269   :  { %3494 = vmatprep.mubr.msk.f32.mxu0 %vm179_vm0, %v608_v19  ;;  %3595 = vmatpush3.msra.mxu1 %v1922_v0  ;;  %v621_v0 = vmul.f32 %v4394_v45, %v44_v62  ;;  %v54_v19 = vld [vmem:[%s5988_s1 + $0x158] sm:$0xff]  ;;  %v68_v62 = vld [vmem:[%s5988_s1 + $0x1c8] sm:$0xff] }
 0x26a   :  { %3596 = vmatprep.subr.mxu1 %v1920_v11  ;;  %v631_v21 = vmul.f32 %v4358_v37, %v54_v19  ;;  %v76_v14 = vld [vmem:[%s5988_s1 + $0x208] sm:$0xff]  ;;  %v79_v19 = vld [vmem:[%s5988_s1 + $0x220] sm:$0xff] }
 0x26b   :  { %3597 = vmatpush3.msra.mxu1 %v1920_v11  ;;  %v51_v11 = vld [vmem:[%s5988_s1 + $0x140] sm:$0xff] }
 0x26c   :  { %3495 = vmatmul.mubr.msk.f32.gmra.mxu0 %vm179_vm0, %v609_v22  ;;  %3598 = vmatprep.subr.mxu1 %v1918_v1  ;;  %v628_v13 = vmul.f32 %v4356_v36, %v51_v11  ;;  %v632_v22 = vmul.f32 %v4340_v31, %v55_v20  ;;  %v75_v11 = vld [vmem:[%s5988_s1 + $0x200] sm:$0xff] }
 0x26d   :  { %3497 = vmatprep.mubr.msk.f32.mxu0 %vm179_vm0, %v610_v23  ;;  %3599 = vmatpush3.msra.mxu1 %v1918_v1  ;;  %v622_v1 = vmul.f32 %v4380_v42, %v45_v63  ;;  %v56_v23 = vld [vmem:[%s5988_s1 + $0x168] sm:$0xff]  ;;  %v69_v63 = vld [vmem:[%s5988_s1 + $0x1d0] sm:$0xff] }
 0x26e   :  { %3600 = vmatprep.subr.mxu1 %v1916_v18  ;;  %v633_v25 = vmul.f32 %v4336_v28, %v56_v23 }
 0x26f   :  { %3601 = vmatpush3.msra.mxu1 %v1916_v18  ;;  %v630_v18 = vmul.f32 %v4348_v34, %v53_v16  ;;  %v77_v16 = vld [vmem:[%s5988_s1 + $0x210] sm:$0xff] }
 0x270   :  { %3498 = vmatmul.mubr.msk.f32.gmra.mxu0 %vm179_vm0, %v611_v27  ;;  %3602 = vmatprep.subr.mxu1 %v1914_v2  ;;  %v58_v27 = vld [vmem:[%s5988_s1 + $0x178] sm:$0xff] }
 0x271   :  { %3500 = vmatprep.mubr.msk.f32.mxu0 %vm179_vm0, %v612_v29  ;;  %3603 = vmatpush3.msra.mxu1 %v1914_v2  ;;  %v46_v2 = vld [vmem:[%s5988_s1 + $0x118] sm:$0xff]  ;;  %v59_v29 = vld [vmem:[%s5988_s1 + $0x180] sm:$0xff]  ;;  %v635_v30 = vmul.f32 %v4342_v32, %v58_v27 }
 0x272   :  { %3604 = vmatprep.subr.mxu1 %v1912_v26  ;;  %v623_v4 = vmul.f32 %v4388_v44, %v46_v2  ;;  %v636_v33 = vmul.f32 %v4332_v15, %v59_v29  ;;  %v70_v2 = vld [vmem:[%s5988_s1 + $0x1d8] sm:$0xff] }
 0x273   :  { %3605 = vmatpush3.msra.mxu1 %v1912_v26  ;;  %v634_v26 = vmul.f32 %v4350_v35, %v57_v24 }
 0x274   :  { %3501 = vmatmul.mubr.msk.f32.gmra.mxu0 %vm179_vm0, %v613_v46  ;;  %3606 = vmatprep.subr.mxu1 %v4439_v3  ;;  %v60_v46 = vld [vmem:[%s5988_s1 + $0x188] sm:$0xff] }
 0x275   :  { %3503 = vmatprep.mubr.msk.f32.mxu0 %vm179_vm0, %v614_v48  ;;  %3607 = vmatpush3.msra.mxu1 %v4439_v3  ;;  %v47_v3 = vld [vmem:[%s5988_s1 + $0x120] sm:$0xff]  ;;  %v637_v48 = vmul.f32 %v4394_v45, %v60_v46 }
 0x276   :  { %3608 = vmatprep.subr.mxu1 %v1908_v47 }
 0x277   :  { %3609 = vmatpush3.msra.mxu1 %v1908_v47  ;;  %v61_v47 = vld [vmem:[%s5988_s1 + $0x190] sm:$0xff] }
 0x278   :  { %3504 = vmatmul.mubr.msk.f32.gmra.mxu0 %vm179_vm0, %v615_v51  ;;  %3610 = vmatprep.subr.mxu1 %v4443_v5  ;;  %v638_v49 = vmul.f32 %v4380_v42, %v61_v47  ;;  %v63_v51 = vld [vmem:[%s5988_s1 + $0x1a0] sm:$0xff]  ;;  %v4773_v47 = vpop.f32.mrf.mxu0 }
 0x279   :  { %3506 = vmatprep.mubr.msk.f32.mxu0 %vm179_vm0, %v616_v52  ;;  %3611 = vmatpush3.msra.mxu1 %v4443_v5  ;;  %v624_v5 = vmul.f32 %v4372_v40, %v47_v3  ;;  %v639_v52 = vmul.f32 %v4388_v44, %v62_v50  ;;  %v640_v53 = vmul.f32 %v4372_v40, %v63_v51  ;;  %v71_v3 = vld [vmem:[%s5988_s1 + $0x1e0] sm:$0xff] }
 0x27a   :  { %3612 = vmatprep.subr.mxu1 %v1904_v55  ;;  %6015 = vst [vmem:[#allocation2_spill] sm:$0xff] %v4773_v47 }
 0x27b   :  { %3613 = vmatpush3.msra.mxu1 %v1904_v55  ;;  %v65_v55 = vld [vmem:[%s5988_s1 + $0x1b0] sm:$0xff] }
 0x27c   :  { %3507 = vmatmul.mubr.msk.f32.gmra.mxu0 %vm179_vm0, %v617_v56  ;;  %3614 = vmatprep.subr.mxu1 %v4447_v7  ;;  %v641_v56 = vmul.f32 %v4382_v43, %v64_v54 }
 0x27d   :  { %3509 = vmatprep.mubr.msk.f32.mxu0 %vm179_vm0, %v618_v57  ;;  %3615 = vmatpush3.msra.mxu1 %v4447_v7  ;;  %v49_v7 = vld [vmem:[%s5988_s1 + $0x130] sm:$0xff]  ;;  %v642_v57 = vmul.f32 %v4364_v38, %v65_v55 }
 0x27e   :  { %v626_v9 = vmul.f32 %v4364_v38, %v49_v7  ;;  %v73_v7 = vld [vmem:[%s5988_s1 + $0x1f0] sm:$0xff] }
 0x280   :  { %3510 = vmatmul.mubr.msk.f32.gmra.mxu0 %vm179_vm0, %v619_v60  ;;  %v643_v60 = vmul.f32 %v4374_v41, %v66_v58  ;;  %v95_v58 = vld [vmem:[%s5988_s1 + $0x2a0] sm:$0xff] }
 0x281   :  { %3512 = vmatprep.mubr.msk.f32.mxu0 %vm179_vm0, %v620_v61  ;;  %v644_v61 = vmul.f32 %v4356_v36, %v67_v59 }
 0x284   :  { %3513 = vmatmul.mubr.msk.f32.gmra.mxu0 %vm179_vm0, %v621_v0  ;;  %v645_v0 = vmul.f32 %v4366_v39, %v68_v62  ;;  %v96_v62 = vld [vmem:[%s5988_s1 + $0x2a8] sm:$0xff] }
 0x285   :  { %3515 = vmatprep.mubr.msk.f32.mxu0 %vm179_vm0, %v622_v1  ;;  %v646_v1 = vmul.f32 %v4348_v34, %v69_v63 }
 0x288   :  { %3516 = vmatmul.mubr.msk.f32.gmra.mxu0 %vm179_vm0, %v623_v4  ;;  %v647_v4 = vmul.f32 %v4358_v37, %v70_v2 }
 0x289   :  { %3518 = vmatprep.mubr.msk.f32.mxu0 %vm179_vm0, %v624_v5  ;;  %v648_v5 = vmul.f32 %v4340_v31, %v71_v3 }
 0x28c   :  { %3519 = vmatmul.mubr.msk.f32.gmra.mxu0 %vm179_vm0, %v625_v8  ;;  %v649_v8 = vmul.f32 %v4336_v28, %v72_v6  ;;  %v99_v6 = vld [vmem:[%s5988_s1 + $0x2c0] sm:$0xff] }
 0x28d   :  { %3521 = vmatprep.mubr.msk.f32.mxu0 %vm179_vm0, %v626_v9  ;;  %v650_v9 = vmul.f32 %v4350_v35, %v73_v7 }
 0x290   :  { %3522 = vmatmul.mubr.msk.f32.gmra.mxu0 %vm179_vm0, %v627_v12  ;;  %v651_v12 = vmul.f32 %v4342_v32, %v74_v10  ;;  %v100_v10 = vld [vmem:[%s5988_s1 + $0x2c8] sm:$0xff] }
 0x291   :  { %3524 = vmatprep.mubr.msk.f32.mxu0 %vm179_vm0, %v628_v13  ;;  %v652_v13 = vmul.f32 %v4332_v15, %v75_v11  ;;  %v78_v15 = vld [vmem:[%s5988_s1 + $0x218] sm:$0xff] }
 0x292   :  { %v655_v20 = vmul.f32 %v4388_v44, %v78_v15  ;;  %v83_v44 = vld [vmem:[%s5988_s1 + $0x240] sm:$0xff] }
 0x293   :  { %v103_v15 = vld [vmem:[%s5988_s1 + $0x2e0] sm:$0xff] }
 0x294   :  { %3525 = vmatmul.mubr.msk.f32.gmra.mxu0 %vm179_vm0, %v629_v17  ;;  %v653_v17 = vmul.f32 %v4394_v45, %v76_v14  ;;  %v81_v45 = vld [vmem:[%s5988_s1 + $0x230] sm:$0xff] }
 0x295   :  { %3527 = vmatprep.mubr.msk.f32.mxu0 %vm179_vm0, %v630_v18  ;;  %v654_v18 = vmul.f32 %v4380_v42, %v77_v16  ;;  %v80_v42 = vld [vmem:[%s5988_s1 + $0x228] sm:$0xff]  ;;  %v658_v23 = vmul.f32 %v4364_v38, %v81_v45 }
 0x296   :  { %v84_v38 = vld [vmem:[%s5988_s1 + $0x248] sm:$0xff] }
 0x298   :  { %3528 = vmatmul.mubr.msk.f32.gmra.mxu0 %vm179_vm0, %v631_v21  ;;  %v656_v21 = vmul.f32 %v4372_v40, %v79_v19  ;;  %v82_v40 = vld [vmem:[%s5988_s1 + $0x238] sm:$0xff] }
 0x299   :  { %3530 = vmatprep.mubr.msk.f32.mxu0 %vm179_vm0, %v632_v22  ;;  %v657_v22 = vmul.f32 %v4382_v43, %v80_v42  ;;  %v659_v24 = vmul.f32 %v4374_v41, %v82_v40  ;;  %v85_v43 = vld [vmem:[%s5988_s1 + $0x250] sm:$0xff]  ;;  %v87_v41 = vld [vmem:[%s5988_s1 + $0x260] sm:$0xff]  ;;  %v104_v42 = vld [vmem:[%s5988_s1 + $0x2e8] sm:$0xff] }
 0x29a   :  { %v662_v27 = vmul.f32 %v4348_v34, %v85_v43  ;;  %v88_v34 = vld [vmem:[%s5988_s1 + $0x268] sm:$0xff] }
 0x29c   :  { %3531 = vmatmul.mubr.msk.f32.gmra.mxu0 %vm179_vm0, %v633_v25  ;;  %v660_v25 = vmul.f32 %v4356_v36, %v83_v44  ;;  %v86_v36 = vld [vmem:[%s5988_s1 + $0x258] sm:$0xff] }
 0x29d   :  { %3533 = vmatprep.mubr.msk.f32.mxu0 %vm179_vm0, %v634_v26  ;;  %v661_v26 = vmul.f32 %v4366_v39, %v84_v38  ;;  %v663_v29 = vmul.f32 %v4358_v37, %v86_v36  ;;  %v89_v39 = vld [vmem:[%s5988_s1 + $0x270] sm:$0xff]  ;;  %v107_v38 = vld [vmem:[%s5988_s1 + $0x300] sm:$0xff]  ;;  %v108_v36 = vld [vmem:[%s5988_s1 + $0x308] sm:$0xff] }
 0x29e   :  { %v666_v46 = vmul.f32 %v4350_v35, %v89_v39 }
 0x2a0   :  { %3534 = vmatmul.mubr.msk.f32.gmra.mxu0 %vm179_vm0, %v635_v30  ;;  %v664_v30 = vmul.f32 %v4340_v31, %v87_v41  ;;  %v90_v31 = vld [vmem:[%s5988_s1 + $0x278] sm:$0xff] }
 0x2a1   :  { %3536 = vmatprep.mubr.msk.f32.mxu0 %vm179_vm0, %v636_v33  ;;  %v665_v33 = vmul.f32 %v4336_v28, %v88_v34  ;;  %v667_v37 = vmul.f32 %v4342_v32, %v90_v31  ;;  %v92_v28 = vld [vmem:[%s5988_s1 + $0x288] sm:$0xff]  ;;  %v94_v32 = vld [vmem:[%s5988_s1 + $0x298] sm:$0xff]  ;;  %v111_v31 = vld [vmem:[%s5988_s1 + $0x320] sm:$0xff] }
 0x2a4   :  { %3537 = vmatmul.mubr.msk.f32.gmra.mxu0 %vm179_vm0, %v637_v48  ;;  %v4775_v48 = vpop.f32.mrf.mxu0 }
 0x2a5   :  { %3539 = vmatprep.mubr.msk.f32.mxu0 %vm179_vm0, %v638_v49  ;;  %6016 = vst [vmem:[#allocation3_spill] sm:$0xff] %v4775_v48  ;;  %v91_v49 = vld [vmem:[%s5988_s1 + $0x280] sm:$0xff] }
 0x2a8   :  { %3540 = vmatmul.mubr.msk.f32.gmra.mxu0 %vm179_vm0, %v639_v52 }
 0x2a9   :  { %3542 = vmatprep.mubr.msk.f32.mxu0 %vm179_vm0, %v640_v53 }
 0x2ac   :  { %3543 = vmatmul.mubr.msk.f32.gmra.mxu0 %vm179_vm0, %v641_v56  ;;  %v93_v56 = vld [vmem:[%s5988_s1 + $0x290] sm:$0xff] }
 0x2ad   :  { %3545 = vmatprep.mubr.msk.f32.mxu0 %vm179_vm0, %v642_v57 }
 0x2b0   :  { %3546 = vmatmul.mubr.msk.f32.gmra.mxu0 %vm179_vm0, %v643_v60 }
 0x2b1   :  { %3548 = vmatprep.mubr.msk.f32.mxu0 %vm179_vm0, %v644_v61 }
 0x2b4   :  { %3549 = vmatmul.mubr.msk.f32.gmra.mxu0 %vm179_vm0, %v645_v0  ;;  %v97_v0 = vld [vmem:[%s5988_s1 + $0x2b0] sm:$0xff] }
 0x2b5   :  { %3551 = vmatprep.mubr.msk.f32.mxu0 %vm179_vm0, %v646_v1 }
 0x2b8   :  { %3552 = vmatmul.mubr.msk.f32.gmra.mxu0 %vm179_vm0, %v647_v4  ;;  %v98_v4 = vld [vmem:[%s5988_s1 + $0x2b8] sm:$0xff] }
 0x2b9   :  { %3554 = vmatprep.mubr.msk.f32.mxu0 %vm179_vm0, %v648_v5 }
 0x2bc   :  { %3555 = vmatmul.mubr.msk.f32.gmra.mxu0 %vm179_vm0, %v649_v8 }
 0x2bd   :  { %3557 = vmatprep.mubr.msk.f32.mxu0 %vm179_vm0, %v650_v9 }
 0x2c0   :  { %3558 = vmatmul.mubr.msk.f32.gmra.mxu0 %vm179_vm0, %v651_v12  ;;  %v101_v12 = vld [vmem:[%s5988_s1 + $0x2d0] sm:$0xff] }
 0x2c1   :  { %3560 = vmatprep.mubr.msk.f32.mxu0 %vm179_vm0, %v652_v13 }
 0x2c4   :  { %3561 = vmatmul.mubr.msk.f32.gmra.mxu0 %vm179_vm0, %v653_v17  ;;  %v102_v17 = vld [vmem:[%s5988_s1 + $0x2d8] sm:$0xff] }
 0x2c5   :  { %3563 = vmatprep.mubr.msk.f32.mxu0 %vm179_vm0, %v654_v18 }
 0x2c8   :  { %3564 = vmatmul.mubr.msk.f32.gmra.mxu0 %vm179_vm0, %v655_v20 }
 0x2c9   :  { %3566 = vmatprep.mubr.msk.f32.mxu0 %vm179_vm0, %v656_v21 }
 0x2cc   :  { %3567 = vmatmul.mubr.msk.f32.gmra.mxu0 %vm179_vm0, %v657_v22  ;;  %v105_v22 = vld [vmem:[%s5988_s1 + $0x2f0] sm:$0xff] }
 0x2cd   :  { %3569 = vmatprep.mubr.msk.f32.mxu0 %vm179_vm0, %v658_v23 }
 0x2d0   :  { %3570 = vmatmul.mubr.msk.f32.gmra.mxu0 %vm179_vm0, %v659_v24  ;;  %v106_v24 = vld [vmem:[%s5988_s1 + $0x2f8] sm:$0xff] }
 0x2d1   :  { %3572 = vmatprep.mubr.msk.f32.mxu0 %vm179_vm0, %v660_v25 }
 0x2d4   :  { %3573 = vmatmul.mubr.msk.f32.gmra.mxu0 %vm179_vm0, %v661_v26 }
 0x2d5   :  { %3575 = vmatprep.mubr.msk.f32.mxu0 %vm179_vm0, %v662_v27 }
 0x2d8   :  { %3576 = vmatmul.mubr.msk.f32.gmra.mxu0 %vm179_vm0, %v663_v29  ;;  %v109_v29 = vld [vmem:[%s5988_s1 + $0x310] sm:$0xff] }
 0x2d9   :  { %3578 = vmatprep.mubr.msk.f32.mxu0 %vm179_vm0, %v664_v30 }
 0x2dc   :  { %3579 = vmatmul.mubr.msk.f32.gmra.mxu0 %vm179_vm0, %v665_v33  ;;  %v110_v33 = vld [vmem:[%s5988_s1 + $0x318] sm:$0xff] }
 0x2dd   :  { %3581 = vmatprep.mubr.msk.f32.mxu0 %vm179_vm0, %v666_v46 }
 0x2e0   :  { %3582 = vmatmul.mubr.msk.f32.gmra.mxu0 %vm179_vm0, %v667_v37 }
 0x324   :  { %v3490_v35 = vpop.f32.mrf.mxu0 }
 0x325   :  { %v4783_v50 = vadd.f32 %v3490_v35, %v92_v28 }
 0x326   :  { %v1006_v51 = vpop.f32.mrf.mxu0 }
 0x327   :  { %v4785_v52 = vadd.f32 %v1006_v51, %v91_v49  ;;  %1327 = vmax.xlane.f32.xlu1 %v4783_v50  ;;  %v112_v49 = vld [vmem:[%s5988_s1 + $0x328] sm:$0xff] }
 0x328   :  { %v3493_v53 = vpop.f32.mrf.mxu0 }
 0x329   :  { %1325 = vmax.xlane.f32.xlu0 %v4785_v52  ;;  %v4792_v55 = vadd.f32 %v3493_v53, %v94_v32  ;;  %v113_v32 = vld [vmem:[%s5988_s1 + $0x330] sm:$0xff] }
 0x32a   :  { %v1016_v54 = vpop.f32.mrf.mxu0 }
 0x32b   :  { %v4801_v60 = vadd.f32 %v1016_v54, %v93_v56 }
 0x32c   :  { %v3496_v57 = vpop.f32.mrf.mxu0 }
 0x32d   :  { %1331 = vmax.xlane.f32.xlu0 %v4792_v55  ;;  %v4813_v2 = vadd.f32 %v3496_v57, %v96_v62  ;;  %v114_v57 = vld [vmem:[%s5988_s1 + $0x338] sm:$0xff] }
 0x32e   :  { %v1026_v59 = vpop.f32.mrf.mxu0 }
 0x32f   :  { %v4803_v61 = vadd.f32 %v1026_v59, %v95_v58  ;;  %v115_v59 = vld [vmem:[%s5988_s1 + $0x340] sm:$0xff] }
 0x330   :  { %v3499_v63 = vpop.f32.mrf.mxu0 }
 0x331   :  { %1333 = vmax.xlane.f32.xlu1 %v4803_v61  ;;  %1329 = vmax.xlane.f32.xlu0 %v4801_v60  ;;  %v4825_v8 = vadd.f32 %v3499_v63, %v98_v4 }
 0x332   :  { %v1036_v1 = vpop.f32.mrf.mxu0 }
 0x333   :  { %v4815_v3 = vadd.f32 %v1036_v1, %v97_v0  ;;  %v116_v1 = vld [vmem:[%s5988_s1 + $0x348] sm:$0xff] }
 0x334   :  { %v3502_v5 = vpop.f32.mrf.mxu0 }
 0x335   :  { %1337 = vmax.xlane.f32.xlu1 %v4815_v3  ;;  %1335 = vmax.xlane.f32.xlu0 %v4813_v2  ;;  %v4837_v14 = vadd.f32 %v3502_v5, %v100_v10  ;;  %v117_v5 = vld [vmem:[%s5988_s1 + $0x350] sm:$0xff] }
 0x336   :  { %v1046_v7 = vpop.f32.mrf.mxu0 }
 0x337   :  { %v4827_v9 = vadd.f32 %v1046_v7, %v99_v6 }
 0x338   :  { %v3505_v11 = vpop.f32.mrf.mxu0 }
 0x339   :  { %1341 = vmax.xlane.f32.xlu1 %v4827_v9  ;;  %1339 = vmax.xlane.f32.xlu0 %v4825_v8  ;;  %v4849_v20 = vadd.f32 %v3505_v11, %v102_v17  ;;  %v118_v11 = vld [vmem:[%s5988_s1 + $0x358] sm:$0xff] }
 0x33a   :  { %v1056_v13 = vpop.f32.mrf.mxu0 }
 0x33b   :  { %v4839_v16 = vadd.f32 %v1056_v13, %v101_v12  ;;  %v119_v13 = vld [vmem:[%s5988_s1 + $0x360] sm:$0xff] }
 0x33c   :  { %v3508_v18 = vpop.f32.mrf.mxu0 }
 0x33d   :  { %1345 = vmax.xlane.f32.xlu1 %v4839_v16  ;;  %1343 = vmax.xlane.f32.xlu0 %v4837_v14  ;;  %v4861_v40 = vadd.f32 %v3508_v18, %v104_v42 }
 0x33e   :  { %v1066_v19 = vpop.f32.mrf.mxu0 }
 0x33f   :  { %v4851_v21 = vadd.f32 %v1066_v19, %v103_v15  ;;  %v120_v19 = vld [vmem:[%s5988_s1 + $0x368] sm:$0xff] }
 0x340   :  { %v3511_v45 = vpop.f32.mrf.mxu0 }
 0x341   :  { %1349 = vmax.xlane.f32.xlu1 %v4851_v21  ;;  %1347 = vmax.xlane.f32.xlu0 %v4849_v20  ;;  %v4873_v26 = vadd.f32 %v3511_v45, %v106_v24  ;;  %v121_v45 = vld [vmem:[%s5988_s1 + $0x370] sm:$0xff] }
 0x342   :  { %v1076_v23 = vpop.f32.mrf.mxu0 }
 0x343   :  { %v4863_v44 = vadd.f32 %v1076_v23, %v105_v22 }
 0x344   :  { %v3514_v25 = vpop.f32.mrf.mxu0 }
 0x345   :  { %1353 = vmax.xlane.f32.xlu1 %v4863_v44  ;;  %1351 = vmax.xlane.f32.xlu0 %v4861_v40  ;;  %v4885_v34 = vadd.f32 %v3514_v25, %v108_v36  ;;  %v122_v25 = vld [vmem:[%s5988_s1 + $0x378] sm:$0xff] }
 0x346   :  { %v1086_v43 = vpop.f32.mrf.mxu0 }
 0x347   :  { %v4875_v27 = vadd.f32 %v1086_v43, %v107_v38  ;;  %v123_v43 = vld [vmem:[%s5988_s1 + $0x380] sm:$0xff] }
 0x348   :  { %v3517_v41 = vpop.f32.mrf.mxu0 }
 0x349   :  { %1357 = vmax.xlane.f32.xlu1 %v4875_v27  ;;  %1355 = vmax.xlane.f32.xlu0 %v4873_v26  ;;  %v4897_v28 = vadd.f32 %v3517_v41, %v110_v33 }
 0x34a   :  { %v1096_v30 = vpop.f32.mrf.mxu0 }
 0x34b   :  { %v4887_v39 = vadd.f32 %v1096_v30, %v109_v29  ;;  %v124_v30 = vld [vmem:[%s5988_s1 + $0x388] sm:$0xff] }
 0x34c   :  { %v3520_v46 = vpop.f32.mrf.mxu0 }
 0x34d   :  { %1361 = vmax.xlane.f32.xlu1 %v4887_v39  ;;  %1359 = vmax.xlane.f32.xlu0 %v4885_v34  ;;  %v4909_v54 = vadd.f32 %v3520_v46, %v112_v49  ;;  %v125_v46 = vld [vmem:[%s5988_s1 + $0x390] sm:$0xff] }
 0x34e   :  { %v1106_v37 = vpop.f32.mrf.mxu0 }
 0x34f   :  { %v4899_v35 = vadd.f32 %v1106_v37, %v111_v31 }
 0x350   :  { %v3523_v51 = vpop.f32.mrf.mxu0 }
 0x351   :  { %1365 = vmax.xlane.f32.xlu1 %v4899_v35  ;;  %1363 = vmax.xlane.f32.xlu0 %v4897_v28  ;;  %v4921_v63 = vadd.f32 %v3523_v51, %v114_v57  ;;  %v126_v51 = vld [vmem:[%s5988_s1 + $0x398] sm:$0xff] }
 0x352   :  { %v1116_v53 = vpop.f32.mrf.mxu0 }
 0x353   :  { %v4911_v56 = vadd.f32 %v1116_v53, %v113_v32  ;;  %v127_v53 = vld [vmem:[%s5988_s1 + $0x3a0] sm:$0xff] }
 0x354   :  { %v3526_v58 = vpop.f32.mrf.mxu0 }
 0x355   :  { %1369 = vmax.xlane.f32.xlu1 %v4911_v56  ;;  %1367 = vmax.xlane.f32.xlu0 %v4909_v54  ;;  %v4933_v7 = vadd.f32 %v3526_v58, %v116_v1 }
 0x356   :  { %v1126_v62 = vpop.f32.mrf.mxu0 }
 0x357   :  { %v4923_v0 = vadd.f32 %v1126_v62, %v115_v59  ;;  %v128_v62 = vld [vmem:[%s5988_s1 + $0x3a8] sm:$0xff] }
 0x358   :  { %v3529_v4 = vpop.f32.mrf.mxu0 }
 0x359   :  { %1373 = vmax.xlane.f32.xlu1 %v4923_v0  ;;  %1371 = vmax.xlane.f32.xlu0 %v4921_v63  ;;  %v4945_v18 = vadd.f32 %v3529_v4, %v118_v11  ;;  %v129_v4 = vld [vmem:[%s5988_s1 + $0x3b0] sm:$0xff] }
 0x35a   :  { %v1136_v6 = vpop.f32.mrf.mxu0 }
 0x35b   :  { %v4935_v10 = vadd.f32 %v1136_v6, %v117_v5 }
 0x35c   :  { %v3532_v12 = vpop.f32.mrf.mxu0 }
 0x35d   :  { %1377 = vmax.xlane.f32.xlu1 %v4935_v10  ;;  %1375 = vmax.xlane.f32.xlu0 %v4933_v7  ;;  %v4957_v23 = vadd.f32 %v3532_v12, %v120_v19  ;;  %v130_v12 = vld [vmem:[%s5988_s1 + $0x3b8] sm:$0xff] }
 0x35e   :  { %v1146_v17 = vpop.f32.mrf.mxu0 }
 0x35f   :  { %v4947_v15 = vadd.f32 %v1146_v17, %v119_v13  ;;  %v131_v17 = vld [vmem:[%s5988_s1 + $0x3c0] sm:$0xff] }
 0x360   :  { %v3535_v42 = vpop.f32.mrf.mxu0 }
 0x361   :  { %1381 = vmax.xlane.f32.xlu1 %v4947_v15  ;;  %1379 = vmax.xlane.f32.xlu0 %v4945_v18  ;;  %v4969_v41 = vadd.f32 %v3535_v42, %v122_v25 }
 0x362   :  { %v1156_v22 = vpop.f32.mrf.mxu0 }
 0x363   :  { %v4959_v24 = vadd.f32 %v1156_v22, %v121_v45  ;;  %v132_v22 = vld [vmem:[%s5988_s1 + $0x3c8] sm:$0xff] }
 0x364   :  { %v3538_v38 = vpop.f32.mrf.mxu0 }
 0x365   :  { %1385 = vmax.xlane.f32.xlu1 %v4959_v24  ;;  %1383 = vmax.xlane.f32.xlu0 %v4957_v23  ;;  %v4981_v37 = vadd.f32 %v3538_v38, %v124_v30  ;;  %v133_v38 = vld [vmem:[%s5988_s1 + $0x3d0] sm:$0xff] }
 0x366   :  { %v1166_v36 = vpop.f32.mrf.mxu0 }
 0x367   :  { %v4971_v29 = vadd.f32 %v1166_v36, %v123_v43 }
 0x368   :  { %v3541_v33 = vpop.f32.mrf.mxu0 }
 0x369   :  { %1389 = vmax.xlane.f32.xlu1 %v4971_v29  ;;  %1387 = vmax.xlane.f32.xlu0 %v4969_v41  ;;  %v4993_v58 = vadd.f32 %v3541_v33, %v126_v51  ;;  %v134_v33 = vld [vmem:[%s5988_s1 + $0x3d8] sm:$0xff] }
 0x36a   :  { %v1176_v31 = vpop.f32.mrf.mxu0 }
 0x36b   :  { %v4983_v49 = vadd.f32 %v1176_v31, %v125_v46  ;;  %v136_v46 = vld [vmem:[%s5988_s1 + $0x3e8] sm:$0xff] }
 0x36c   :  { %v3544_v32 = vpop.f32.mrf.mxu0 }
 0x36d   :  { %1393 = vmax.xlane.f32.xlu1 %v4983_v49  ;;  %1391 = vmax.xlane.f32.xlu0 %v4981_v37  ;;  %v5005_v6 = vadd.f32 %v3544_v32, %v128_v62 }
 0x36e   :  { %v1186_v57 = vpop.f32.mrf.mxu0 }
 0x36f   :  { %v4995_v59 = vadd.f32 %v1186_v57, %v127_v53  ;;  %v135_v57 = vld [vmem:[%s5988_s1 + $0x3e0] sm:$0xff] }
 0x370   :  { %v3547_v1 = vpop.f32.mrf.mxu0 }
 0x371   :  { %1397 = vmax.xlane.f32.xlu1 %v4995_v59  ;;  %1395 = vmax.xlane.f32.xlu0 %v4993_v58  ;;  %v5017_v42 = vadd.f32 %v3547_v1, %v130_v12  ;;  %v138_v1 = vld [vmem:[%s5988_s1 + $0x3f8] sm:$0xff] }
 0x372   :  { %v1196_v5 = vpop.f32.mrf.mxu0 }
 0x373   :  { %v5007_v11 = vadd.f32 %v1196_v5, %v129_v4 }
 0x374   :  { %v3550_v13 = vpop.f32.mrf.mxu0 }
 0x375   :  { %1401 = vmax.xlane.f32.xlu1 %v5007_v11  ;;  %1399 = vmax.xlane.f32.xlu0 %v5005_v6  ;;  %v5029_v36 = vadd.f32 %v3550_v13, %v132_v22  ;;  %v137_v13 = vld [vmem:[%s5988_s1 + $0x3f0] sm:$0xff] }
 0x376   :  { %v1206_v19 = vpop.f32.mrf.mxu0 }
 0x377   :  { %v5019_v45 = vadd.f32 %v1206_v19, %v131_v17  ;;  %v140_v19 = vld [vmem:[%s5988_s1 + $0x408] sm:$0xff] }
 0x378   :  { %v3553_v25 = vpop.f32.mrf.mxu0 }
 0x379   :  { %1405 = vmax.xlane.f32.xlu1 %v5019_v45  ;;  %1403 = vmax.xlane.f32.xlu0 %v5017_v42  ;;  %v5041_v51 = vadd.f32 %v3553_v25, %v134_v33 }
 0x37a   :  { %v1216_v43 = vpop.f32.mrf.mxu0 }
 0x37b   :  { %v5031_v30 = vadd.f32 %v1216_v43, %v133_v38  ;;  %v139_v43 = vld [vmem:[%s5988_s1 + $0x400] sm:$0xff] }
 0x37c   :  { %v3556_v31 = vpop.f32.mrf.mxu0 }
 0x37d   :  { %1409 = vmax.xlane.f32.xlu1 %v5031_v30  ;;  %1407 = vmax.xlane.f32.xlu0 %v5029_v36  ;;  %v5043_v32 = vadd.f32 %v3556_v31, %v136_v46  ;;  %v142_v46 = vld [vmem:[%s5988_s1 + $0x418] sm:$0xff] }
 0x37e   :  { %v1226_v53 = vpop.f32.mrf.mxu0 }
 0x37f   :  { %v5050_v62 = vadd.f32 %v1226_v53, %v135_v57 }
 0x380   :  { %v3559_v4 = vpop.f32.mrf.mxu0 }
 0x381   :  { %1415 = vmax.xlane.f32.xlu1 %v5043_v32  ;;  %1411 = vmax.xlane.f32.xlu0 %v5041_v51  ;;  %v5056_v5 = vadd.f32 %v3559_v4, %v138_v1  ;;  %v141_v1 = vld [vmem:[%s5988_s1 + $0x410] sm:$0xff] }
 0x382   :  { %v1236_v12 = vpop.f32.mrf.mxu0 }
 0x383   :  { %6017 = vst [vmem:[#allocation4_spill] sm:$0xff] %v5056_v5  ;;  %v5062_v17 = vadd.f32 %v1236_v12, %v137_v13  ;;  %v144_v12 = vld [vmem:[%s5988_s1 + $0x428] sm:$0xff] }
 0x384   :  { %v3562_v22 = vpop.f32.mrf.mxu0 }
 0x385   :  { %1413 = vmax.xlane.f32.xlu1 %v5050_v62  ;;  %v5068_v25 = vadd.f32 %v3562_v22, %v140_v19 }
 0x386   :  { %v1246_v38 = vpop.f32.mrf.mxu0 }
 0x387   :  { %6018 = vst [vmem:[#allocation5_spill] sm:$0xff] %v5068_v25  ;;  %v5074_v33 = vadd.f32 %v1246_v38, %v139_v43  ;;  %v143_v38 = vld [vmem:[%s5988_s1 + $0x420] sm:$0xff] }
 0x388   :  { %v3565_v31 = vpop.f32.mrf.mxu0 }
 0x389   :  { %1419 = vmax.xlane.f32.xlu1 %v5056_v5  ;;  %v5080_v53 = vadd.f32 %v3565_v31, %v142_v46  ;;  %v146_v46 = vld [vmem:[%s5988_s1 + $0x438] sm:$0xff] }
 0x38a   :  { %v1256_v57 = vpop.f32.mrf.mxu0 }
 0x38b   :  { %6019 = vst [vmem:[#allocation6_spill] sm:$0xff] %v5080_v53  ;;  %v5086_v4 = vadd.f32 %v1256_v57, %v141_v1 }
 0x38c   :  { %v3568_v13 = vpop.f32.mrf.mxu0 }
 0x38d   :  { %1417 = vmax.xlane.f32.xlu1 %v5062_v17  ;;  %v5092_v19 = vadd.f32 %v3568_v13, %v144_v12  ;;  %v145_v12 = vld [vmem:[%s5988_s1 + $0x430] sm:$0xff] }
 0x38e   :  { %v1266_v22 = vpop.f32.mrf.mxu0 }
 0x38f   :  { %6020 = vst [vmem:[#allocation7_spill] sm:$0xff] %v5092_v19  ;;  %v5098_v43 = vadd.f32 %v1266_v22, %v143_v38  ;;  %v148_v22 = vld [vmem:[%s5988_s1 + $0x448] sm:$0xff] }
 0x390   :  { %v3571_v31 = vpop.f32.mrf.mxu0 }
 0x391   :  { %1423 = vmax.xlane.f32.xlu1 %v5068_v25  ;;  %v5104_v57 = vadd.f32 %v3571_v31, %v146_v46  ;;  %v147_v31 = vld [vmem:[%s5988_s1 + $0x440] sm:$0xff] }
 0x392   :  { %v1276_v1 = vpop.f32.mrf.mxu0 }
 0x393   :  { %6021 = vst [vmem:[#allocation8_spill] sm:$0xff] %v5104_v57  ;;  %v5110_v13 = vadd.f32 %v1276_v1, %v145_v12 }
 0x394   :  { %v3574_v38 = vpop.f32.mrf.mxu0 }
 0x395   :  { %1421 = vmax.xlane.f32.xlu1 %v5074_v33  ;;  %6022 = vst [vmem:[#allocation9_spill] sm:$0xff] %v5110_v13  ;;  %v5116_v48 = vadd.f32 %v3574_v38, %v148_v22  ;;  %v150_v22 = vld [vmem:[%s5988_s1 + $0x458] sm:$0xff] }
 0x396   :  { %v1286_v46 = vpop.f32.mrf.mxu0 }
 0x397   :  { %v5123_v12 = vadd.f32 %v1286_v46, %v147_v31 }
 0x398   :  { %v3577_v38 = vpop.f32.mrf.mxu0 }
 0x399   :  { %1427 = vmax.xlane.f32.xlu1 %v5080_v53  ;;  %v5130_v5 = vadd.f32 %v3577_v38, %v150_v22 }
 0x39b   :  { %6023 = vst [vmem:[#allocation10_spill] sm:$0xff] %v5130_v5 }
 0x39d   :  { %1425 = vmax.xlane.f32.xlu1 %v5086_v4 }
 0x3a1   :  { %1431 = vmax.xlane.f32.xlu1 %v5092_v19 }
 0x3a5   :  { %1429 = vmax.xlane.f32.xlu1 %v5098_v43 }
 0x3a9   :  { %1435 = vmax.xlane.f32.xlu1 %v5104_v57 }
 0x3ad   :  { %1433 = vmax.xlane.f32.xlu1 %v5110_v13 }
 0x3b0   :  { %v1328_v47 = vpop.xlane.xlu1 %1327 }
 0x3b1   :  { %v1454_v19 = vsub.f32 %v4783_v50, %v1328_v47  ;;  %1439 = vmax.xlane.f32.xlu1 %v5116_v48  ;;  %v1296_v50 = vpop.f32.mrf.mxu0 }
 0x3b2   :  { %v1326_v1 = vpop.xlane.xlu0 %1325 }
 0x3b3   :  { %v1519_v57 = vmul.f32 1.442695, %v1454_v19  ;;  %v1453_v53 = vsub.f32 %v4785_v52, %v1326_v1  ;;  %v149_v19 = vld [vmem:[%s5988_s1 + $0x450] sm:$0xff]  ;;  %v152_v1 = vld [vmem:[%s5988_s1 + $0x468] sm:$0xff] }
 0x3b5   :  { %3826 = vpow2.f32 %v1519_v57  ;;  %v1517_v13 = vmul.f32 1.442695, %v1453_v53  ;;  %1437 = vmax.xlane.f32.xlu1 %v5123_v12  ;;  %v5137_v57 = vadd.f32 %v1296_v50, %v149_v19 }
 0x3b6   :  { %v1332_v25 = vpop.xlane.xlu0 %1331 }
 0x3b7   :  { %v1456_v47 = vsub.f32 %v4792_v55, %v1332_v25  ;;  %3828 = vpow2.f32 %v1517_v13  ;;  %6024 = vst [vmem:[#allocation11_spill] sm:$0xff] %v5137_v57  ;;  %v3580_v55 = vpop.f32.mrf.mxu0 }
 0x3b8   :  { %v5144_v38 = vadd.f32 %v3580_v55, %v152_v1 }
 0x3b9   :  { %v1523_v52 = vmul.f32 1.442695, %v1456_v47  ;;  %1443 = vmax.xlane.f32.xlu1 %v5130_v5  ;;  %v1306_v5 = vpop.f32.mrf.mxu0 }
 0x3ba   :  { %v1334_v46 = vpop.xlane.xlu1 %1333  ;;  %v1330_v31 = vpop.xlane.xlu0 %1329 }
 0x3bb   :  { %v1455_v53 = vsub.f32 %v4801_v60, %v1330_v31  ;;  %3830 = vpow2.f32 %v1523_v52  ;;  %v151_v60 = vld [vmem:[%s5988_s1 + $0x460] sm:$0xff]  ;;  %v1457_v50 = vsub.f32 %v4803_v61, %v1334_v46  ;;  %v3583_v1 = vpop.f32.mrf.mxu0 }
 0x3bd   :  { %v1521_v25 = vmul.f32 1.442695, %v1455_v53  ;;  %1441 = vmax.xlane.f32.xlu1 %v5137_v57  ;;  %v5154_v57 = vadd.f32 %v1306_v5, %v151_v60  ;;  %v1525_v55 = vmul.f32 1.442695, %v1457_v50  ;;  %v1316_v5 = vpop.f32.mrf.mxu0  ;;  %v153_v60 = vld [vmem:[%s5988_s1 + $0x470] sm:$0xff] }
 0x3be   :  { %v1338_v22 = vpop.xlane.xlu1 %1337  ;;  %v1336_v13 = vpop.xlane.xlu0 %1335 }
 0x3bf   :  { %v1458_v47 = vsub.f32 %v4813_v2, %v1336_v13  ;;  %3832 = vpow2.f32 %v1521_v25  ;;  %6026 = vst [vmem:[#allocation13_spill] sm:$0xff] %v5154_v57  ;;  %v154_v2 = vld [vmem:[%s5988_s1 + $0x478] sm:$0xff]  ;;  %v1459_v50 = vsub.f32 %v4815_v3, %v1338_v22 }
 0x3c1   :  { %v1527_v19 = vmul.f32 1.442695, %v1458_v47  ;;  %1447 = vmax.xlane.f32.xlu1 %v5144_v38  ;;  %v5164_v47 = vadd.f32 %v3583_v1, %v154_v2  ;;  %v1529_v2 = vmul.f32 1.442695, %v1459_v50 }
 0x3c2   :  { %v5152_v52 = vpop.eup %3826  ;;  %v1342_v31 = vpop.xlane.xlu1 %1341 }
 0x3c3   :  { %6025 = vst [vmem:[#allocation12_spill] sm:$0xff] %v5152_v52  ;;  %v1340_v53 = vpop.xlane.xlu0 %1339  ;;  %1647 = vadd.xlane.f32.xlu0 %v5152_v52  ;;  %3834 = vpow2.f32 %v1527_v19 }
 0x3c4   :  { %v1460_v61 = vsub.f32 %v4825_v8, %v1340_v53  ;;  %v5162_v46 = vpop.eup %3828  ;;  %3836 = vpow2.f32 %v1525_v55 }
 0x3c5   :  { %1445 = vmax.xlane.f32.xlu1 %v5154_v57  ;;  %6027 = vst [vmem:[#allocation14_spill] sm:$0xff] %v5162_v46  ;;  %v5174_v57 = vadd.f32 %v1316_v5, %v153_v60 }
 0x3c6   :  { %v1346_v25 = vpop.xlane.xlu1 %1345  ;;  %v1531_v19 = vmul.f32 1.442695, %v1460_v61  ;;  %v1461_v61 = vsub.f32 %v4827_v9, %v1342_v31 }
 0x3c7   :  { %v1344_v13 = vpop.xlane.xlu0 %1343  ;;  %1645 = vadd.xlane.f32.xlu0 %v5162_v46  ;;  %v1463_v9 = vsub.f32 %v4839_v16, %v1346_v25 }
 0x3c8   :  { %v5172_v8 = vpop.eup %3830  ;;  %3838 = vpow2.f32 %v1531_v19  ;;  %v1462_v1 = vsub.f32 %v4837_v14, %v1344_v13  ;;  %v1533_v14 = vmul.f32 1.442695, %v1461_v61 }
 0x3c9   :  { %1451 = vmax.xlane.f32.xlu1 %v5164_v47  ;;  %6028 = vst [vmem:[#allocation15_spill] sm:$0xff] %v5172_v8  ;;  %3840 = vpow2.f32 %v1529_v2  ;;  %v1537_v61 = vmul.f32 1.442695, %v1463_v9 }
 0x3ca   :  { %v1350_v53 = vpop.xlane.xlu1 %1349  ;;  %v1535_v5 = vmul.f32 1.442695, %v1462_v1 }
 0x3cb   :  { %v1348_v52 = vpop.xlane.xlu0 %1347  ;;  %1651 = vadd.xlane.f32.xlu0 %v5172_v8 }
 0x3cc   :  { %v5179_v55 = vpop.eup %3832  ;;  %3842 = vpow2.f32 %v1535_v5  ;;  %v1464_v13 = vsub.f32 %v4849_v20, %v1348_v52 }
 0x3cd   :  { %1449 = vmax.xlane.f32.xlu1 %v5174_v57  ;;  %6029 = vst [vmem:[#allocation16_spill] sm:$0xff] %v5179_v55  ;;  %3844 = vpow2.f32 %v1533_v14 }
 0x3ce   :  { %v5181_v3 = vpop.xlane.xlu1 %1353  ;;  %v1539_v31 = vmul.f32 1.442695, %v1464_v13 }
 0x3cf   :  { %v1352_v22 = vpop.xlane.xlu0 %1351  ;;  %1649 = vadd.xlane.f32.xlu0 %v5179_v55 }
 0x3d0   :  { %v5185_v60 = vpop.eup %3834  ;;  %3846 = vpow2.f32 %v1539_v31  ;;  %v1466_v20 = vsub.f32 %v4861_v40, %v1352_v22 }
 0x3d1   :  { %6030 = vst [vmem:[#allocation17_spill] sm:$0xff] %v5185_v60  ;;  %v5191_v19 = vpop.eup %3836 }
 0x3d2   :  { %v5187_v8 = vpop.xlane.xlu1 %1357  ;;  %6031 = vst [vmem:[#allocation18_spill] sm:$0xff] %v5191_v19  ;;  %v1543_v25 = vmul.f32 1.442695, %v1466_v20 }
 0x3d3   :  { %v1356_v50 = vpop.xlane.xlu0 %1355  ;;  %1655 = vadd.xlane.f32.xlu0 %v5185_v60 }
 0x3d5   :  { %v5197_v1 = vpop.eup %3838 }
 0x3d6   :  { %v5193_v46 = vpop.xlane.xlu1 %1361  ;;  %v5202_v5 = vpop.eup %3840 }
 0x3d7   :  { %1653 = vadd.xlane.f32.xlu0 %v5191_v19  ;;  %v1360_v2 = vpop.xlane.xlu0 %1359 }
 0x3d9   :  { %v5209_v13 = vpop.eup %3842 }
 0x3da   :  { %v1366_v55 = vpop.xlane.xlu1 %1365 }
 0x3db   :  { %v1473_v60 = vsub.f32 %v4899_v35, %v1366_v55  ;;  %1659 = vadd.xlane.f32.xlu0 %v5197_v1  ;;  %v5204_v19 = vpop.xlane.xlu0 %1363  ;;  %v1465_v35 = vsub.f32 %v4851_v21, %v1350_v53 }
 0x3dd   :  { %v1557_v52 = vmul.f32 1.442695, %v1473_v60  ;;  %v1541_v60 = vmul.f32 1.442695, %v1465_v35 }
 0x3de   :  { %v1370_v14 = vpop.xlane.xlu1 %1369 }
 0x3df   :  { %3848 = vpow2.f32 %v1557_v52  ;;  %v1475_v16 = vsub.f32 %v4911_v56, %v1370_v14  ;;  %1657 = vadd.xlane.f32.xlu0 %v5202_v5  ;;  %v5213_v22 = vpop.xlane.xlu0 %1367  ;;  %v1468_v56 = vsub.f32 %v4873_v26, %v1356_v50 }
 0x3e0   :  { %3850 = vpow2.f32 %v1537_v61  ;;  %v5216_v61 = vpop.eup %3844 }
 0x3e1   :  { %v1561_v55 = vmul.f32 1.442695, %v1475_v16  ;;  %v1547_v20 = vmul.f32 1.442695, %v1468_v56  ;;  %v5222_v14 = vpop.eup %3846 }
 0x3e2   :  { %v1374_v9 = vpop.xlane.xlu1 %1373 }
 0x3e3   :  { %3852 = vpow2.f32 %v1561_v55  ;;  %v1477_v40 = vsub.f32 %v4923_v0, %v1374_v9  ;;  %1663 = vadd.xlane.f32.xlu0 %v5209_v13  ;;  %v1467_v0 = vsub.f32 %v4863_v44, %v5181_v3  ;;  %v5224_v16 = vpop.xlane.xlu0 %1371 }
 0x3e4   :  { %3854 = vpow2.f32 %v1543_v25  ;;  %v1470_v25 = vsub.f32 %v4885_v34, %v1360_v2 }
 0x3e5   :  { %v1565_v31 = vmul.f32 1.442695, %v1477_v40 }
 0x3e6   :  { %v1378_v21 = vpop.xlane.xlu1 %1377  ;;  %v1551_v34 = vmul.f32 1.442695, %v1470_v25 }
 0x3e7   :  { %3856 = vpow2.f32 %v1565_v31  ;;  %v1479_v53 = vsub.f32 %v4935_v10, %v1378_v21  ;;  %1661 = vadd.xlane.f32.xlu0 %v5216_v61  ;;  %v1545_v10 = vmul.f32 1.442695, %v1467_v0  ;;  %v5238_v40 = vpop.xlane.xlu0 %1375  ;;  %v1471_v0 = vsub.f32 %v4887_v39, %v5193_v46 }
 0x3e8   :  { %3858 = vpow2.f32 %v1541_v60  ;;  %v1469_v60 = vsub.f32 %v4875_v27, %v5187_v8  ;;  %v1472_v39 = vsub.f32 %v4897_v28, %v5204_v19 }
 0x3e9   :  { %v1569_v52 = vmul.f32 1.442695, %v1479_v53 }
 0x3ea   :  { %v1382_v26 = vpop.xlane.xlu1 %1381  ;;  %v1549_v53 = vmul.f32 1.442695, %v1469_v60  ;;  %v1474_v60 = vsub.f32 %v4909_v54, %v5213_v22 }
 0x3eb   :  { %3860 = vpow2.f32 %v1569_v52  ;;  %v1481_v50 = vsub.f32 %v4947_v15, %v1382_v26  ;;  %1667 = vadd.xlane.f32.xlu0 %v5222_v14 }
 0x3ec   :  { %v5228_v35 = vpop.eup %3848  ;;  %3862 = vpow2.f32 %v1547_v20  ;;  %v5254_v20 = vpop.xlane.xlu0 %1379 }
 0x3ed   :  { %v1573_v55 = vmul.f32 1.442695, %v1481_v50  ;;  %1685 = vadd.xlane.f32.xlu1 %v5228_v35  ;;  %v5232_v44 = vpop.eup %3850  ;;  %v1553_v50 = vmul.f32 1.442695, %v1471_v0 }
 0x3ee   :  { %v1386_v3 = vpop.xlane.xlu1 %1385 }
 0x3ef   :  { %3864 = vpow2.f32 %v1573_v55  ;;  %v1483_v9 = vsub.f32 %v4959_v24, %v1386_v3  ;;  %1665 = vadd.xlane.f32.xlu0 %v5232_v44 }
 0x3f0   :  { %v5236_v15 = vpop.eup %3852  ;;  %3866 = vpow2.f32 %v1545_v10  ;;  %v1384_v3 = vpop.xlane.xlu0 %1383 }
 0x3f1   :  { %v1577_v2 = vmul.f32 1.442695, %v1483_v9  ;;  %1689 = vadd.xlane.f32.xlu1 %v5236_v15  ;;  %v5243_v56 = vpop.eup %3854  ;;  %v1555_v9 = vmul.f32 1.442695, %v1472_v39 }
 0x3f2   :  { %v1390_v31 = vpop.xlane.xlu1 %1389 }
 0x3f3   :  { %3868 = vpow2.f32 %v1577_v2  ;;  %v1485_v24 = vsub.f32 %v4971_v29, %v1390_v31  ;;  %1671 = vadd.xlane.f32.xlu0 %v5243_v56  ;;  %v1559_v31 = vmul.f32 1.442695, %v1474_v60 }
 0x3f4   :  { %v5247_v21 = vpop.eup %3856  ;;  %3870 = vpow2.f32 %v1551_v34  ;;  %v1388_v22 = vpop.xlane.xlu0 %1387 }
 0x3f5   :  { %v1581_v27 = vmul.f32 1.442695, %v1485_v24  ;;  %1693 = vadd.xlane.f32.xlu1 %v5247_v21  ;;  %v5252_v8 = vpop.eup %3858  ;;  %v1476_v24 = vsub.f32 %v4921_v63, %v5224_v16 }
 0x3f6   :  { %v1394_v52 = vpop.xlane.xlu1 %1393 }
 0x3f7   :  { %3872 = vpow2.f32 %v1581_v27  ;;  %v1487_v29 = vsub.f32 %v4983_v49, %v1394_v52  ;;  %1669 = vadd.xlane.f32.xlu0 %v5252_v8  ;;  %v1563_v52 = vmul.f32 1.442695, %v1476_v24 }
 0x3f8   :  { %v5258_v26 = vpop.eup %3860  ;;  %3874 = vpow2.f32 %v1549_v53 }
 0x3f9   :  { %v1585_v46 = vmul.f32 1.442695, %v1487_v29  ;;  %1697 = vadd.xlane.f32.xlu1 %v5258_v26  ;;  %v5263_v10 = vpop.eup %3862  ;;  %v1478_v29 = vsub.f32 %v4933_v7, %v5238_v40 }
 0x3fa   :  { %v1398_v25 = vpop.xlane.xlu1 %1397 }
 0x3fb   :  { %3876 = vpow2.f32 %v1585_v46  ;;  %v1489_v55 = vsub.f32 %v4995_v59, %v1398_v25  ;;  %1675 = vadd.xlane.f32.xlu0 %v5263_v10  ;;  %v1392_v46 = vpop.xlane.xlu0 %1391  ;;  %v1567_v25 = vmul.f32 1.442695, %v1478_v29 }
 0x3fc   :  { %v5267_v49 = vpop.eup %3864  ;;  %3878 = vpow2.f32 %v1553_v50  ;;  %v1486_v29 = vsub.f32 %v4981_v37, %v1392_v46 }
 0x3fd   :  { %v1589_v28 = vmul.f32 1.442695, %v1489_v55  ;;  %1701 = vadd.xlane.f32.xlu1 %v5267_v49  ;;  %v5272_v19 = vpop.eup %3866  ;;  %v1480_v55 = vsub.f32 %v4945_v18, %v5254_v20 }
 0x3fe   :  { %v1402_v34 = vpop.xlane.xlu1 %1401 }
 0x3ff   :  { %3880 = vpow2.f32 %v1589_v28  ;;  %v1491_v2 = vsub.f32 %v5007_v11, %v1402_v34  ;;  %1673 = vadd.xlane.f32.xlu0 %v5272_v19  ;;  %v1571_v60 = vmul.f32 1.442695, %v1480_v55  ;;  %v1482_v28 = vsub.f32 %v4957_v23, %v1384_v3  ;;  %v1396_v18 = vpop.xlane.xlu0 %1395 }
 0x400   :  { %v5276_v59 = vpop.eup %3868  ;;  %3882 = vpow2.f32 %v1555_v9 }
 0x401   :  { %v1593_v53 = vmul.f32 1.442695, %v1491_v2  ;;  %1705 = vadd.xlane.f32.xlu1 %v5276_v59  ;;  %v5281_v54 = vpop.eup %3870  ;;  %v1575_v24 = vmul.f32 1.442695, %v1482_v28 }
 0x402   :  { %v1406_v0 = vpop.xlane.xlu1 %1405 }
 0x403   :  { %3884 = vpow2.f32 %v1593_v53  ;;  %v1493_v27 = vsub.f32 %v5019_v45, %v1406_v0  ;;  %1679 = vadd.xlane.f32.xlu0 %v5281_v54  ;;  %v1484_v53 = vsub.f32 %v4969_v41, %v1388_v22 }
 0x404   :  { %v5285_v11 = vpop.eup %3872  ;;  %3886 = vpow2.f32 %v1559_v31 }
 0x405   :  { %v1597_v63 = vmul.f32 1.442695, %v1493_v27  ;;  %1709 = vadd.xlane.f32.xlu1 %v5285_v11  ;;  %v5290_v16 = vpop.eup %3874 }
 0x406   :  { %v1410_v50 = vpop.xlane.xlu1 %1409 }
 0x407   :  { %3888 = vpow2.f32 %v1597_v63  ;;  %v1495_v39 = vsub.f32 %v5031_v30, %v1410_v50  ;;  %1677 = vadd.xlane.f32.xlu0 %v5290_v16 }
 0x408   :  { %v5294_v45 = vpop.eup %3876  ;;  %3890 = vpow2.f32 %v1563_v52  ;;  %v1579_v52 = vmul.f32 1.442695, %v1484_v53 }
 0x409   :  { %v1601_v7 = vmul.f32 1.442695, %v1495_v39  ;;  %1713 = vadd.xlane.f32.xlu1 %v5294_v45  ;;  %v5299_v40 = vpop.eup %3878  ;;  %v1583_v39 = vmul.f32 1.442695, %v1486_v29 }
 0x40a   :  { %v5301_v9 = vpop.xlane.xlu1 %1415 }
 0x40b   :  { %3892 = vpow2.f32 %v1601_v7  ;;  %1681 = vadd.xlane.f32.xlu0 %v5299_v40 }
 0x40c   :  { %v5304_v30 = vpop.eup %3880  ;;  %3894 = vpow2.f32 %v1567_v25  ;;  %v1488_v25 = vsub.f32 %v4993_v58, %v1396_v18 }
 0x40d   :  { %1717 = vadd.xlane.f32.xlu1 %v5304_v30  ;;  %v5308_v34 = vpop.eup %3882  ;;  %3896 = vpow2.f32 %v1571_v60 }
 0x40e   :  { %v1414_v20 = vpop.xlane.xlu1 %1413 }
 0x40f   :  { %v1497_v2 = vsub.f32 %v5050_v62, %v1414_v20  ;;  %1683 = vadd.xlane.f32.xlu0 %v5308_v34  ;;  %v1400_v62 = vpop.xlane.xlu0 %1399 }
 0x410   :  { %v5312_v31 = vpop.eup %3884  ;;  %v1490_v60 = vsub.f32 %v5005_v6, %v1400_v62 }
 0x411   :  { %v1605_v0 = vmul.f32 1.442695, %v1497_v2  ;;  %1721 = vadd.xlane.f32.xlu1 %v5312_v31  ;;  %v5316_v23 = vpop.eup %3886 }
 0x412   :  { %v5318_v3 = vpop.xlane.xlu1 %1419 }
 0x413   :  { %3898 = vpow2.f32 %v1605_v0  ;;  %1687 = vadd.xlane.f32.xlu0 %v5316_v23  ;;  %v1404_v37 = vpop.xlane.xlu0 %1403 }
 0x414   :  { %v5321_v27 = vpop.eup %3888  ;;  %3900 = vpow2.f32 %v1575_v24  ;;  %v1591_v24 = vmul.f32 1.442695, %v1490_v60  ;;  %v1492_v53 = vsub.f32 %v5017_v42, %v1404_v37 }
 0x415   :  { %1725 = vadd.xlane.f32.xlu1 %v5321_v27  ;;  %v5325_v41 = vpop.eup %3890  ;;  %3902 = vpow2.f32 %v1579_v52 }
 0x416   :  { %v1418_v22 = vpop.xlane.xlu1 %1417 }
 0x417   :  { %v1499_v63 = vsub.f32 %v5062_v17, %v1418_v22  ;;  %1691 = vadd.xlane.f32.xlu0 %v5325_v41  ;;  %v1587_v17 = vmul.f32 1.442695, %v1488_v25  ;;  %v1408_v2 = vpop.xlane.xlu0 %1407 }
 0x418   :  { %v5329_v50 = vpop.eup %3892  ;;  %v1494_v62 = vsub.f32 %v5029_v36, %v1408_v2 }
 0x419   :  { %v1609_v55 = vmul.f32 1.442695, %v1499_v63  ;;  %1729 = vadd.xlane.f32.xlu1 %v5329_v50  ;;  %v5333_v7 = vpop.eup %3894 }
 0x41a   :  { %v5335_v46 = vpop.xlane.xlu1 %1423  ;;  %v5339_v28 = vpop.eup %3896  ;;  %v1599_v25 = vmul.f32 1.442695, %v1494_v62 }
 0x41b   :  { %3904 = vpow2.f32 %v1609_v55  ;;  %1695 = vadd.xlane.f32.xlu0 %v5333_v7  ;;  %v1412_v22 = vpop.xlane.xlu0 %1411 }
 0x41c   :  { %3906 = vpow2.f32 %v1583_v39  ;;  %v1496_v55 = vsub.f32 %v5041_v51, %v1412_v22 }
 0x41d   :  { %3908 = vpow2.f32 %v1587_v17 }
 0x41e   :  { %v1422_v20 = vpop.xlane.xlu1 %1421  ;;  %v1603_v60 = vmul.f32 1.442695, %v1496_v55 }
 0x41f   :  { %v1501_v58 = vsub.f32 %v5074_v33, %v1422_v20  ;;  %1699 = vadd.xlane.f32.xlu0 %v5339_v28  ;;  %v1595_v33 = vmul.f32 1.442695, %v1492_v53  ;;  %v6032_v53 = vld [vmem:[#allocation4_spill] sm:$0xff] }
 0x420   :  { %v5343_v18 = vpop.eup %3898 }
 0x421   :  { %v1613_v0 = vmul.f32 1.442695, %v1501_v58  ;;  %1733 = vadd.xlane.f32.xlu1 %v5343_v18  ;;  %v5347_v52 = vpop.eup %3900 }
 0x422   :  { %v1428_v6 = vpop.xlane.xlu1 %1427  ;;  %v5351_v29 = vpop.eup %3902 }
 0x423   :  { %3910 = vpow2.f32 %v1613_v0  ;;  %1703 = vadd.xlane.f32.xlu0 %v5347_v52  ;;  %v1500_v0 = vsub.f32 %v6032_v53, %v5318_v3  ;;  %v6036_v53 = vld [vmem:[#allocation7_spill] sm:$0xff] }
 0x424   :  { %3912 = vpow2.f32 %v1591_v24 }
 0x425   :  { %3914 = vpow2.f32 %v1595_v33 }
 0x426   :  { %v1426_v63 = vpop.xlane.xlu1 %1425 }
 0x427   :  { %v1503_v39 = vsub.f32 %v5086_v4, %v1426_v63  ;;  %1707 = vadd.xlane.f32.xlu0 %v5351_v29  ;;  %v1498_v4 = vsub.f32 %v5043_v32, %v5301_v9  ;;  %v6033_v9 = vld [vmem:[#allocation5_spill] sm:$0xff] }
 0x428   :  { %v5355_v42 = vpop.eup %3904  ;;  %v1502_v22 = vsub.f32 %v6033_v9, %v5335_v46 }
 0x429   :  { %v1617_v37 = vmul.f32 1.442695, %v1503_v39  ;;  %1737 = vadd.xlane.f32.xlu1 %v5355_v42  ;;  %v5359_v17 = vpop.eup %3906  ;;  %v1607_v24 = vmul.f32 1.442695, %v1498_v4  ;;  %v6035_v4 = vld [vmem:[#allocation6_spill] sm:$0xff] }
 0x42a   :  { %v1432_v36 = vpop.xlane.xlu1 %1431  ;;  %v5364_v20 = vpop.eup %3908 }
 0x42b   :  { %3916 = vpow2.f32 %v1617_v37  ;;  %1711 = vadd.xlane.f32.xlu0 %v5359_v17  ;;  %v1615_v37 = vmul.f32 1.442695, %v1502_v22 }
 0x42c   :  { %3918 = vpow2.f32 %v1599_v25  ;;  %v6034_v25 = vld [vmem:[#allocation9_spill] sm:$0xff] }
 0x42d   :  { %3920 = vpow2.f32 %v1603_v60  ;;  %v1504_v60 = vsub.f32 %v6035_v4, %v1428_v6 }
 0x42e   :  { %v1430_v58 = vpop.xlane.xlu1 %1429 }
 0x42f   :  { %v1505_v2 = vsub.f32 %v5098_v43, %v1430_v58  ;;  %1715 = vadd.xlane.f32.xlu0 %v5364_v20  ;;  %v1611_v43 = vmul.f32 1.442695, %v1500_v0  ;;  %v1619_v46 = vmul.f32 1.442695, %v1504_v60  ;;  %v1506_v0 = vsub.f32 %v6036_v53, %v1432_v36 }
 0x430   :  { %v5368_v51 = vpop.eup %3910 }
 0x431   :  { %v1621_v33 = vmul.f32 1.442695, %v1505_v2  ;;  %1741 = vadd.xlane.f32.xlu1 %v5368_v51  ;;  %v5373_v62 = vpop.eup %3912  ;;  %v1623_v22 = vmul.f32 1.442695, %v1506_v0  ;;  %v6039_v0 = vld [vmem:[#allocation11_spill] sm:$0xff] }
 0x432   :  { %v1436_v32 = vpop.xlane.xlu1 %1435  ;;  %v5378_v63 = vpop.eup %3914 }
 0x433   :  { %3922 = vpow2.f32 %v1621_v33  ;;  %1719 = vadd.xlane.f32.xlu0 %v5373_v62 }
 0x434   :  { %3924 = vpow2.f32 %v1607_v24 }
 0x435   :  { %3926 = vpow2.f32 %v1611_v43 }
 0x436   :  { %v1434_v39 = vpop.xlane.xlu1 %1433 }
 0x437   :  { %v1507_v55 = vsub.f32 %v6034_v25, %v1434_v39  ;;  %1723 = vadd.xlane.f32.xlu0 %v5378_v63  ;;  %v6037_v39 = vld [vmem:[#allocation8_spill] sm:$0xff] }
 0x438   :  { %v5382_v3 = vpop.eup %3916  ;;  %v1508_v25 = vsub.f32 %v6037_v39, %v1436_v32 }
 0x439   :  { %v1625_v58 = vmul.f32 1.442695, %v1507_v55  ;;  %1745 = vadd.xlane.f32.xlu1 %v5382_v3  ;;  %v5386_v2 = vpop.eup %3918 }
 0x43a   :  { %v1440_v24 = vpop.xlane.xlu1 %1439  ;;  %v5390_v33 = vpop.eup %3920  ;;  %v1627_v36 = vmul.f32 1.442695, %v1508_v25 }
 0x43b   :  { %3928 = vpow2.f32 %v1625_v58  ;;  %1727 = vadd.xlane.f32.xlu0 %v5386_v2 }
 0x43c   :  { %3930 = vpow2.f32 %v1615_v37 }
 0x43d   :  { %3932 = vpow2.f32 %v1619_v46  ;;  %v6038_v46 = vld [vmem:[#allocation10_spill] sm:$0xff] }
 0x43e   :  { %v1438_v9 = vpop.xlane.xlu1 %1437 }
 0x43f   :  { %v1509_v43 = vsub.f32 %v5123_v12, %v1438_v9  ;;  %1731 = vadd.xlane.f32.xlu0 %v5390_v33  ;;  %v1510_v12 = vsub.f32 %v5116_v48, %v1440_v24 }
 0x440   :  { %v5394_v6 = vpop.eup %3922 }
 0x441   :  { %v1629_v55 = vmul.f32 1.442695, %v1509_v43  ;;  %1749 = vadd.xlane.f32.xlu1 %v5394_v6  ;;  %v5398_v37 = vpop.eup %3924  ;;  %v1631_v43 = vmul.f32 1.442695, %v1510_v12 }
 0x442   :  { %v1444_v4 = vpop.xlane.xlu1 %1443  ;;  %v5402_v60 = vpop.eup %3926 }
 0x443   :  { %3934 = vpow2.f32 %v1629_v55  ;;  %1735 = vadd.xlane.f32.xlu0 %v5398_v37  ;;  %v1512_v53 = vsub.f32 %v6038_v46, %v1444_v4 }
 0x444   :  { %3936 = vpow2.f32 %v1623_v22 }
 0x445   :  { %3938 = vpow2.f32 %v1627_v36  ;;  %v1635_v48 = vmul.f32 1.442695, %v1512_v53  ;;  %v6041_v36 = vld [vmem:[#allocation13_spill] sm:$0xff] }
 0x446   :  { %v1442_v58 = vpop.xlane.xlu1 %1441 }
 0x447   :  { %v1511_v32 = vsub.f32 %v6039_v0, %v1442_v58  ;;  %1739 = vadd.xlane.f32.xlu0 %v5402_v60 }
 0x448   :  { %v5407_v9 = vpop.eup %3928 }
 0x449   :  { %6040 = vst [vmem:[#allocation4_spill] sm:$0xff] %v5407_v9  ;;  %v1633_v39 = vmul.f32 1.442695, %v1511_v32  ;;  %1753 = vadd.xlane.f32.xlu1 %v5407_v9  ;;  %v5410_v22 = vpop.eup %3930  ;;  %v6055_v9 = vld [vmem:[#allocation17_spill] sm:$0xff] }
 0x44a   :  { %v1448_v25 = vpop.xlane.xlu1 %1447  ;;  %v5414_v4 = vpop.eup %3932 }
 0x44b   :  { %3940 = vpow2.f32 %v1633_v39  ;;  %1743 = vadd.xlane.f32.xlu0 %v5410_v22  ;;  %v1514_v55 = vsub.f32 %v5144_v38, %v1448_v25 }
 0x44c   :  { %v1648_v24 = vpop.xlane.xlu0 %1647  ;;  %3942 = vpow2.f32 %v1631_v43 }
 0x44d   :  { %3944 = vpow2.f32 %v1635_v48  ;;  %v1639_v53 = vmul.f32 1.442695, %v1514_v55 }
 0x44e   :  { %v1446_v58 = vpop.xlane.xlu1 %1445  ;;  %3946 = vrcp.f32 %v1648_v24 }
 0x44f   :  { %v1513_v12 = vsub.f32 %v6041_v36, %v1446_v58  ;;  %1747 = vadd.xlane.f32.xlu0 %v5414_v4 }
 0x450   :  { %v5418_v46 = vpop.eup %3934  ;;  %v1646_v0 = vpop.xlane.xlu0 %1645 }
 0x451   :  { %6042 = vst [vmem:[#allocation5_spill] sm:$0xff] %v5418_v46  ;;  %v1637_v32 = vmul.f32 1.442695, %v1513_v12  ;;  %3948 = vrcp.f32 %v1646_v0  ;;  %1757 = vadd.xlane.f32.xlu1 %v5418_v46  ;;  %v5421_v43 = vpop.eup %3936 }
 0x452   :  { %v1452_v38 = vpop.xlane.xlu1 %1451  ;;  %v5425_v58 = vpop.eup %3938 }
 0x453   :  { %3950 = vpow2.f32 %v1637_v32  ;;  %v1516_v39 = vsub.f32 %v5164_v47, %v1452_v38  ;;  %1751 = vadd.xlane.f32.xlu0 %v5421_v43  ;;  %6043 = vst [vmem:[#allocation9_spill] sm:$0xff] %v5425_v58 }
 0x454   :  { %v1652_v25 = vpop.xlane.xlu0 %1651  ;;  %3952 = vpow2.f32 %v1639_v53 }
 0x455   :  { %v1643_v48 = vmul.f32 1.442695, %v1516_v39  ;;  %3954 = vrcp.f32 %v1652_v25  ;;  %v6047_v39 = vld [vmem:[#allocation14_spill] sm:$0xff] }
 0x456   :  { %v1450_v24 = vpop.xlane.xlu1 %1449 }
 0x457   :  { %v1515_v55 = vsub.f32 %v5174_v57, %v1450_v24  ;;  %1755 = vadd.xlane.f32.xlu0 %v5425_v58  ;;  %3956 = vpow2.f32 %v1643_v48 }
 0x458   :  { %v5429_v36 = vpop.eup %3940  ;;  %v1650_v12 = vpop.xlane.xlu0 %1649 }
 0x459   :  { %6044 = vst [vmem:[#allocation6_spill] sm:$0xff] %v5429_v36  ;;  %v1641_v0 = vmul.f32 1.442695, %v1515_v55  ;;  %3958 = vrcp.f32 %v1650_v12  ;;  %1761 = vadd.xlane.f32.xlu1 %v5429_v36  ;;  %v5432_v47 = vpop.eup %3942  ;;  %v6049_v55 = vld [vmem:[#allocation12_spill] sm:$0xff] }
 0x45a   :  { %6045 = vst [vmem:[#allocation7_spill] sm:$0xff] %v5432_v47  ;;  %v5435_v53 = vpop.eup %3944 }
 0x45b   :  { %3960 = vpow2.f32 %v1641_v0  ;;  %1759 = vadd.xlane.f32.xlu0 %v5432_v47  ;;  %6046 = vst [vmem:[#allocation8_spill] sm:$0xff] %v5435_v53  ;;  %v3947_v38 = vpop.eup %3946 }
 0x45c   :  { %v1656_v32 = vpop.xlane.xlu0 %1655  ;;  %v1776_v12 = vmul.f32 %v3947_v38, %v6049_v55 }
 0x45d   :  { %3962 = vrcp.f32 %v1656_v32  ;;  %v6052_v32 = vld [vmem:[#allocation16_spill] sm:$0xff] }
 0x45e   :  { %v3949_v57 = vpop.eup %3948 }
 0x45f   :  { %1763 = vadd.xlane.f32.xlu0 %v5435_v53  ;;  %v1774_v25 = vmul.f32 %v3949_v57, %v6047_v39 }
 0x460   :  { %v5439_v48 = vpop.eup %3950  ;;  %v1654_v24 = vpop.xlane.xlu0 %1653 }
 0x461   :  { %6048 = vst [vmem:[#allocation10_spill] sm:$0xff] %v5439_v48  ;;  %3964 = vrcp.f32 %v1654_v24  ;;  %1765 = vadd.xlane.f32.xlu1 %v5439_v48  ;;  %3616 = vmatprep.mubr.f32.mxu1 %v1774_v25  ;;  %v5443_v0 = vpop.eup %3952  ;;  %v6053_v24 = vld [vmem:[#allocation15_spill] sm:$0xff]  ;;  %v6054_v48 = vld [vmem:[#allocation18_spill] sm:$0xff] }
 0x462   :  { %6050 = vst [vmem:[#allocation11_spill] sm:$0xff] %v5443_v0  ;;  %3617 = vmatmul.mubr.f32.vlgmr.msra.gmra.mxu1 %v1776_v12  ;;  %v3955_v36 = vpop.eup %3954 }
 0x463   :  { %1767 = vadd.xlane.f32.xlu0 %v5443_v0  ;;  %v1780_v25 = vmul.f32 %v3955_v36, %v6053_v24 }
 0x464   :  { %v1660_v47 = vpop.xlane.xlu0 %1659  ;;  %v5446_v53 = vpop.eup %3956 }
 0x465   :  { %6051 = vst [vmem:[#allocation13_spill] sm:$0xff] %v5446_v53  ;;  %3966 = vrcp.f32 %v1660_v47 }
 0x466   :  { %v3959_v57 = vpop.eup %3958 }
 0x467   :  { %1771 = vadd.xlane.f32.xlu0 %v5446_v53  ;;  %v1778_v39 = vmul.f32 %v3959_v57, %v6052_v32 }
 0x468   :  { %v5450_v46 = vpop.eup %3960  ;;  %v1658_v38 = vpop.xlane.xlu0 %1657 }
 0x469   :  { %3968 = vrcp.f32 %v1658_v38  ;;  %1769 = vadd.xlane.f32.xlu1 %v5450_v46  ;;  %3619 = vmatprep.mubr.f32.mxu1 %v1778_v39 }
 0x46a   :  { %3620 = vmatmul.mubr.f32.gmra.mxu1 %v1780_v25  ;;  %v3963_v12 = vpop.eup %3962 }
 0x46b   :  { %v1784_v57 = vmul.f32 %v3963_v12, %v6055_v9 }
 0x46c   :  { %v1664_v55 = vpop.xlane.xlu0 %1663 }
 0x46d   :  { %3970 = vrcp.f32 %v1664_v55 }
 0x46e   :  { %v3965_v0 = vpop.eup %3964 }
 0x46f   :  { %v1782_v58 = vmul.f32 %v3965_v0, %v6054_v48 }
 0x470   :  { %v1662_v53 = vpop.xlane.xlu0 %1661 }
 0x471   :  { %3972 = vrcp.f32 %v1662_v53  ;;  %3622 = vmatprep.mubr.f32.mxu1 %v1782_v58 }
 0x472   :  { %3623 = vmatmul.mubr.f32.gmra.mxu1 %v1784_v57  ;;  %v3967_v32 = vpop.eup %3966 }
 0x473   :  { %v1788_v24 = vmul.f32 %v3967_v32, %v5197_v1 }
 0x474   :  { %v1668_v47 = vpop.xlane.xlu0 %1667 }
 0x475   :  { %3974 = vrcp.f32 %v1668_v47 }
 0x476   :  { %v3969_v36 = vpop.eup %3968  ;;  %v1686_v55 = vpop.xlane.xlu1 %1685 }
 0x477   :  { %v1786_v38 = vmul.f32 %v3969_v36, %v5202_v5 }
 0x478   :  { %v1666_v39 = vpop.xlane.xlu0 %1665 }
 0x479   :  { %3976 = vrcp.f32 %v1666_v39  ;;  %3625 = vmatprep.mubr.f32.mxu1 %v1786_v38 }
 0x47a   :  { %3626 = vmatmul.mubr.f32.gmra.mxu1 %v1788_v24  ;;  %v3971_v0 = vpop.eup %3970  ;;  %v1690_v57 = vpop.xlane.xlu1 %1689 }
 0x47b   :  { %v1792_v53 = vmul.f32 %v3971_v0, %v5209_v13 }
 0x47c   :  { %v1672_v48 = vpop.xlane.xlu0 %1671 }
 0x47d   :  { %3978 = vrcp.f32 %v1672_v48 }
 0x47e   :  { %v3973_v25 = vpop.eup %3972 }
 0x47f   :  { %v1790_v9 = vmul.f32 %v3973_v25, %v5216_v61  ;;  %v1694_v61 = vpop.xlane.xlu1 %1693 }
 0x480   :  { %v1670_v58 = vpop.xlane.xlu0 %1669 }
 0x481   :  { %3980 = vrcp.f32 %v1670_v58  ;;  %3628 = vmatprep.mubr.f32.mxu1 %v1790_v9 }
 0x482   :  { %3629 = vmatmul.mubr.f32.gmra.mxu1 %v1792_v53  ;;  %v3975_v12 = vpop.eup %3974 }
 0x483   :  { %v1796_v36 = vmul.f32 %v3975_v12, %v5222_v14  ;;  %v1698_v25 = vpop.xlane.xlu1 %1697 }
 0x484   :  { %v1676_v5 = vpop.xlane.xlu0 %1675 }
 0x485   :  { %3982 = vrcp.f32 %v1676_v5 }
 0x486   :  { %v3977_v1 = vpop.eup %3976 }
 0x487   :  { %v1794_v47 = vmul.f32 %v3977_v1, %v5232_v44  ;;  %v1702_v58 = vpop.xlane.xlu1 %1701 }
 0x488   :  { %v1674_v32 = vpop.xlane.xlu0 %1673 }
 0x489   :  { %3984 = vrcp.f32 %v1674_v32  ;;  %3631 = vmatprep.mubr.f32.mxu1 %v1794_v47 }
 0x48a   :  { %3632 = vmatmul.mubr.f32.gmra.mxu1 %v1796_v36  ;;  %v3979_v39 = vpop.eup %3978 }
 0x48b   :  { %v1800_v0 = vmul.f32 %v3979_v39, %v5243_v56  ;;  %v1706_v1 = vpop.xlane.xlu1 %1705 }
 0x48c   :  { %v1680_v38 = vpop.xlane.xlu0 %1679 }
 0x48d   :  { %3986 = vrcp.f32 %v1680_v38 }
 0x48e   :  { %v3981_v13 = vpop.eup %3980 }
 0x48f   :  { %v1798_v24 = vmul.f32 %v3981_v13, %v5252_v8 }
 0x490   :  { %v1678_v48 = vpop.xlane.xlu0 %1677 }
 0x491   :  { %3988 = vrcp.f32 %v1678_v48  ;;  %3634 = vmatprep.mubr.f32.mxu1 %v1798_v24 }
 0x492   :  { %3635 = vmatmul.mubr.f32.gmra.mxu1 %v1800_v0  ;;  %v3983_v9 = vpop.eup %3982 }
 0x493   :  { %v1804_v12 = vmul.f32 %v3983_v9, %v5263_v10  ;;  %v1710_v10 = vpop.xlane.xlu1 %1709 }
 0x494   :  { %v1682_v44 = vpop.xlane.xlu0 %1681 }
 0x495   :  { %3990 = vrcp.f32 %v1682_v44 }
 0x496   :  { %v3985_v14 = vpop.eup %3984  ;;  %3992 = vrcp.f32 %v1686_v55 }
 0x497   :  { %v1802_v53 = vmul.f32 %v3985_v14, %v5272_v19  ;;  %v1714_v48 = vpop.xlane.xlu1 %1713 }
 0x498   :  { %v1684_v5 = vpop.xlane.xlu0 %1683 }
 0x499   :  { %3994 = vrcp.f32 %v1684_v5  ;;  %3637 = vmatprep.mubr.f32.mxu1 %v1802_v53 }
 0x49a   :  { %3638 = vmatmul.mubr.f32.gmra.mxu1 %v1804_v12  ;;  %3996 = vrcp.f32 %v1690_v57  ;;  %v3987_v8 = vpop.eup %3986 }
 0x49b   :  { %v1808_v38 = vmul.f32 %v3987_v8, %v5281_v54  ;;  %v1718_v14 = vpop.xlane.xlu1 %1717 }
 0x49c   :  { %v1688_v56 = vpop.xlane.xlu0 %1687 }
 0x49d   :  { %3998 = vrcp.f32 %v1688_v56 }
 0x49e   :  { %v3989_v47 = vpop.eup %3988  ;;  %4000 = vrcp.f32 %v1694_v61 }
 0x49f   :  { %v1806_v32 = vmul.f32 %v3989_v47, %v5290_v16 }
 0x4a0   :  { %v1692_v36 = vpop.xlane.xlu0 %1691 }
 0x4a1   :  { %4002 = vrcp.f32 %v1692_v36  ;;  %3640 = vmatprep.mubr.f32.mxu1 %v1806_v32 }
 0x4a2   :  { %v3991_v19 = vpop.eup %3990  ;;  %3641 = vmatmul.mubr.f32.gmra.mxu1 %v1808_v38  ;;  %4004 = vrcp.f32 %v1698_v25 }
 0x4a3   :  { %v1810_v55 = vmul.f32 %v3991_v19, %v5299_v40  ;;  %v3993_v39 = vpop.eup %3992 }
 0x4a4   :  { %v1696_v57 = vpop.xlane.xlu0 %1695  ;;  %v1814_v61 = vmul.f32 %v3993_v39, %v5228_v35 }
 0x4a5   :  { %4006 = vrcp.f32 %v1696_v57  ;;  %3643 = vmatprep.mubr.f32.mxu1 %v1810_v55 }
 0x4a6   :  { %v3995_v13 = vpop.eup %3994  ;;  %4008 = vrcp.f32 %v1702_v58 }
 0x4a7   :  { %v1812_v24 = vmul.f32 %v3995_v13, %v5308_v34  ;;  %v3997_v54 = vpop.eup %3996 }
 0x4a8   :  { %v1700_v16 = vpop.xlane.xlu0 %1699  ;;  %v1818_v44 = vmul.f32 %v3997_v54, %v5236_v15 }
 0x4a9   :  { %4010 = vrcp.f32 %v1700_v16  ;;  %3644 = vmatmul.mubr.f32.gmra.mxu1 %v1812_v24 }
 0x4aa   :  { %v3999_v0 = vpop.eup %3998  ;;  %3646 = vmatprep.mubr.f32.mxu1 %v1814_v61  ;;  %4012 = vrcp.f32 %v1706_v1  ;;  %v1722_v1 = vpop.xlane.xlu1 %1721 }
 0x4ab   :  { %v1816_v40 = vmul.f32 %v3999_v0, %v5316_v23  ;;  %v4001_v9 = vpop.eup %4000 }
 0x4ac   :  { %v1704_v25 = vpop.xlane.xlu0 %1703  ;;  %v1822_v53 = vmul.f32 %v4001_v9, %v5247_v21 }
 0x4ad   :  { %4014 = vrcp.f32 %v1704_v25  ;;  %3647 = vmatmul.mubr.f32.gmra.mxu1 %v1816_v40 }
 0x4ae   :  { %v4003_v34 = vpop.eup %4002  ;;  %3649 = vmatprep.mubr.f32.mxu1 %v1818_v44  ;;  %4016 = vrcp.f32 %v1710_v10  ;;  %v1726_v38 = vpop.xlane.xlu1 %1725 }
 0x4af   :  { %v1820_v35 = vmul.f32 %v4003_v34, %v5325_v41  ;;  %v4005_v5 = vpop.eup %4004 }
 0x4b0   :  { %v1708_v58 = vpop.xlane.xlu0 %1707  ;;  %v1826_v56 = vmul.f32 %v4005_v5, %v5258_v26 }
 0x4b1   :  { %4018 = vrcp.f32 %v1708_v58  ;;  %3650 = vmatmul.mubr.f32.gmra.mxu1 %v1820_v35 }
 0x4b2   :  { %v4007_v23 = vpop.eup %4006  ;;  %3652 = vmatprep.mubr.f32.mxu1 %v1822_v53  ;;  %4020 = vrcp.f32 %v1714_v48  ;;  %v1730_v24 = vpop.xlane.xlu1 %1729 }
 0x4b3   :  { %v1824_v12 = vmul.f32 %v4007_v23, %v5333_v7  ;;  %v4009_v8 = vpop.eup %4008 }
 0x4b4   :  { %v1712_v15 = vpop.xlane.xlu0 %1711  ;;  %v1830_v32 = vmul.f32 %v4009_v8, %v5267_v49 }
 0x4b5   :  { %4022 = vrcp.f32 %v1712_v15  ;;  %3653 = vmatmul.mubr.f32.gmra.mxu1 %v1824_v12 }
 0x4b6   :  { %v4011_v41 = vpop.eup %4010  ;;  %3655 = vmatprep.mubr.f32.mxu1 %v1826_v56  ;;  %4024 = vrcp.f32 %v1718_v14  ;;  %v1734_v48 = vpop.xlane.xlu1 %1733 }
 0x4b7   :  { %v1828_v47 = vmul.f32 %v4011_v41, %v5339_v28  ;;  %v4013_v36 = vpop.eup %4012 }
 0x4b8   :  { %v1716_v21 = vpop.xlane.xlu0 %1715  ;;  %v1834_v10 = vmul.f32 %v4013_v36, %v5276_v59 }
 0x4b9   :  { %4026 = vrcp.f32 %v1716_v21  ;;  %3656 = vmatmul.mubr.f32.gmra.mxu1 %v1828_v47 }
 0x4ba   :  { %v4015_v7 = vpop.eup %4014  ;;  %3658 = vmatprep.mubr.f32.mxu1 %v1830_v32  ;;  %4028 = vrcp.f32 %v1722_v1  ;;  %v1738_v44 = vpop.xlane.xlu1 %1737 }
 0x4bb   :  { %v1832_v26 = vmul.f32 %v4015_v7, %v5347_v52  ;;  %v4017_v55 = vpop.eup %4016 }
 0x4bc   :  { %v1720_v19 = vpop.xlane.xlu0 %1719  ;;  %v1838_v39 = vmul.f32 %v4017_v55, %v5285_v11 }
 0x4bd   :  { %4030 = vrcp.f32 %v1720_v19  ;;  %3659 = vmatmul.mubr.f32.gmra.mxu1 %v1832_v26 }
 0x4be   :  { %v4019_v28 = vpop.eup %4018  ;;  %3661 = vmatprep.mubr.f32.mxu1 %v1834_v10  ;;  %4032 = vrcp.f32 %v1726_v38  ;;  %v1742_v35 = vpop.xlane.xlu1 %1741 }
 0x4bf   :  { %v1836_v57 = vmul.f32 %v4019_v28, %v5351_v29  ;;  %v4021_v13 = vpop.eup %4020 }
 0x4c0   :  { %v1724_v49 = vpop.xlane.xlu0 %1723  ;;  %v1842_v61 = vmul.f32 %v4021_v13, %v5294_v45 }
 0x4c1   :  { %4034 = vrcp.f32 %v1724_v49  ;;  %3662 = vmatmul.mubr.f32.gmra.mxu1 %v1836_v57 }
 0x4c2   :  { %v4023_v52 = vpop.eup %4022  ;;  %3664 = vmatprep.mubr.f32.mxu1 %v1838_v39  ;;  %4036 = vrcp.f32 %v1730_v24  ;;  %v1746_v23 = vpop.xlane.xlu1 %1745 }
 0x4c3   :  { %v1840_v16 = vmul.f32 %v4023_v52, %v5359_v17  ;;  %v4025_v54 = vpop.eup %4024 }
 0x4c4   :  { %v1728_v59 = vpop.xlane.xlu0 %1727  ;;  %v1846_v40 = vmul.f32 %v4025_v54, %v5304_v30 }
 0x4c5   :  { %4038 = vrcp.f32 %v1728_v59  ;;  %3665 = vmatmul.mubr.f32.gmra.mxu1 %v1840_v16  ;;  %v6056_v59 = vld [vmem:[#allocation4_spill] sm:$0xff] }
 0x4c6   :  { %v4027_v29 = vpop.eup %4026  ;;  %3667 = vmatprep.mubr.f32.mxu1 %v1842_v61  ;;  %4040 = vrcp.f32 %v1734_v48 }
 0x4c7   :  { %v1844_v11 = vmul.f32 %v4027_v29, %v5364_v20  ;;  %v4029_v25 = vpop.eup %4028 }
 0x4c8   :  { %v1732_v0 = vpop.xlane.xlu0 %1731  ;;  %v1850_v34 = vmul.f32 %v4029_v25, %v5312_v31 }
 0x4c9   :  { %4042 = vrcp.f32 %v1732_v0  ;;  %3668 = vmatmul.mubr.f32.gmra.mxu1 %v1844_v11  ;;  %v6058_v11 = vld [vmem:[#allocation5_spill] sm:$0xff] }
 0x4ca   :  { %v4031_v17 = vpop.eup %4030  ;;  %3670 = vmatprep.mubr.f32.mxu1 %v1846_v40  ;;  %4044 = vrcp.f32 %v1738_v44  ;;  %v1750_v8 = vpop.xlane.xlu1 %1749 }
 0x4cb   :  { %v1848_v45 = vmul.f32 %v4031_v17, %v5373_v62  ;;  %v4033_v14 = vpop.eup %4032  ;;  %v6059_v17 = vld [vmem:[#allocation7_spill] sm:$0xff] }
 0x4cc   :  { %v1736_v9 = vpop.xlane.xlu0 %1735  ;;  %v1854_v53 = vmul.f32 %v4033_v14, %v5321_v27 }
 0x4cd   :  { %4046 = vrcp.f32 %v1736_v9  ;;  %3671 = vmatmul.mubr.f32.gmra.mxu1 %v1848_v45  ;;  %v6060_v9 = vld [vmem:[#allocation6_spill] sm:$0xff] }
 0x4ce   :  { %v4035_v20 = vpop.eup %4034  ;;  %3673 = vmatprep.mubr.f32.mxu1 %v1850_v34  ;;  %4048 = vrcp.f32 %v1742_v35  ;;  %v6061_v35 = vld [vmem:[#allocation8_spill] sm:$0xff] }
 0x4cf   :  { %v1852_v30 = vmul.f32 %v4035_v20, %v5378_v63  ;;  %v4037_v5 = vpop.eup %4036 }
 0x4d0   :  { %v1740_v58 = vpop.xlane.xlu0 %1739  ;;  %v1858_v15 = vmul.f32 %v4037_v5, %v5329_v50 }
 0x4d1   :  { %4050 = vrcp.f32 %v1740_v58  ;;  %3674 = vmatmul.mubr.f32.gmra.mxu1 %v1852_v30  ;;  %v6062_v58 = vld [vmem:[#allocation10_spill] sm:$0xff] }
 0x4d2   :  { %v4039_v62 = vpop.eup %4038  ;;  %3676 = vmatprep.mubr.f32.mxu1 %v1854_v53  ;;  %4052 = vrcp.f32 %v1746_v23  ;;  %v1754_v21 = vpop.xlane.xlu1 %1753  ;;  %v6063_v23 = vld [vmem:[#allocation11_spill] sm:$0xff] }
 0x4d3   :  { %v1856_v31 = vmul.f32 %v4039_v62, %v5386_v2  ;;  %v4041_v56 = vpop.eup %4040 }
 0x4d4   :  { %v1744_v12 = vpop.xlane.xlu0 %1743  ;;  %v1862_v41 = vmul.f32 %v4041_v56, %v5343_v18  ;;  %v6064_v56 = vld [vmem:[#allocation13_spill] sm:$0xff] }
 0x4d5   :  { %4054 = vrcp.f32 %v1744_v12  ;;  %3677 = vmatmul.mubr.f32.gmra.mxu1 %v1856_v31 }
 0x4d6   :  { %v4043_v63 = vpop.eup %4042  ;;  %3679 = vmatprep.mubr.f32.mxu1 %v1858_v15  ;;  %4056 = vrcp.f32 %v1750_v8 }
 0x4d7   :  { %v1860_v27 = vmul.f32 %v4043_v63, %v5390_v33  ;;  %v4045_v47 = vpop.eup %4044  ;;  %v23_v63 = vld [vmem:[%s5988_s1 + $0x60] sm:$0xff] }
 0x4d8   :  { %v1748_v1 = vpop.xlane.xlu0 %1747  ;;  %v1866_v36 = vmul.f32 %v4045_v47, %v5355_v42 }
 0x4d9   :  { %4058 = vrcp.f32 %v1748_v1  ;;  %3680 = vmatmul.mubr.f32.gmra.mxu1 %v1860_v27  ;;  %v22_v27 = vld [vmem:[%s5988_s1 + $0x58] sm:$0xff] }
 0x4da   :  { %v4047_v2 = vpop.eup %4046  ;;  %3682 = vmatprep.mubr.f32.mxu1 %v1862_v41  ;;  %4060 = vrcp.f32 %v1754_v21  ;;  %v1758_v38 = vpop.xlane.xlu1 %1757 }
 0x4db   :  { %v1864_v50 = vmul.f32 %v4047_v2, %v5398_v37  ;;  %v4049_v7 = vpop.eup %4048 }
 0x4dc   :  { %v1752_v32 = vpop.xlane.xlu0 %1751  ;;  %v1870_v19 = vmul.f32 %v4049_v7, %v5368_v51 }
 0x4dd   :  { %4062 = vrcp.f32 %v1752_v32  ;;  %3683 = vmatmul.mubr.f32.gmra.mxu1 %v1864_v50 }
 0x4de   :  { %v4051_v33 = vpop.eup %4050  ;;  %3685 = vmatprep.mubr.f32.mxu1 %v1866_v36  ;;  %4064 = vrcp.f32 %v1758_v38 }
 0x4df   :  { %v1868_v18 = vmul.f32 %v4051_v33, %v5402_v60  ;;  %v4053_v10 = vpop.eup %4052 }
 0x4e0   :  { %v1756_v26 = vpop.xlane.xlu0 %1755  ;;  %v1874_v57 = vmul.f32 %v4053_v10, %v5382_v3 }
 0x4e1   :  { %4066 = vrcp.f32 %v1756_v26  ;;  %3686 = vmatmul.mubr.f32.gmra.mxu1 %v1868_v18 }
 0x4e2   :  { %v4055_v37 = vpop.eup %4054  ;;  %v1762_v55 = vpop.xlane.xlu1 %1761  ;;  %3688 = vmatprep.mubr.f32.mxu1 %v1870_v19 }
 0x4e3   :  { %v1872_v42 = vmul.f32 %v4055_v37, %v5410_v22  ;;  %4068 = vrcp.f32 %v1762_v55  ;;  %v4057_v49 = vpop.eup %4056 }
 0x4e4   :  { %v1760_v28 = vpop.xlane.xlu0 %1759  ;;  %v1878_v13 = vmul.f32 %v4057_v49, %v5394_v6 }
 0x4e5   :  { %4070 = vrcp.f32 %v1760_v28  ;;  %3689 = vmatmul.mubr.f32.gmra.mxu1 %v1872_v42 }
 0x4e6   :  { %v4059_v60 = vpop.eup %4058  ;;  %3691 = vmatprep.mubr.f32.mxu1 %v1874_v57 }
 0x4e7   :  { %v1876_v39 = vmul.f32 %v4059_v60, %v5414_v4  ;;  %v4061_v24 = vpop.eup %4060  ;;  %v6057_v4 = vld [vmem:[#allocation9_spill] sm:$0xff] }
 0x4e8   :  { %v1764_v51 = vpop.xlane.xlu0 %1763  ;;  %v1882_v61 = vmul.f32 %v4061_v24, %v6056_v59 }
 0x4e9   :  { %4072 = vrcp.f32 %v1764_v51  ;;  %3692 = vmatmul.mubr.f32.gmra.mxu1 %v1876_v39 }
 0x4ea   :  { %v4063_v52 = vpop.eup %4062  ;;  %v1766_v16 = vpop.xlane.xlu1 %1765  ;;  %3694 = vmatprep.mubr.f32.mxu1 %v1878_v13 }
 0x4eb   :  { %4074 = vrcp.f32 %v1766_v16  ;;  %v1880_v22 = vmul.f32 %v4063_v52, %v5421_v43  ;;  %v4065_v54 = vpop.eup %4064  ;;  %v24_v43 = vld [vmem:[%s5988_s1 + $0x68] sm:$0xff] }
 0x4ec   :  { %v1768_v3 = vpop.xlane.xlu0 %1767  ;;  %v1886_v0 = vmul.f32 %v4065_v54, %v6058_v11  ;;  %3712 = vmatprep.subr.mxu1 %v24_v43 }
 0x4ed   :  { %4076 = vrcp.f32 %v1768_v3  ;;  %3695 = vmatmul.mubr.f32.gmra.mxu1 %v1880_v22 }
 0x4ee   :  { %v4067_v48 = vpop.eup %4066  ;;  %3697 = vmatprep.mubr.f32.mxu1 %v1882_v61  ;;  %3713 = vmatpush3.msra.mxu1 %v24_v43 }
 0x4ef   :  { %v1884_v29 = vmul.f32 %v4067_v48, %v6057_v4  ;;  %3714 = vmatprep.subr.mxu1 %v23_v63 }
 0x4f0   :  { %v1772_v6 = vpop.xlane.xlu0 %1771  ;;  %v4069_v40 = vpop.eup %4068  ;;  %3715 = vmatpush3.msra.mxu1 %v23_v63 }
 0x4f1   :  { %3698 = vmatmul.mubr.f32.gmra.mxu1 %v1884_v29  ;;  %4078 = vrcp.f32 %v1772_v6  ;;  %v1890_v34 = vmul.f32 %v4069_v40, %v6060_v9  ;;  %3716 = vmatprep.subr.mxu1 %v22_v27 }
 0x4f2   :  { %v4071_v25 = vpop.eup %4070  ;;  %v1770_v44 = vpop.xlane.xlu1 %1769  ;;  %3700 = vmatprep.mubr.f32.mxu1 %v1886_v0  ;;  %3717 = vmatpush3.msra.mxu1 %v22_v27  ;;  %v4132_v27 = vld [vmem:[%s5988_s1 + $0x110] sm:$0xff] }
 0x4f3   :  { %4080 = vrcp.f32 %v1770_v44  ;;  %v1888_v45 = vmul.f32 %v4071_v25, %v6059_v17 }
 0x4f5   :  { %3701 = vmatmul.mubr.f32.gmra.mxu1 %v1888_v45 }
 0x4f6   :  { %v4073_v14 = vpop.eup %4072  ;;  %3703 = vmatprep.mubr.f32.mxu1 %v1890_v34 }
 0x4f7   :  { %v1892_v20 = vmul.f32 %v4073_v14, %v6061_v35  ;;  %v4126_v14 = vld [vmem:[%s5988_s1 + $0x100] sm:$0xff] }
 0x4f8   :  { %v4075_v30 = vpop.eup %4074 }
 0x4f9   :  { %3704 = vmatmul.mubr.f32.gmra.mxu1 %v1892_v20  ;;  %v1894_v53 = vmul.f32 %v4075_v30, %v6062_v58  ;;  %v4127_v20 = vld [vmem:[%s5988_s1 + $0x108] sm:$0xff] }
 0x4fa   :  { %v4077_v5 = vpop.eup %4076 }
 0x4fb   :  { %3706 = vmatprep.mubr.f32.mxu1 %v1894_v53  ;;  %v1896_v62 = vmul.f32 %v4077_v5, %v6063_v23  ;;  %v4128_v53 = vld [vmem:[%s5988_s1 + $0x80] sm:$0xff] }
 0x4fc   :  { %v4129_v23 = vld [vmem:[%s5988_s1 + $0x180] sm:$0xff] }
 0x4fd   :  { %3707 = vmatmul.mubr.f32.gmra.mxu1 %v1896_v62 }
 0x4fe   :  { %v4079_v31 = vpop.eup %4078 }
 0x4ff   :  { %v1900_v8 = vmul.f32 %v4079_v31, %v6064_v56  ;;  %v4130_v31 = vld [vmem:[%s5988_s1 + $0x88] sm:$0xff] }
 0x500   :  { %v4081_v12 = vpop.eup %4080 }
 0x501   :  { %v1898_v15 = vmul.f32 %v4081_v12, %v5450_v46  ;;  %v21_v46 = vld [vmem:[%s5988_s1 + $0x50] sm:$0xff] }
 0x502   :  { %3718 = vmatprep.subr.mxu1 %v21_v46 }
 0x503   :  { %3709 = vmatprep.mubr.f32.mxu1 %v1898_v15  ;;  %3719 = vmatpush3.msra.mxu1 %v21_v46  ;;  %v4131_v15 = vld [vmem:[%s5988_s1 + $0x188] sm:$0xff] }
 0x504   :  { %3710 = vmatmul.mubr.f32.gmra.mxu1 %v1900_v8 }
 0x522   :  { %v3618_v1 = vpop.f32.mrf.mxu1 }
 0x523   :  { %v2335_v12 = vmul.f32 %v4130_v31, %v3618_v1  ;;  %v4134_v1 = vld [vmem:[%s5988_s1 + $0x208] sm:$0xff] }
 0x524   :  { %v2015_v41 = vpop.f32.mrf.mxu1 }
 0x525   :  { %v2334_v5 = vmul.f32 %v4128_v53, %v2015_v41 }
 0x52a   :  { %v5526_v47 = vpop.f32.mrf.mxu1 }
 0x52c   :  { %v5528_v21 = vpop.f32.mrf.mxu1 }
 0x532   :  { %v5530_v2 = vpop.f32.mrf.mxu1 }
 0x534   :  { %v5532_v50 = vpop.f32.mrf.mxu1 }
 0x53a   :  { %v5534_v32 = vpop.f32.mrf.mxu1 }
 0x53c   :  { %v5536_v36 = vpop.f32.mrf.mxu1 }
 0x542   :  { %v5538_v7 = vpop.f32.mrf.mxu1 }
 0x544   :  { %v5540_v38 = vpop.f32.mrf.mxu1 }
 0x54a   :  { %v5542_v33 = vpop.f32.mrf.mxu1 }
 0x54c   :  { %v5544_v18 = vpop.f32.mrf.mxu1 }
 0x552   :  { %v5546_v26 = vpop.f32.mrf.mxu1 }
 0x554   :  { %v5548_v19 = vpop.f32.mrf.mxu1 }
 0x55a   :  { %v5550_v10 = vpop.f32.mrf.mxu1 }
 0x55c   :  { %v5552_v37 = vpop.f32.mrf.mxu1 }
 0x562   :  { %v3642_v55 = vpop.f32.mrf.mxu1 }
 0x563   :  { %v2351_v30 = vmul.f32 %v4127_v20, %v3642_v55  ;;  %v4133_v55 = vld [vmem:[%s5988_s1 + $0x118] sm:$0xff] }
 0x564   :  { %v2095_v42 = vpop.f32.mrf.mxu1 }
 0x565   :  { %v2350_v35 = vmul.f32 %v4126_v14, %v2095_v42  ;;  %v2399_v41 = vadd.f32 %v2351_v30, %v2335_v12 }
 0x567   :  { %v2398_v63 = vadd.f32 %v2350_v35, %v2334_v5  ;;  %v4138_v5 = vld [vmem:[%s5988_s1 + $0x98] sm:$0xff] }
 0x569   :  { %v3645_v28 = vpop.f32.mrf.mxu1 }
 0x56a   :  { %v2353_v42 = vmul.f32 %v4133_v55, %v3645_v28  ;;  %v4137_v28 = vld [vmem:[%s5988_s1 + $0x200] sm:$0xff] }
 0x56b   :  { %v2105_v57 = vpop.f32.mrf.mxu1 }
 0x56c   :  { %v2352_v46 = vmul.f32 %v4132_v27, %v2105_v57  ;;  %v4136_v57 = vld [vmem:[%s5988_s1 + $0x190] sm:$0xff] }
 0x56d   :  { %v5554_v49 = vpop.f32.mrf.mxu1 }
 0x56f   :  { %v5556_v60 = vpop.f32.mrf.mxu1 }
 0x571   :  { %v5558_v39 = vpop.f32.mrf.mxu1 }
 0x573   :  { %v5560_v51 = vpop.f32.mrf.mxu1 }
 0x575   :  { %v5562_v13 = vpop.f32.mrf.mxu1 }
 0x577   :  { %v5564_v24 = vpop.f32.mrf.mxu1 }
 0x579   :  { %v5566_v52 = vpop.f32.mrf.mxu1 }
 0x57b   :  { %v5568_v16 = vpop.f32.mrf.mxu1 }
 0x57d   :  { %v5570_v22 = vpop.f32.mrf.mxu1 }
 0x57f   :  { %v5572_v3 = vpop.f32.mrf.mxu1 }
 0x581   :  { %v5574_v59 = vpop.f32.mrf.mxu1 }
 0x583   :  { %v5576_v61 = vpop.f32.mrf.mxu1 }
 0x585   :  { %v3666_v54 = vpop.f32.mrf.mxu1 }
 0x586   :  { %v2367_v56 = vmul.f32 %v4131_v15, %v3666_v54  ;;  %v4135_v54 = vld [vmem:[%s5988_s1 + $0x90] sm:$0xff] }
 0x587   :  { %v2175_v48 = vpop.f32.mrf.mxu1  ;;  %v2336_v35 = vmul.f32 %v4135_v54, %v5528_v21  ;;  %v4139_v21 = vld [vmem:[%s5988_s1 + $0x198] sm:$0xff] }
 0x588   :  { %v2366_v62 = vmul.f32 %v4129_v23, %v2175_v48  ;;  %v2337_v23 = vmul.f32 %v4138_v5, %v5526_v47  ;;  %v2415_v31 = vadd.f32 %v2399_v41, %v2367_v56  ;;  %v4141_v47 = vld [vmem:[%s5988_s1 + $0x128] sm:$0xff] }
 0x589   :  { %v3669_v4 = vpop.f32.mrf.mxu1  ;;  %v2400_v15 = vadd.f32 %v2352_v46, %v2336_v35  ;;  %v2355_v56 = vmul.f32 %v4141_v47, %v5554_v49  ;;  %v4146_v35 = vld [vmem:[%s5988_s1 + $0xa8] sm:$0xff]  ;;  %v4153_v47 = vld [vmem:[%s5988_s1 + $0x220] sm:$0xff] }
 0x58a   :  { %v2414_v20 = vadd.f32 %v2398_v63, %v2366_v62  ;;  %v2369_v62 = vmul.f32 %v4139_v21, %v3669_v4  ;;  %v2401_v27 = vadd.f32 %v2353_v42, %v2337_v23  ;;  %v4142_v4 = vld [vmem:[%s5988_s1 + $0x218] sm:$0xff] }
 0x58b   :  { %v2185_v29 = vpop.f32.mrf.mxu1 }
 0x58c   :  { %v2368_v30 = vmul.f32 %v4136_v57, %v2185_v29  ;;  %v4140_v29 = vld [vmem:[%s5988_s1 + $0x120] sm:$0xff]  ;;  %v4147_v57 = vld [vmem:[%s5988_s1 + $0x1a8] sm:$0xff] }
 0x58d   :  { %v5578_v6 = vpop.f32.mrf.mxu1 }
 0x58f   :  { %v2195_v11 = vpop.f32.mrf.mxu1 }
 0x591   :  { %v5580_v0 = vpop.f32.mrf.mxu1 }
 0x593   :  { %v5582_v40 = vpop.f32.mrf.mxu1 }
 0x595   :  { %v5584_v25 = vpop.f32.mrf.mxu1 }
 0x597   :  { %v5586_v44 = vpop.f32.mrf.mxu1 }
 0x599   :  { %v5588_v43 = vpop.f32.mrf.mxu1 }
 0x59b   :  { %v5590_v17 = vpop.f32.mrf.mxu1 }
 0x59d   :  { %v5592_v45 = vpop.f32.mrf.mxu1 }
 0x59f   :  { %v5594_v9 = vpop.f32.mrf.mxu1 }
 0x5a1   :  { %v5596_v34 = vpop.f32.mrf.mxu1 }
 0x5a3   :  { %v5604_v58 = vpop.f32.mrf.mxu1 }
 0x5a5   :  { %v3690_v8 = vpop.f32.mrf.mxu1 }
 0x5a6   :  { %v2383_v48 = vmul.f32 %v4134_v1, %v3690_v8  ;;  %v2354_v8 = vmul.f32 %v4140_v29, %v5556_v60  ;;  %v4143_v60 = vld [vmem:[%s5988_s1 + $0xa0] sm:$0xff]  ;;  %v2416_v1 = vadd.f32 %v2400_v15, %v2368_v30 }
 0x5a7   :  { %v2255_v14 = vpop.f32.mrf.mxu1  ;;  %v2338_v42 = vmul.f32 %v4143_v60, %v5532_v50  ;;  %v2339_v50 = vmul.f32 %v4146_v35, %v5530_v2  ;;  %v4158_v35 = vld [vmem:[%s5988_s1 + $0x238] sm:$0xff] }
 0x5a8   :  { %v2382_v53 = vmul.f32 %v4137_v28, %v2255_v14  ;;  %v5654_v41 = vadd.f32 %v2415_v31, %v2383_v48  ;;  %v4144_v14 = vld [vmem:[%s5988_s1 + $0x1a0] sm:$0xff]  ;;  %v4145_v48 = vld [vmem:[%s5988_s1 + $0x210] sm:$0xff]  ;;  %v4149_v31 = vld [vmem:[%s5988_s1 + $0x138] sm:$0xff] }
 0x5a9   :  { %v3693_v12 = vpop.f32.mrf.mxu1  ;;  %v2370_v49 = vmul.f32 %v4144_v14, %v2195_v11  ;;  %v2371_v11 = vmul.f32 %v4147_v57, %v5578_v6  ;;  %v2402_v28 = vadd.f32 %v2354_v8, %v2338_v42  ;;  %v2403_v2 = vadd.f32 %v2355_v56, %v2339_v50 }
 0x5aa   :  { %v5648_v63 = vadd.f32 %v2414_v20, %v2382_v53  ;;  %v2385_v46 = vmul.f32 %v4142_v4, %v3693_v12  ;;  %v2417_v20 = vadd.f32 %v2401_v27, %v2369_v62  ;;  %v4148_v53 = vld [vmem:[%s5988_s1 + $0x130] sm:$0xff]  ;;  %v2357_v6 = vmul.f32 %v4149_v31, %v5558_v39  ;;  %v4150_v62 = vld [vmem:[%s5988_s1 + $0x228] sm:$0xff]  ;;  %v4154_v4 = vld [vmem:[%s5988_s1 + $0xb8] sm:$0xff] }
 0x5ab   :  { %v2265_v55 = vpop.f32.mrf.mxu1  ;;  %v2356_v5 = vmul.f32 %v4148_v53, %v5560_v51  ;;  %v4151_v51 = vld [vmem:[%s5988_s1 + $0xb0] sm:$0xff]  ;;  %v2418_v8 = vadd.f32 %v2402_v28, %v2370_v49  ;;  %v4163_v31 = vld [vmem:[%s5988_s1 + $0x1c8] sm:$0xff] }
 0x5ac   :  { %v2384_v54 = vmul.f32 %v4145_v48, %v2265_v55  ;;  %3720 = vmatprep.mubr.msk.f32.mxu1 %vm179_vm0, %v5648_v63  ;;  %v5691_v21 = vadd.f32 %v2417_v20, %v2385_v46  ;;  %v2340_v29 = vmul.f32 %v4151_v51, %v5536_v36  ;;  %v4152_v27 = vld [vmem:[%s5988_s1 + $0x1b0] sm:$0xff]  ;;  %v2341_v36 = vmul.f32 %v4154_v4, %v5534_v32  ;;  %v4155_v55 = vld [vmem:[%s5988_s1 + $0x1b8] sm:$0xff]  ;;  %v4157_v48 = vld [vmem:[%s5988_s1 + $0x148] sm:$0xff] }
 0x5ad   :  { %v3696_v30 = vpop.f32.mrf.mxu1  ;;  %3721 = vmatmul.mubr.msk.f32.vlgmr.msra.gmra.mxu1 %vm179_vm0, %v5654_v41  ;;  %v2372_v39 = vmul.f32 %v4152_v27, %v5582_v40  ;;  %v2419_v46 = vadd.f32 %v2403_v2, %v2371_v11  ;;  %v2373_v40 = vmul.f32 %v4155_v55, %v5580_v0  ;;  %v2359_v0 = vmul.f32 %v4157_v48, %v5562_v13  ;;  %v4161_v28 = vld [vmem:[%s5988_s1 + $0x230] sm:$0xff]  ;;  %v4166_v27 = vld [vmem:[%s5988_s1 + $0x248] sm:$0xff] }
 0x5ae   :  { %v5685_v23 = vadd.f32 %v2416_v1, %v2384_v54  ;;  %v2387_v12 = vmul.f32 %v4150_v62, %v3696_v30  ;;  %v2404_v42 = vadd.f32 %v2356_v5, %v2340_v29  ;;  %v4156_v1 = vld [vmem:[%s5988_s1 + $0x140] sm:$0xff]  ;;  %v2405_v32 = vadd.f32 %v2357_v6, %v2341_v36  ;;  %v4162_v5 = vld [vmem:[%s5988_s1 + $0xc8] sm:$0xff]  ;;  %v4165_v29 = vld [vmem:[%s5988_s1 + $0x158] sm:$0xff] }
 0x5af   :  { %v2275_v15 = vpop.f32.mrf.mxu1  ;;  %v2358_v14 = vmul.f32 %v4156_v1, %v5564_v24  ;;  %v4159_v24 = vld [vmem:[%s5988_s1 + $0xc0] sm:$0xff]  ;;  %v4168_v36 = vld [vmem:[%s5988_s1 + $0x1d0] sm:$0xff] }
 0x5b0   :  { %v2386_v56 = vmul.f32 %v4153_v47, %v2275_v15  ;;  %3723 = vmatprep.mubr.msk.f32.mxu1 %vm179_vm0, %v5685_v23  ;;  %v5729_v54 = vadd.f32 %v2419_v46, %v2387_v12  ;;  %v2342_v57 = vmul.f32 %v4159_v24, %v5540_v38  ;;  %v2420_v11 = vadd.f32 %v2404_v42, %v2372_v39  ;;  %v4160_v30 = vld [vmem:[%s5988_s1 + $0x1c0] sm:$0xff]  ;;  %v4164_v12 = vld [vmem:[%s5988_s1 + $0x150] sm:$0xff]  ;;  %v4171_v42 = vld [vmem:[%s5988_s1 + $0x1d8] sm:$0xff] }
 0x5b1   :  { %v3699_v60 = vpop.f32.mrf.mxu1  ;;  %3724 = vmatmul.mubr.msk.f32.gmra.mxu1 %vm179_vm0, %v5691_v21  ;;  %v2374_v13 = vmul.f32 %v4160_v30, %v5586_v44  ;;  %v2343_v38 = vmul.f32 %v4162_v5, %v5538_v7  ;;  %v2421_v2 = vadd.f32 %v2405_v32, %v2373_v40  ;;  %v2375_v44 = vmul.f32 %v4163_v31, %v5584_v25  ;;  %v4169_v46 = vld [vmem:[%s5988_s1 + $0x240] sm:$0xff]  ;;  %v4170_v40 = vld [vmem:[%s5988_s1 + $0xd8] sm:$0xff]  ;;  %v4178_v5 = vld [vmem:[%s5988_s1 + $0xe8] sm:$0xff] }
 0x5b2   :  { %v5723_v49 = vadd.f32 %v2418_v8, %v2386_v56  ;;  %v2389_v50 = vmul.f32 %v4158_v35, %v3699_v60  ;;  %v2406_v62 = vadd.f32 %v2358_v14, %v2342_v57  ;;  %v2360_v15 = vmul.f32 %v4164_v12, %v5568_v16  ;;  %v4167_v16 = vld [vmem:[%s5988_s1 + $0xd0] sm:$0xff]  ;;  %v4172_v32 = vld [vmem:[%s5988_s1 + $0x160] sm:$0xff]  ;;  %v4173_v35 = vld [vmem:[%s5988_s1 + $0x168] sm:$0xff] }
 0x5b3   :  { %v2285_v20 = vpop.f32.mrf.mxu1  ;;  %v2407_v7 = vadd.f32 %v2359_v0, %v2343_v38  ;;  %v2361_v25 = vmul.f32 %v4165_v29, %v5566_v52  ;;  %v2344_v56 = vmul.f32 %v4167_v16, %v5544_v18  ;;  %v2376_v52 = vmul.f32 %v4168_v36, %v5590_v17  ;;  %v4180_v12 = vld [vmem:[%s5988_s1 + $0x178] sm:$0xff]  ;;  %v4184_v16 = vld [vmem:[%s5988_s1 + $0x170] sm:$0xff] }
 0x5b4   :  { %v2388_v53 = vmul.f32 %v4161_v28, %v2285_v20  ;;  %3726 = vmatprep.mubr.msk.f32.mxu1 %vm179_vm0, %v5723_v49  ;;  %v5767_v8 = vadd.f32 %v2421_v2, %v2389_v50  ;;  %v2422_v4 = vadd.f32 %v2406_v62, %v2374_v13  ;;  %v2345_v18 = vmul.f32 %v4170_v40, %v5542_v33  ;;  %v4174_v20 = vld [vmem:[%s5988_s1 + $0x258] sm:$0xff]  ;;  %v4176_v13 = vld [vmem:[%s5988_s1 + $0x1e0] sm:$0xff]  ;;  %v4177_v28 = vld [vmem:[%s5988_s1 + $0x250] sm:$0xff] }
 0x5b5   :  { %v3702_v6 = vpop.f32.mrf.mxu1  ;;  %3727 = vmatmul.mubr.msk.f32.gmra.mxu1 %vm179_vm0, %v5729_v54  ;;  %v2423_v60 = vadd.f32 %v2407_v7, %v2375_v44  ;;  %v2377_v17 = vmul.f32 %v4171_v42, %v5588_v43  ;;  %v2408_v14 = vadd.f32 %v2360_v15, %v2344_v56  ;;  %v2362_v48 = vmul.f32 %v4172_v32, %v5572_v3  ;;  %v4175_v3 = vld [vmem:[%s5988_s1 + $0xe0] sm:$0xff]  ;;  %v4179_v2 = vld [vmem:[%s5988_s1 + $0x1e8] sm:$0xff]  ;;  %v4185_v36 = vld [vmem:[%s5988_s1 + $0x1f8] sm:$0xff] }
 0x5b6   :  { %v5761_v51 = vadd.f32 %v2420_v11, %v2388_v53  ;;  %v2391_v39 = vmul.f32 %v4166_v27, %v3702_v6  ;;  %v2409_v33 = vadd.f32 %v2361_v25, %v2345_v18  ;;  %v2363_v43 = vmul.f32 %v4173_v35, %v5570_v22  ;;  %v4181_v7 = vld [vmem:[%s5988_s1 + $0x268] sm:$0xff]  ;;  %v4182_v27 = vld [vmem:[%s5988_s1 + $0x260] sm:$0xff] }
 0x5b7   :  { %v2295_v47 = vpop.f32.mrf.mxu1  ;;  %v2346_v11 = vmul.f32 %v4175_v3, %v5548_v19  ;;  %v2424_v30 = vadd.f32 %v2408_v14, %v2376_v52  ;;  %v2378_v22 = vmul.f32 %v4176_v13, %v5594_v9  ;;  %v2347_v19 = vmul.f32 %v4178_v5, %v5546_v26 }
 0x5b8   :  { %v2390_v55 = vmul.f32 %v4169_v46, %v2295_v47  ;;  %3729 = vmatprep.mubr.msk.f32.mxu1 %vm179_vm0, %v5761_v51  ;;  %v5805_v50 = vadd.f32 %v2423_v60, %v2391_v39  ;;  %v2425_v38 = vadd.f32 %v2409_v33, %v2377_v17  ;;  %v2379_v9 = vmul.f32 %v4179_v2, %v5592_v45  ;;  %v4183_v47 = vld [vmem:[%s5988_s1 + $0xf8] sm:$0xff] }
 0x5b9   :  { %v3705_v1 = vpop.f32.mrf.mxu1  ;;  %3730 = vmatmul.mubr.msk.f32.gmra.mxu1 %vm179_vm0, %v5767_v8  ;;  %v2410_v44 = vadd.f32 %v2362_v48, %v2346_v11  ;;  %v2411_v62 = vadd.f32 %v2363_v43, %v2347_v19  ;;  %v2365_v26 = vmul.f32 %v4180_v12, %v5574_v59  ;;  %v2349_v59 = vmul.f32 %v4183_v47, %v5550_v10  ;;  %v4186_v10 = vld [vmem:[%s5988_s1 + $0xf0] sm:$0xff] }
 0x5ba   :  { %v5799_v0 = vadd.f32 %v2422_v4, %v2390_v55  ;;  %v2393_v24 = vmul.f32 %v4174_v20, %v3705_v1  ;;  %v2364_v56 = vmul.f32 %v4184_v16, %v5576_v61  ;;  %v2381_v52 = vmul.f32 %v4185_v36, %v5596_v34  ;;  %v4187_v61 = vld [vmem:[%s5988_s1 + $0x1f0] sm:$0xff]  ;;  %v4188_v1 = vld [vmem:[%s5988_s1 + $0x278] sm:$0xff] }
 0x5bb   :  { %v2305_v57 = vpop.f32.mrf.mxu1  ;;  %v2426_v25 = vadd.f32 %v2410_v44, %v2378_v22  ;;  %v2427_v4 = vadd.f32 %v2411_v62, %v2379_v9  ;;  %v2348_v55 = vmul.f32 %v4186_v10, %v5552_v37  ;;  %v2413_v40 = vadd.f32 %v2365_v26, %v2349_v59  ;;  %v5909_v11 = vld [vmem:[%s5988_s1 + $0x70] ss:$0 sm:$0xff] }
 0x5bc   :  { %v2392_v53 = vmul.f32 %v4177_v28, %v2305_v57  ;;  %3732 = vmatprep.mubr.msk.f32.mxu1 %vm179_vm0, %v5799_v0  ;;  %v2441_v15 = vadd.f32 %v2425_v38, %v2393_v24  ;;  %v2380_v18 = vmul.f32 %v4187_v61, %v5604_v58  ;;  %v4189_v58 = vld [vmem:[%s5988_s1 + $0x270] sm:$0xff]  ;;  %v26_v61 = vld [vmem:[%s5988_s1 + $0x78] sm:$0x1] }
 0x5bd   :  { %v3708_v31 = vpop.f32.mrf.mxu1  ;;  %3733 = vmatmul.mubr.msk.f32.gmra.mxu1 %vm179_vm0, %v5805_v50  ;;  %v2412_v34 = vadd.f32 %v2364_v56, %v2348_v55  ;;  %v2429_v17 = vadd.f32 %v2413_v40, %v2381_v52 }
 0x5be   :  { %v2440_v6 = vadd.f32 %v2424_v30, %v2392_v53  ;;  %v2395_v29 = vmul.f32 %v4181_v7, %v3708_v31 }
 0x5bf   :  { %v2315_v45 = vpop.f32.mrf.mxu1  ;;  %v2428_v32 = vadd.f32 %v2412_v34, %v2380_v18  ;;  %v2781_v18 = vlaneseq  ;;  %v155_v34 = vld [vmem:[%s5988_s1 + $0x480] sm:$0xff] }
 0x5c0   :  { %v2394_v39 = vmul.f32 %v4182_v27, %v2315_v45  ;;  %3735 = vmatprep.mubr.msk.f32.mxu1 %vm179_vm0, %v2440_v6  ;;  %v2443_v60 = vadd.f32 %v2427_v4, %v2395_v29 }
 0x5c1   :  { %3736 = vmatmul.mubr.msk.f32.gmra.mxu1 %vm179_vm0, %v2441_v15 }
 0x5c2   :  { %v2442_v46 = vadd.f32 %v2426_v25, %v2394_v39 }
 0x5c4   :  { %v3711_v42 = vpop.f32.mrf.mxu1  ;;  %3738 = vmatprep.mubr.msk.f32.mxu1 %vm179_vm0, %v2442_v46 }
 0x5c5   :  { %v2397_v14 = vmul.f32 %v4188_v1, %v3711_v42  ;;  %3739 = vmatmul.mubr.msk.f32.gmra.mxu1 %vm179_vm0, %v2443_v60 }
 0x5c6   :  { %v2325_v37 = vpop.f32.mrf.mxu1 }
 0x5c7   :  { %v2445_v48 = vadd.f32 %v2429_v17, %v2397_v14  ;;  %v2396_v33 = vmul.f32 %v4189_v58, %v2325_v37  ;;  %v156_v17 = vld [vmem:[%s5988_s1 + $0x488] sm:$0xff] }
 0x5c9   :  { %v2444_v35 = vadd.f32 %v2428_v32, %v2396_v33  ;;  %3779 = vmatprep.subr.mxu1 %v2445_v48 }
 0x5ca   :  { %3780 = vmatpush3.msra.mxu1 %v2445_v48 }
 0x5cb   :  { %3741 = vmatprep.mubr.msk.f32.mxu1 %vm179_vm0, %v2444_v35  ;;  %3781 = vmatprep.subr.mxu1 %v2444_v35 }
 0x5cc   :  { %3742 = vmatmul.mubr.msk.f32.gmra.mxu1 %vm179_vm0, %v2445_v48 }
 0x5cd   :  { %3782 = vmatpush3.msra.mxu1 %v2444_v35 }
 0x5ce   :  { %3783 = vmatprep.subr.mxu1 %v2443_v60 }
 0x5cf   :  { %3784 = vmatpush3.msra.mxu1 %v2443_v60  ;;  %v2782_v60 = vshrl.u32 %v2781_v18, 7 }
 0x5d0   :  { %3785 = vmatprep.subr.mxu1 %v2442_v46 }
 0x5d1   :  { %3786 = vmatpush3.msra.mxu1 %v2442_v46  ;;  %v2783_v42 = vsub.s32 0, %v2782_v60 }
 0x5d2   :  { %3787 = vmatprep.subr.mxu1 %v2441_v15 }
 0x5d3   :  { %3788 = vmatpush3.msra.mxu1 %v2441_v15 }
 0x5d4   :  { %3789 = vmatprep.subr.mxu1 %v2440_v6 }
 0x5d5   :  { %3790 = vmatpush3.msra.mxu1 %v2440_v6 }
 0x5d6   :  { %3791 = vmatprep.subr.mxu1 %v5805_v50 }
 0x5d7   :  { %3792 = vmatpush3.msra.mxu1 %v5805_v50 }
 0x5d8   :  { %3793 = vmatprep.subr.mxu1 %v5799_v0 }
 0x5d9   :  { %3794 = vmatpush3.msra.mxu1 %v5799_v0 }
 0x5da   :  { %3795 = vmatprep.subr.mxu1 %v5767_v8 }
 0x5db   :  { %3796 = vmatpush3.msra.mxu1 %v5767_v8 }
 0x5dc   :  { %3797 = vmatprep.subr.mxu1 %v5761_v51 }
 0x5dd   :  { %3798 = vmatpush3.msra.mxu1 %v5761_v51 }
 0x5de   :  { %3799 = vmatprep.subr.mxu1 %v5729_v54 }
 0x5df   :  { %3800 = vmatpush3.msra.mxu1 %v5729_v54  ;;  %v4193_v54 = vmov 0.0  }
 0x5e0   :  { %3801 = vmatprep.subr.mxu1 %v5723_v49  ;;  %3744 = vmatprep.subr.mxu0 %v4193_v54 }
 0x5e1   :  { %3802 = vmatpush3.msra.mxu1 %v5723_v49  ;;  %3776 = vmatprep.mubr.msk.f32.mxu0 %vm4194_vm1, %v4193_v54 }
 0x5e2   :  { %3803 = vmatprep.subr.mxu1 %v5691_v21 }
 0x5e3   :  { %3804 = vmatpush3.msra.mxu1 %v5691_v21 }
 0x5e4   :  { %3805 = vmatprep.subr.mxu1 %v5685_v23 }
 0x5e5   :  { %3806 = vmatpush3.msra.mxu1 %v5685_v23 }
 0x5e6   :  { %3807 = vmatprep.subr.mxu1 %v5654_v41 }
 0x5e7   :  { %3808 = vmatpush3.msra.mxu1 %v5654_v41 }
 0x5e8   :  { %3809 = vmatprep.subr.mxu1 %v5648_v63 }
 0x5e9   :  { %3810 = vmatpush3.msra.mxu1 %v5648_v63 }
 0x66d   :  { %v5898_v21 = vpop.f32.mrf.mxu1 }
 0x66e   :  { %v2570_v56 = vadd.f32 %v5898_v21, %v5909_v11 }
 0x66f   :  { %v5900_v49 = vpop.f32.mrf.mxu1 }
 0x670   :  { %v2565_v36 = vadd.f32 %v5909_v11, %v5900_v49 }
 0x671   :  { %v5902_v23 = vpop.f32.mrf.mxu1 }
 0x672   :  { %v2580_v39 = vadd.f32 %v5902_v23, %v5909_v11 }
 0x673   :  { %v5904_v51 = vpop.f32.mrf.mxu1 }
 0x674   :  { %v2575_v59 = vadd.f32 %v5909_v11, %v5904_v51 }
 0x675   :  { %v3728_v41 = vpop.f32.mrf.mxu1 }
 0x676   :  { %v2590_v29 = vadd.f32 %v3728_v41, %v5909_v11 }
 0x677   :  { %v2584_v8 = vpop.f32.mrf.mxu1 }
 0x678   :  { %v2585_v25 = vadd.f32 %v5909_v11, %v2584_v8 }
 0x679   :  { %v3731_v0 = vpop.f32.mrf.mxu1 }
 0x67a   :  { %v2600_v12 = vadd.f32 %v3731_v0, %v5909_v11 }
 0x67b   :  { %v2594_v43 = vpop.f32.mrf.mxu1 }
 0x67c   :  { %v2595_v15 = vadd.f32 %v5909_v11, %v2594_v43 }
 0x67d   :  { %v3734_v63 = vpop.f32.mrf.mxu1 }
 0x67e   :  { %v2610_v31 = vadd.f32 %v3734_v63, %v5909_v11 }
 0x67f   :  { %v2604_v50 = vpop.f32.mrf.mxu1 }
 0x680   :  { %v2605_v6 = vadd.f32 %v5909_v11, %v2604_v50 }
 0x681   :  { %v3737_v20 = vpop.f32.mrf.mxu1 }
 0x682   :  { %v2620_v19 = vadd.f32 %v3737_v20, %v5909_v11 }
 0x683   :  { %v2614_v24 = vpop.f32.mrf.mxu1 }
 0x684   :  { %v2615_v2 = vadd.f32 %v5909_v11, %v2614_v24  ;;  %v4190_v24 = vld [vmem:[%s5988_s1 + $0x20] ss:$0 sm:$0xff] }
 0x685   :  { %v3740_v57 = vpop.f32.mrf.mxu1 }
 0x686   :  { %v2630_v53 = vadd.f32 %v3740_v57, %v5909_v11  ;;  %v6065_v57 = vld [vmem:[#allocation2_spill] sm:$0xff] }
 0x687   :  { %v2624_v3 = vpop.f32.mrf.mxu1 }
 0x688   :  { %v2625_v5 = vadd.f32 %v5909_v11, %v2624_v3  ;;  %v386_v3 = vadd.f32 %v4190_v24, %v6065_v57 }
 0x68c   :  { %v3743_v30 = vpop.f32.mrf.mxu1 }
 0x68d   :  { %v2640_v13 = vadd.f32 %v3743_v30, %v5909_v11  ;;  %v6066_v30 = vld [vmem:[#allocation3_spill] sm:$0xff] }
 0x68e   :  { %v2634_v22 = vpop.f32.mrf.mxu1 }
 0x68f   :  { %4082 = vtanh.f32 %v2640_v13  ;;  %v2635_v28 = vadd.f32 %v5909_v11, %v2634_v22  ;;  %v406_v11 = vmax.f32 %v386_v3, 0.0  ;;  %v381_v13 = vadd.f32 %v4190_v24, %v6066_v30 }
 0x691   :  { %4084 = vtanh.f32 %v2635_v28 }
 0x692   :  { %4086 = vtanh.f32 %v2630_v53 }
 0x693   :  { %4088 = vtanh.f32 %v2625_v5  ;;  %v405_v5 = vmax.f32 %v381_v13, 0.0 }
 0x694   :  { %4090 = vtanh.f32 %v2620_v19 }
 0x695   :  { %4092 = vtanh.f32 %v2615_v2 }
 0x696   :  { %4094 = vtanh.f32 %v2610_v31 }
 0x697   :  { %4096 = vtanh.f32 %v2605_v6 }
 0x698   :  { %4098 = vtanh.f32 %v2600_v12 }
 0x699   :  { %4100 = vtanh.f32 %v2595_v15 }
 0x69a   :  { %4102 = vtanh.f32 %v2590_v29 }
 0x69b   :  { %4104 = vtanh.f32 %v2585_v25 }
 0x69c   :  { %v4083_v38 = vpop.eup %4082  ;;  %4106 = vtanh.f32 %v2580_v39 }
 0x69d   :  { %3745 = vmatpush3.xpose.msk.msra.mxu0 %vm2659_vm2, %v4083_v38  ;;  %4108 = vtanh.f32 %v2575_v59  ;;  %v4195_v38 = vmov 1.0  }
 0x69e   :  { %3746 = vmatprep.subr.mxu0 %v4193_v54  ;;  %v4085_v9 = vpop.eup %4084  ;;  %4110 = vtanh.f32 %v2570_v56 }
 0x69f   :  { %v4087_v44 = vpop.eup %4086  ;;  %4112 = vtanh.f32 %v2565_v36 }
 0x6a0   :  { %v4089_v62 = vpop.eup %4088 }
 0x6a1   :  { %3747 = vmatpush3.xpose.msk.msra.mxu0 %vm2659_vm2, %v4085_v9  ;;  %v4091_v26 = vpop.eup %4090 }
 0x6a2   :  { %3748 = vmatprep.subr.mxu0 %v4193_v54  ;;  %v4093_v7 = vpop.eup %4092 }
 0x6a3   :  { %v4095_v45 = vpop.eup %4094 }
 0x6a4   :  { %v4097_v27 = vpop.eup %4096 }
 0x6a5   :  { %3749 = vmatpush3.xpose.msk.msra.mxu0 %vm2659_vm2, %v4087_v44  ;;  %v4099_v47 = vpop.eup %4098 }
 0x6a6   :  { %3750 = vmatprep.subr.mxu0 %v4193_v54  ;;  %v4101_v16 = vpop.eup %4100 }
 0x6a7   :  { %v4103_v4 = vpop.eup %4102 }
 0x6a8   :  { %v4105_v52 = vpop.eup %4104 }
 0x6a9   :  { %3751 = vmatpush3.xpose.msk.msra.mxu0 %vm2659_vm2, %v4089_v62  ;;  %v4107_v46 = vpop.eup %4106 }
 0x6aa   :  { %3752 = vmatprep.subr.mxu0 %v4193_v54  ;;  %v4109_v10 = vpop.eup %4108 }
 0x6ab   :  { %v4111_v55 = vpop.eup %4110 }
 0x6ac   :  { %v4113_v40 = vpop.eup %4112 }
 0x6ad   :  { %3753 = vmatpush3.xpose.msk.msra.mxu0 %vm2659_vm2, %v4091_v26 }
 0x6ae   :  { %3754 = vmatprep.subr.mxu0 %v4193_v54 }
 0x6b1   :  { %3755 = vmatpush3.xpose.msk.msra.mxu0 %vm2659_vm2, %v4093_v7 }
 0x6b2   :  { %3756 = vmatprep.subr.mxu0 %v4193_v54 }
 0x6b5   :  { %3757 = vmatpush3.xpose.msk.msra.mxu0 %vm2659_vm2, %v4095_v45 }
 0x6b6   :  { %3758 = vmatprep.subr.mxu0 %v4193_v54 }
 0x6b9   :  { %3759 = vmatpush3.xpose.msk.msra.mxu0 %vm2659_vm2, %v4097_v27 }
 0x6ba   :  { %3760 = vmatprep.subr.mxu0 %v4193_v54 }
 0x6bd   :  { %3761 = vmatpush3.xpose.msk.msra.mxu0 %vm2659_vm2, %v4099_v47 }
 0x6be   :  { %3762 = vmatprep.subr.mxu0 %v4193_v54 }
 0x6c1   :  { %3763 = vmatpush3.xpose.msk.msra.mxu0 %vm2659_vm2, %v4101_v16 }
 0x6c2   :  { %3764 = vmatprep.subr.mxu0 %v4193_v54 }
 0x6c5   :  { %3765 = vmatpush3.xpose.msk.msra.mxu0 %vm2659_vm2, %v4103_v4 }
 0x6c6   :  { %3766 = vmatprep.subr.mxu0 %v4193_v54 }
 0x6c9   :  { %3767 = vmatpush3.xpose.msk.msra.mxu0 %vm2659_vm2, %v4105_v52 }
 0x6ca   :  { %3768 = vmatprep.subr.mxu0 %v4193_v54 }
 0x6cd   :  { %3769 = vmatpush3.xpose.msk.msra.mxu0 %vm2659_vm2, %v4107_v46 }
 0x6ce   :  { %3770 = vmatprep.subr.mxu0 %v4193_v54 }
 0x6d1   :  { %3771 = vmatpush3.xpose.msk.msra.mxu0 %vm2659_vm2, %v4109_v10 }
 0x6d2   :  { %3772 = vmatprep.subr.mxu0 %v4193_v54 }
 0x6d5   :  { %3773 = vmatpush3.xpose.msk.msra.mxu0 %vm2659_vm2, %v4111_v55 }
 0x6d6   :  { %3774 = vmatprep.subr.mxu0 %v4193_v54 }
 0x6d9   :  { %3775 = vmatpush3.xpose.msk.msra.mxu0 %vm2659_vm2, %v4113_v40 }
 0x6da   :  { %3814 = vmatprep.subr.mxu0 %v4193_v54 }
 0x6dc   :  { %3777 = vmatmul.mubr.msk.f32.vlgmr.msra.gmra.mxu0 %vm2659_vm2, %v26_v61 }
 0x6dd   :  { %3818 = vmatprep.mubr.msk.f32.mxu0 %vm4194_vm1, %v4193_v54 }
 0x79c   :  { %v2777_v1 = vpop.f32.mrf.mxu0 }
 0x79d   :  { %v2784_v14 = vrot.slane %v2777_v1, %v2783_v42 }
 0x79e   :  { %v3778_v37 = vpop.f32.mrf.mxu0 }
 0x79f   :  { %v2785_v32 = vadd.f32 %v2784_v14, %v155_v34  ;;  %v2786_v48 = vadd.f32 %v2784_v14, %v156_v17 }
 0x7a1   :  { %2789 = vmax.xlane.f32.xlu0 %v2786_v48  ;;  %2787 = vmax.xlane.f32.xlu1 %v2785_v32 }
 0x82a   :  { %v2790_v58 = vpop.xlane.xlu0 %2789  ;;  %v2788_v33 = vpop.xlane.xlu1 %2787 }
 0x82b   :  { %v2792_v35 = vsub.f32 %v2786_v48, %v2790_v58  ;;  %v2791_v21 = vsub.f32 %v2785_v32, %v2788_v33 }
 0x82d   :  { %v2795_v49 = vmul.f32 1.442695, %v2792_v35  ;;  %v2793_v23 = vmul.f32 1.442695, %v2791_v21 }
 0x82f   :  { %4114 = vpow2.f32 %v2795_v49 }
 0x830   :  { %4116 = vpow2.f32 %v2793_v23 }
 0x83c   :  { %v4115_v51 = vpop.eup %4114 }
 0x83d   :  { %v4117_v41 = vpop.eup %4116  ;;  %2799 = vadd.xlane.f32.xlu0 %v4115_v51 }
 0x83e   :  { %2797 = vadd.xlane.f32.xlu1 %v4117_v41 }
 0x8c6   :  { %v2800_v8 = vpop.xlane.xlu0 %2799 }
 0x8c7   :  { %4118 = vrcp.f32 %v2800_v8  ;;  %v2798_v0 = vpop.xlane.xlu1 %2797 }
 0x8c8   :  { %4120 = vrcp.f32 %v2798_v0 }
 0x8d4   :  { %v4119_v43 = vpop.eup %4118 }
 0x8d5   :  { %v4121_v63 = vpop.eup %4120  ;;  %v2804_v50 = vmul.f32 %v4119_v43, %v4115_v51 }
 0x8d6   :  { %v2802_v20 = vmul.f32 %v4121_v63, %v4117_v41 }
 0x8d8   :  { %3811 = vmatprep.mubr.f32.mxu1 %v2802_v20 }
 0x8d9   :  { %3812 = vmatmul.mubr.f32.vlgmr.msra.gmra.mxu1 %v2804_v50 }
 0x999   :  { %v3813_v22 = vpop.f32.mrf.mxu1 }
 0x99a   :  { %v2881_v28 = vmul.f32 %v3813_v22, %v406_v11 }
 0x99b   :  { %v2871_v53 = vpop.f32.mrf.mxu1 }
 0x99c   :  { %3815 = vmatpush3.xpose.msk.msra.mxu0 %vm179_vm0, %v2881_v28  ;;  %v2880_v19 = vmul.f32 %v2871_v53, %v405_v5 }
 0x99d   :  { %3816 = vmatprep.subr.mxu0 %v4193_v54 }
 0x9a0   :  { %3817 = vmatpush3.xpose.msk.msra.mxu0 %vm179_vm0, %v2880_v19 }
 0x9a3   :  { %3819 = vmatmul.mubr.msk.f32.vlgmr.msra.gmra.mxu0 %vm179_vm0, %v4195_v38 }
 0xa63   :  { %v2957_v2 = vpop.f32.mrf.mxu0 }
 0xa64   :  { %v2961_v9 = vsub.f32 0.0, %v2957_v2 }
 0xa65   :  { %v3820_v31 = vpop.f32.mrf.mxu0 }
 0xa66   :  { %v2962_v44 = vmul.f32 1.442695, %v2961_v9 }
 0xa68   :  { %4122 = vpow2.f32 %v2962_v44 }
 0xa75   :  { %v4123_v6 = vpop.eup %4122 }
 0xa76   :  { %v2964_v62 = vadd.f32 1.0, %v4123_v6 }
 0xa78   :  { %4124 = vrcp.f32 %v2964_v62 }
 0xa85   :  { %v4125_v12 = vpop.eup %4124 }
 0xa86   :  { %v2970_v26 = vrot.slane %v4125_v12, %v2783_v42 }
 0xa88   :  { %2971 = vst.msk [vmem:[%s5990_s2] sm:$0xff] %vm2659_vm2, %v2970_v26 }

</bundles_post_ra>
